<compile_context>
chip_gen: v7x
topology: tpu7x:2x2x1
jax: 0.10.0
libtpu: 0.0.40
codegen_flags: <defaults>
</compile_context>

<pallas_src>
import functools

import jax
import jax.numpy as jnp
from jax.experimental import pallas as pl
from jax.experimental.pallas import tpu as pltpu


# --------------------------------------------------------------------------
# Kernel
# --------------------------------------------------------------------------
def _se_kernel(x_ref, w1_ref, b1_ref, w2_ref, b2_ref,
               out_ref, mean_ref, std_ref,
               acc_ref, scale_ref, *, HW):
    """Two-pass SE kernel.  Grid = (B_tiles, pass, HW_tiles).

      x_ref    : (B_tile, C, hw_tile)  NCHW-native tile (C on sublanes)
      w1_ref   : (C, C_mid)            fc1 weight^T with 1/HW folded in
      b1_ref   : (1, C_mid)
      w2_ref   : (C_mid, 2C)           fc2 weight^T, cols pre-permuted [::2 | 1::2]
      b2_ref   : (1, 2C)               same permutation
      out_ref  : (B_tile, C, hw_tile)
      mean_ref : (1, B_tile, C)        lane-dense SE outputs
      std_ref  : (1, B_tile, C)
      acc_ref  : (B_tile, C) f32       pooled-sum accumulator  (scratch)
      scale_ref: (B_tile, C) f32       exact f32 scale for pass 1 (scratch)
    """
    p = pl.program_id(1)          # 0: pool + squeeze/excite, 1: apply scale
    t = pl.program_id(2)          # HW tile index (pass 1 walks tiles reversed)
    n_hw = pl.num_programs(2)
    B_tile, C, hw_tile = x_ref.shape
    ragged = (HW % hw_tile) != 0  # static

    # ---- pass 0, first HW tile: reset the pooled-sum accumulator ----------
    @pl.when((p == 0) & (t == 0))
    def _():
        acc_ref[...] = jnp.zeros(acc_ref.shape, acc_ref.dtype)

    # ---- pass 0: block-wide per-channel spatial sum for this HW tile ------
    @pl.when(p == 0)
    def _():
        x32 = x_ref[...].astype(jnp.float32)            # (B_tile, C, hw_tile)
        if ragged:
            # only the final HW tile has out-of-range lanes to mask
            @pl.when(t == n_hw - 1)
            def _():
                lane = jax.lax.broadcasted_iota(jnp.int32, x32.shape, 2)
                valid = lane < (HW - t * hw_tile)
                acc_ref[...] += jnp.sum(jnp.where(valid, x32, 0.0), axis=-1)

            @pl.when(t < n_hw - 1)
            def _():
                acc_ref[...] += jnp.sum(x32, axis=-1)
        else:
            acc_ref[...] += jnp.sum(x32, axis=-1)

    # ---- pass 0, last HW tile: squeeze/excite on the pooled (B_tile, C) ---
    @pl.when((p == 0) & (t == n_hw - 1))
    def _():
        m = acc_ref[...]                                 # sums; 1/HW folded in w1
        h = jnp.dot(m, w1_ref[...],
                    preferred_element_type=jnp.float32) + b1_ref[...]
        h = jnp.maximum(h, 0.0)                          # (B_tile, C_mid)
        s = jnp.dot(h, w2_ref[...],
                    preferred_element_type=jnp.float32) + b2_ref[...]
        s = jax.nn.sigmoid(s)                            # (B_tile, 2C)
        scale_ref[...] = s[:, :C]                        # exact f32 scale for pass 1
        mean_ref[0] = s[:, :C].astype(mean_ref.dtype)    # == torch s[:, ::2]
        std_ref[0] = s[:, C:].astype(std_ref.dtype)      # == torch s[:, 1::2]

    # ---- pass 1: (re-)stream x and scale each channel row by its mean -----
    @pl.when(p == 1)
    def _():
        x32 = x_ref[...].astype(jnp.float32)             # (B_tile, C, hw_tile)
        scale = scale_ref[...]                           # (B_tile, C) f32
        out_ref[...] = (x32 * scale[:, :, None]).astype(out_ref.dtype)


# --------------------------------------------------------------------------
# Planning helpers
# --------------------------------------------------------------------------
def _tpu_vmem_and_cores():
    """VMEM capacity + a megacore heuristic (v7x: 64 MiB/core, 2 cores)."""
    vmem_cap = None
    try:
        info = pltpu.get_tpu_info()
        vmem_cap = int(getattr(info, "vmem_capacity_bytes", 0)) or None
    except Exception:
        vmem_cap = None
    if vmem_cap is None:
        vmem_cap = 64 << 20          # conservative default, safe on every gen
    num_cores = 2 if vmem_cap <= (64 << 20) else 1
    return vmem_cap, num_cores


def _plan(B, C, C_mid, HW, itemsize, num_cores, vmem_cap,
          max_block_bytes, allow_single_buffer):
    # Batch tile: as large as possible but expose >= num_cores steps on the
    # parallel batch axis (feeds both v7x TensorCores; near-free elsewhere).
    max_tile = B if B < num_cores else max(1, min(8, B // num_cores))
    B_tile = max(d for d in range(1, max_tile + 1) if B % d == 0)
    B_tiles = B // B_tile

    # VMEM budget: ~75% of physical capacity -> ~48 MiB (v7x), ~96 MiB (v5e/v6e)
    vmem_budget = (vmem_cap // 4) * 3
    w_bytes = 2 * 4 * (C * C_mid + C_mid + C_mid * 2 * C + 2 * C)     # 2x-buffered weights
    small_bytes = 2 * 2 * B_tile * C * itemsize + 2 * B_tile * C * 4  # mean/std blocks + scratch
    overhead = w_bytes + small_bytes + (2 << 20)                      # + compiler slack

    per_hw = B_tile * C * itemsize       # bytes per HW lane of one x/out block
    per_hw_f32 = B_tile * C * 4          # per lane of an f32 compute temporary

    def fits(n_buf, hw_t):
        blk = per_hw * hw_t
        if max_block_bytes is not None and blk > max_block_bytes:
            return False
        return n_buf * 2 * blk + 2 * per_hw_f32 * hw_t + overhead <= vmem_budget

    if allow_single_buffer and B_tiles == 1 and fits(1, HW):
        hw_tile, n_buf = HW, 1           # whole slab resident, single-buffered: 1R + 1W
    elif fits(2, HW):
        hw_tile, n_buf = HW, 2           # whole slab resident, default pipeline
    else:
        n_buf = 2                        # streamed two-pass: 2R + 1W, lane-dense tiles
        cap = (vmem_budget - overhead) // (4 * per_hw + 2 * per_hw_f32)
        if max_block_bytes is not None:
            cap = min(cap, max_block_bytes // per_hw)
        hw_tile = min(HW, max(128, (int(cap) // 128) * 128))
    n_hw = -(-HW // hw_tile)

    vmem_est = n_buf * 2 * per_hw * hw_tile + 2 * per_hw_f32 * hw_tile + overhead
    vmem_limit = int(min(max(vmem_est, 32 << 20), vmem_budget))
    return B_tile, B_tiles, hw_tile, n_hw, n_buf, vmem_limit


# --------------------------------------------------------------------------
# Wrapper
# --------------------------------------------------------------------------
def se_module_forward(x, w1, b1, w2, b2, *, max_block_bytes=None):
    """x: (B, C, H, W).  w1: (C_mid, C, 1, 1), b1: (C_mid,),
    w2: (2C, C_mid, 1, 1), b2: (2C,).  Returns (x*mean, (mean, std))."""
    B, C, H, W = x.shape
    HW = H * W
    C_mid = w1.shape[0]
    itemsize = x.dtype.itemsize

    # --- parameter plumbing (tiny, once, outside the kernel) ---------------
    # Column-permute fc2 so cols [0, C) are the even (mean) outputs and
    # [C, 2C) the odd (std) outputs; fold 1/HW of the spatial mean into fc1.
    perm = jnp.concatenate([jnp.arange(0, 2 * C, 2), jnp.arange(1, 2 * C, 2)])
    w1t = (w1.reshape(C_mid, C).astype(jnp.float32) / HW).T           # (C, C_mid)
    b1r = b1.reshape(1, C_mid).astype(jnp.float32)                    # (1, C_mid)
    w2t = w2.reshape(2 * C, C_mid)[perm].astype(jnp.float32).T        # (C_mid, 2C)
    b2r = b2[perm].reshape(1, 2 * C).astype(jnp.float32)              # (1, 2C)

    # Free reshape only -- no NCHW <-> NHWC transpose of the big tensor.
    x_r = x.reshape(B, C, HW)

    vmem_cap, num_cores = _tpu_vmem_and_cores()
    kernel = functools.partial(_se_kernel, HW=HW)

    def run(allow_single_buffer):
        (B_tile, B_tiles, hw_tile, n_hw, n_buf, vmem_limit) = _plan(
            B, C, C_mid, HW, itemsize, num_cores, vmem_cap,
            max_block_bytes, allow_single_buffer)

        # Pass 0 walks HW tiles forward; pass 1 walks them in reverse so the
        # first pass-1 tile reuses the block left resident by pass 0.
        def x_map(b, p, t):
            return (b, 0, (1 - p) * t + p * (n_hw - 1 - t))

        # During p == 0 park the (unwritten) out block on the tile that
        # pass 1 writes first, so no garbage block is ever flushed to HBM.
        def out_map(b, p, t):
            return (b, 0, n_hw - 1 - p * t)

        if n_buf == 1:
            x_in_spec = pl.BlockSpec((B_tile, C, hw_tile), x_map,
                                     pipeline_mode=pl.Buffered(1))
            x_out_spec = pl.BlockSpec((B_tile, C, hw_tile), out_map,
                                      pipeline_mode=pl.Buffered(1))
        else:
            x_in_spec = pl.BlockSpec((B_tile, C, hw_tile), x_map)
            x_out_spec = pl.BlockSpec((B_tile, C, hw_tile), out_map)

        call = pl.pallas_call(
            kernel,
            out_shape=(
                jax.ShapeDtypeStruct((B, C, HW), x.dtype),
                jax.ShapeDtypeStruct((B_tiles, B_tile, C), x.dtype),
                jax.ShapeDtypeStruct((B_tiles, B_tile, C), x.dtype),
            ),
            grid_spec=pltpu.PrefetchScalarGridSpec(
                num_scalar_prefetch=0,
                grid=(B_tiles, 2, n_hw),            # (batch tiles, pass, HW tiles)
                in_specs=[
                    x_in_spec,
                    pl.BlockSpec((C, C_mid), lambda b, p, t: (0, 0)),
                    pl.BlockSpec((1, C_mid), lambda b, p, t: (0, 0)),
                    pl.BlockSpec((C_mid, 2 * C), lambda b, p, t: (0, 0)),
                    pl.BlockSpec((1, 2 * C), lambda b, p, t: (0, 0)),
                ],
                out_specs=[
                    x_out_spec,
                    pl.BlockSpec((1, B_tile, C), lambda b, p, t: (b, 0, 0)),
                    pl.BlockSpec((1, B_tile, C), lambda b, p, t: (b, 0, 0)),
                ],
                scratch_shapes=[
                    pltpu.VMEM((B_tile, C), jnp.float32),   # pooled sums
                    pltpu.VMEM((B_tile, C), jnp.float32),   # f32 scale
                ],
            ),
            compiler_params=pltpu.CompilerParams(
                dimension_semantics=("parallel", "arbitrary", "arbitrary"),
                vmem_limit_bytes=vmem_limit,
            ),
        )
        return call(x_r, w1t, b1r, w2t, b2r), n_buf

    try:
        (out_r, mean_t, std_t), n_buf = run(allow_single_buffer=True)
        if n_buf == 1:
            # Surface any issue with the single-buffer mode so the fallback engages.
            jax.block_until_ready((out_r, mean_t, std_t))
    except Exception:
        # pl.Buffered(1) (or the tighter plan) not supported on this jax/TPU
        # combination: rebuild with the default double-buffered pipeline.
        (out_r, mean_t, std_t), _ = run(allow_single_buffer=False)

    # Back to PyTorch shapes; all reshapes are layout-free.
    out = out_r.reshape(B, C, H, W)
    mean = mean_t.reshape(B, C, 1, 1)
    std = std_t.reshape(B, C, 1, 1)
    return out, (mean, std)


# --------------------------------------------------------------------------
# Pure-JAX reference matching the PyTorch eval forward
# --------------------------------------------------------------------------
def ref_forward(x, w1, b1, w2, b2):
    B, C, H, W = x.shape
    C_mid = w1.shape[0]
    m = x.mean((2, 3), keepdims=True)                               # (B,C,1,1)
    y1 = jnp.einsum('bcij,dc->bdij', m, w1.reshape(C_mid, C)) + b1.reshape(1, -1, 1, 1)
    y1 = jnp.maximum(y1, 0.0)
    y2 = jnp.einsum('bcij,dc->bdij', y1, w2.reshape(2 * C, C_mid)) + b2.reshape(1, -1, 1, 1)
    s = jax.nn.sigmoid(y2)
    mean = s[:, ::2]
    std = s[:, 1::2]
    return x * mean, (mean, std)


if __name__ == "__main__":
    # SEModule(channels=128, reduction_=40) -> reduction = 4: fc1 128->32, fc2 32->256
    # (default reduction_=1 divides by zero in PyTorch, so pick a valid one)
    B, C, H, W = 2, 128, 8, 8
    reduction = 4
    C_mid = C // reduction

    key = jax.random.PRNGKey(0)
    kx, k1, k2, k3, k4, kx2, kx3 = jax.random.split(key, 7)
    x = jax.random.normal(kx, (B, C, H, W), dtype=jnp.float32)
    w1 = jax.random.normal(k1, (C_mid, C, 1, 1), dtype=jnp.float32) * 0.05
    b1 = jax.random.normal(k2, (C_mid,), dtype=jnp.float32) * 0.05
    w2 = jax.random.normal(k3, (2 * C, C_mid, 1, 1), dtype=jnp.float32) * 0.05
    b2 = jax.random.normal(k4, (2 * C,), dtype=jnp.float32) * 0.05

    def check(xv, **kw):
        out, (mean, std) = se_module_forward(xv, w1, b1, w2, b2, **kw)
        jax.block_until_ready((out, mean, std))
        out_r, (mean_r, std_r) = ref_forward(xv, w1, b1, w2, b2)
        assert jnp.allclose(out, out_r, rtol=1e-5, atol=1e-5)
        assert jnp.allclose(mean, mean_r, rtol=1e-5, atol=1e-5)
        assert jnp.allclose(std, std_r, rtol=1e-5, atol=1e-5)

    # 1) whole-slab resident fast path (1 read + 1 write of x).
    check(x)

    # 2) streamed two-pass path with a ragged last HW tile (tiny forced budget).
    x2 = jax.random.normal(kx2, (B, C, 12, 12), dtype=jnp.float32)
    check(x2, max_block_bytes=64 * 1024)

    # 3) multiple batch tiles (exercises the (B_tiles, B_tile, C) mean/std blocks).
    x3 = jax.random.normal(kx3, (16, C, 8, 8), dtype=jnp.float32)
    check(x3)

    print("KERNEL_OK")
</pallas_src>

<mosaic_0001>
module attributes {stable_mosaic.version = 11 : i64} {
  func.func @_se_kernel(%arg0: i32, %arg1: i32, %arg2: i32, %arg3: memref<1x128x64xf32, #tpu.memory_space<vmem>>, %arg4: memref<128x32xf32, #tpu.memory_space<vmem>>, %arg5: memref<1x32xf32, #tpu.memory_space<vmem>>, %arg6: memref<32x256xf32, #tpu.memory_space<vmem>>, %arg7: memref<1x256xf32, #tpu.memory_space<vmem>>, %arg8: memref<1x128x64xf32, #tpu.memory_space<vmem>>, %arg9: memref<1x1x128xf32, #tpu.memory_space<vmem>>, %arg10: memref<1x1x128xf32, #tpu.memory_space<vmem>>, %arg11: memref<1x128xf32, #tpu.memory_space<vmem>>, %arg12: memref<1x128xf32, #tpu.memory_space<vmem>>) attributes {dimension_semantics = [#tpu.dimension_semantics<parallel>, #tpu.dimension_semantics<arbitrary>, #tpu.dimension_semantics<arbitrary>], iteration_bounds = array<i64: 2, 2, 1>, scalar_prefetch = 0 : i64, scratch_operands = 2 : i64, tpu.core_type = #tpu.core_type<tc>, window_params = [{transform_indices = @transform_0, window_bounds = array<i64: 1, 128, 64>}, {pipeline_mode = #tpu.pipeline_mode<synchronous>, transform_indices = @transform_1, window_bounds = array<i64: 128, 32>}, {pipeline_mode = #tpu.pipeline_mode<synchronous>, transform_indices = @transform_2, window_bounds = array<i64: 1, 32>}, {pipeline_mode = #tpu.pipeline_mode<synchronous>, transform_indices = @transform_3, window_bounds = array<i64: 32, 256>}, {pipeline_mode = #tpu.pipeline_mode<synchronous>, transform_indices = @transform_4, window_bounds = array<i64: 1, 256>}, {transform_indices = @transform_5, window_bounds = array<i64: 1, 128, 64>}, {transform_indices = @transform_6, window_bounds = array<i64: 1, 1, 128>}, {transform_indices = @transform_7, window_bounds = array<i64: 1, 1, 128>}]} {
    %c0_i32 = arith.constant 0 : i32
    %0 = arith.cmpi eq, %arg1, %c0_i32 : i32
    %c0_i32_0 = arith.constant 0 : i32
    %1 = arith.cmpi eq, %arg2, %c0_i32_0 : i32
    %2 = arith.andi %0, %1 : i1
    %3 = arith.extui %2 : i1 to i32
    %c0_i32_1 = arith.constant 0 : i32
    %4 = arith.cmpi ne, %3, %c0_i32_1 : i32
    scf.if %4 {
      %cst = arith.constant 0.000000e+00 : f32
      %16 = vector.broadcast %cst : f32 to vector<1x128xf32>
      %c0 = arith.constant 0 : index
      %c0_8 = arith.constant 0 : index
      %17 = vector.load %arg11[%c0, %c0_8] : memref<1x128xf32, #tpu.memory_space<vmem>>, vector<1x128xf32>
      tpu.vector_store %arg11[%c0, %c0_8], %16 {strides = array<i32>} : memref<1x128xf32, #tpu.memory_space<vmem>>, vector<1x128xf32>,
    } else {
    }
    %c0_i32_2 = arith.constant 0 : i32
    %5 = arith.cmpi eq, %arg1, %c0_i32_2 : i32
    %6 = arith.extui %5 : i1 to i32
    %c0_i32_3 = arith.constant 0 : i32
    %7 = arith.cmpi ne, %6, %c0_i32_3 : i32
    scf.if %7 {
      %c0 = arith.constant 0 : index
      %c0_8 = arith.constant 0 : index
      %c0_9 = arith.constant 0 : index
      %16 = vector.load %arg3[%c0, %c0_8, %c0_9] : memref<1x128x64xf32, #tpu.memory_space<vmem>>, vector<1x128x64xf32>
      %c0_10 = arith.constant 0 : index
      %c0_11 = arith.constant 0 : index
      %17 = vector.load %arg11[%c0_10, %c0_11] : memref<1x128xf32, #tpu.memory_space<vmem>>, vector<1x128xf32>
      %cst = arith.constant dense<0.000000e+00> : vector<1x128xf32>
      %18 = vector.multi_reduction <add>, %16, %cst [2] : vector<1x128x64xf32> to vector<1x128xf32>
      %19 = arith.addf %17, %18 : vector<1x128xf32>
      %c0_12 = arith.constant 0 : index
      %c0_13 = arith.constant 0 : index
      %20 = vector.load %arg11[%c0_12, %c0_13] : memref<1x128xf32, #tpu.memory_space<vmem>>, vector<1x128xf32>
      tpu.vector_store %arg11[%c0_12, %c0_13], %19 {strides = array<i32>} : memref<1x128xf32, #tpu.memory_space<vmem>>, vector<1x128xf32>,
    } else {
    }
    %c0_i32_4 = arith.constant 0 : i32
    %8 = arith.cmpi eq, %arg1, %c0_i32_4 : i32
    %c0_i32_5 = arith.constant 0 : i32
    %9 = arith.cmpi eq, %arg2, %c0_i32_5 : i32
    %10 = arith.andi %8, %9 : i1
    %11 = arith.extui %10 : i1 to i32
    %c0_i32_6 = arith.constant 0 : i32
    %12 = arith.cmpi ne, %11, %c0_i32_6 : i32
    scf.if %12 {
      %c0 = arith.constant 0 : index
      %c0_8 = arith.constant 0 : index
      %16 = vector.load %arg11[%c0, %c0_8] : memref<1x128xf32, #tpu.memory_space<vmem>>, vector<1x128xf32>
      %c0_9 = arith.constant 0 : index
      %c0_10 = arith.constant 0 : index
      %17 = vector.load %arg4[%c0_9, %c0_10] : memref<128x32xf32, #tpu.memory_space<vmem>>, vector<128x32xf32>
      %cst = arith.constant dense<0.000000e+00> : vector<1x32xf32>
      %18 = tpu.matmul %16, %17, %cst {dimension_numbers = #tpu.dot_dimension_numbers<[1], [0], [0], [1], [0, 0, 1, 1], [], []>} : vector<1x128xf32>, vector<128x32xf32>, vector<1x32xf32> -> vector<1x32xf32>
      %c0_11 = arith.constant 0 : index
      %c0_12 = arith.constant 0 : index
      %19 = vector.load %arg5[%c0_11, %c0_12] : memref<1x32xf32, #tpu.memory_space<vmem>>, vector<1x32xf32>
      %20 = arith.addf %18, %19 : vector<1x32xf32>
      %cst_13 = arith.constant 0.000000e+00 : f32
      %21 = vector.broadcast %cst_13 : f32 to vector<1x32xf32>
      %22 = arith.maximumf %20, %21 : vector<1x32xf32>
      %c0_14 = arith.constant 0 : index
      %c0_15 = arith.constant 0 : index
      %23 = vector.load %arg6[%c0_14, %c0_15] : memref<32x256xf32, #tpu.memory_space<vmem>>, vector<32x256xf32>
      %cst_16 = arith.constant dense<0.000000e+00> : vector<1x256xf32>
      %24 = tpu.matmul %22, %23, %cst_16 {dimension_numbers = #tpu.dot_dimension_numbers<[1], [0], [0], [1], [0, 0, 1, 1], [], []>} : vector<1x32xf32>, vector<32x256xf32>, vector<1x256xf32> -> vector<1x256xf32>
      %c0_17 = arith.constant 0 : index
      %c0_18 = arith.constant 0 : index
      %25 = vector.load %arg7[%c0_17, %c0_18] : memref<1x256xf32, #tpu.memory_space<vmem>>, vector<1x256xf32>
      %26 = arith.addf %24, %25 : vector<1x256xf32>
      %27 = arith.negf %26 : vector<1x256xf32>
      %28 = math.exp %27 : vector<1x256xf32>
      %cst_19 = arith.constant 1.000000e+00 : f32
      %29 = vector.broadcast %cst_19 : f32 to vector<1x256xf32>
      %30 = arith.addf %29, %28 : vector<1x256xf32>
      %31 = arith.divf %29, %30 : vector<1x256xf32>
      %32 = vector.extract_strided_slice %31 {offsets = [0, 0], sizes = [1, 128], strides = [1, 1]} : vector<1x256xf32> to vector<1x128xf32>
      %c0_20 = arith.constant 0 : index
      %c0_21 = arith.constant 0 : index
      %33 = vector.load %arg12[%c0_20, %c0_21] : memref<1x128xf32, #tpu.memory_space<vmem>>, vector<1x128xf32>
      tpu.vector_store %arg12[%c0_20, %c0_21], %32 {strides = array<i32>} : memref<1x128xf32, #tpu.memory_space<vmem>>, vector<1x128xf32>,
      %34 = vector.extract_strided_slice %31 {offsets = [0, 0], sizes = [1, 128], strides = [1, 1]} : vector<1x256xf32> to vector<1x128xf32>
      %c0_22 = arith.constant 0 : index
      %c0_23 = arith.constant 0 : index
      %c0_24 = arith.constant 0 : index
      %35 = vector.load %arg9[%c0_22, %c0_23, %c0_24] : memref<1x1x128xf32, #tpu.memory_space<vmem>>, vector<1x1x128xf32>
      %36 = vector.shape_cast %35 : vector<1x1x128xf32> to vector<1x128xf32>
      %37 = vector.shape_cast %34 : vector<1x128xf32> to vector<1x1x128xf32>
      tpu.vector_store %arg9[%c0_22, %c0_23, %c0_24], %37 {strides = array<i32>} : memref<1x1x128xf32, #tpu.memory_space<vmem>>, vector<1x1x128xf32>,
      %38 = vector.extract_strided_slice %31 {offsets = [0, 128], sizes = [1, 128], strides = [1, 1]} : vector<1x256xf32> to vector<1x128xf32>
      %c0_25 = arith.constant 0 : index
      %c0_26 = arith.constant 0 : index
      %c0_27 = arith.constant 0 : index
      %39 = vector.load %arg10[%c0_25, %c0_26, %c0_27] : memref<1x1x128xf32, #tpu.memory_space<vmem>>, vector<1x1x128xf32>
      %40 = vector.shape_cast %39 : vector<1x1x128xf32> to vector<1x128xf32>
      %41 = vector.shape_cast %38 : vector<1x128xf32> to vector<1x1x128xf32>
      tpu.vector_store %arg10[%c0_25, %c0_26, %c0_27], %41 {strides = array<i32>} : memref<1x1x128xf32, #tpu.memory_space<vmem>>, vector<1x1x128xf32>,
    } else {
    }
    %c1_i32 = arith.constant 1 : i32
    %13 = arith.cmpi eq, %arg1, %c1_i32 : i32
    %14 = arith.extui %13 : i1 to i32
    %c0_i32_7 = arith.constant 0 : i32
    %15 = arith.cmpi ne, %14, %c0_i32_7 : i32
    scf.if %15 {
      %c0 = arith.constant 0 : index
      %c0_8 = arith.constant 0 : index
      %c0_9 = arith.constant 0 : index
      %16 = vector.load %arg3[%c0, %c0_8, %c0_9] : memref<1x128x64xf32, #tpu.memory_space<vmem>>, vector<1x128x64xf32>
      %c0_10 = arith.constant 0 : index
      %c0_11 = arith.constant 0 : index
      %17 = vector.load %arg12[%c0_10, %c0_11] : memref<1x128xf32, #tpu.memory_space<vmem>>, vector<1x128xf32>
      %18 = vector.shape_cast %17 : vector<1x128xf32> to vector<1x128x1xf32>
      %19 = vector.broadcast %18 : vector<1x128x1xf32> to vector<1x128x64xf32>
      %20 = arith.mulf %16, %19 : vector<1x128x64xf32>
      %c0_12 = arith.constant 0 : index
      %c0_13 = arith.constant 0 : index
      %c0_14 = arith.constant 0 : index
      %21 = vector.load %arg8[%c0_12, %c0_13, %c0_14] : memref<1x128x64xf32, #tpu.memory_space<vmem>>, vector<1x128x64xf32>
      tpu.vector_store %arg8[%c0_12, %c0_13, %c0_14], %20 {strides = array<i32>} : memref<1x128x64xf32, #tpu.memory_space<vmem>>, vector<1x128x64xf32>,
    } else {
    }
    return
  }
  func.func @transform_0(%arg0: i32, %arg1: i32, %arg2: i32) -> (i32, i32, i32) {
    %c1_i32 = arith.constant 1 : i32
    %0 = arith.subi %c1_i32, %arg1 : i32
    %1 = arith.muli %0, %arg2 : i32
    %c0_i32 = arith.constant 0 : i32
    %2 = arith.subi %c0_i32, %arg2 : i32
    %3 = arith.muli %arg1, %2 : i32
    %4 = arith.addi %1, %3 : i32
    %c0_i32_0 = arith.constant 0 : i32
    %c0_i32_1 = arith.constant 0 : i32
    return %arg0, %c0_i32_0, %4 : i32, i32, i32
  }
  func.func @transform_1(%arg0: i32, %arg1: i32, %arg2: i32) -> (i32, i32) {
    %c0_i32 = arith.constant 0 : i32
    %c0_i32_0 = arith.constant 0 : i32
    %c0_i32_1 = arith.constant 0 : i32
    return %c0_i32, %c0_i32_0 : i32, i32
  }
  func.func @transform_2(%arg0: i32, %arg1: i32, %arg2: i32) -> (i32, i32) {
    %c0_i32 = arith.constant 0 : i32
    %c0_i32_0 = arith.constant 0 : i32
    %c0_i32_1 = arith.constant 0 : i32
    return %c0_i32, %c0_i32_0 : i32, i32
  }
  func.func @transform_3(%arg0: i32, %arg1: i32, %arg2: i32) -> (i32, i32) {
    %c0_i32 = arith.constant 0 : i32
    %c0_i32_0 = arith.constant 0 : i32
    %c0_i32_1 = arith.constant 0 : i32
    return %c0_i32, %c0_i32_0 : i32, i32
  }
  func.func @transform_4(%arg0: i32, %arg1: i32, %arg2: i32) -> (i32, i32) {
    %c0_i32 = arith.constant 0 : i32
    %c0_i32_0 = arith.constant 0 : i32
    %c0_i32_1 = arith.constant 0 : i32
    return %c0_i32, %c0_i32_0 : i32, i32
  }
  func.func @transform_5(%arg0: i32, %arg1: i32, %arg2: i32) -> (i32, i32, i32) {
    %0 = arith.muli %arg1, %arg2 : i32
    %c0_i32 = arith.constant 0 : i32
    %1 = arith.subi %c0_i32, %0 : i32
    %c0_i32_0 = arith.constant 0 : i32
    %c0_i32_1 = arith.constant 0 : i32
    return %arg0, %c0_i32_0, %1 : i32, i32, i32
  }
  func.func @transform_6(%arg0: i32, %arg1: i32, %arg2: i32) -> (i32, i32, i32) {
    %c0_i32 = arith.constant 0 : i32
    %c0_i32_0 = arith.constant 0 : i32
    %c0_i32_1 = arith.constant 0 : i32
    return %arg0, %c0_i32, %c0_i32_0 : i32, i32, i32
  }
  func.func @transform_7(%arg0: i32, %arg1: i32, %arg2: i32) -> (i32, i32, i32) {
    %c0_i32 = arith.constant 0 : i32
    %c0_i32_0 = arith.constant 0 : i32
    %c0_i32_1 = arith.constant 0 : i32
    return %arg0, %c0_i32, %c0_i32_0 : i32, i32, i32
  }
}

module attributes {stable_mosaic.version = 11 : i64} {
  func.func @_se_kernel(%arg0: i32, %arg1: i32, %arg2: i32, %arg3: memref<1x128x64xf32, #tpu.memory_space<vmem>>, %arg4: memref<128x32xf32, #tpu.memory_space<vmem>>, %arg5: memref<1x32xf32, #tpu.memory_space<vmem>>, %arg6: memref<32x256xf32, #tpu.memory_space<vmem>>, %arg7: memref<1x256xf32, #tpu.memory_space<vmem>>, %arg8: memref<1x128x64xf32, #tpu.memory_space<vmem>>, %arg9: memref<1x1x128xf32, #tpu.memory_space<vmem>>, %arg10: memref<1x1x128xf32, #tpu.memory_space<vmem>>, %arg11: memref<1x128xf32, #tpu.memory_space<vmem>>, %arg12: memref<1x128xf32, #tpu.memory_space<vmem>>) attributes {dimension_semantics = [#tpu.dimension_semantics<parallel>, #tpu.dimension_semantics<arbitrary>, #tpu.dimension_semantics<arbitrary>], iteration_bounds = array<i64: 2, 2, 1>, scalar_prefetch = 0 : i64, scratch_operands = 2 : i64, tpu.core_type = #tpu.core_type<tc>, window_params = [{transform_indices = @transform_0, window_bounds = array<i64: 1, 128, 64>}, {pipeline_mode = #tpu.pipeline_mode<synchronous>, transform_indices = @transform_1, window_bounds = array<i64: 128, 32>}, {pipeline_mode = #tpu.pipeline_mode<synchronous>, transform_indices = @transform_2, window_bounds = array<i64: 1, 32>}, {pipeline_mode = #tpu.pipeline_mode<synchronous>, transform_indices = @transform_3, window_bounds = array<i64: 32, 256>}, {pipeline_mode = #tpu.pipeline_mode<synchronous>, transform_indices = @transform_4, window_bounds = array<i64: 1, 256>}, {transform_indices = @transform_5, window_bounds = array<i64: 1, 128, 64>}, {transform_indices = @transform_6, window_bounds = array<i64: 1, 1, 128>}, {transform_indices = @transform_7, window_bounds = array<i64: 1, 1, 128>}]} {
    %c0_i32 = arith.constant 0 : i32
    %0 = arith.cmpi eq, %arg1, %c0_i32 : i32
    %c0_i32_0 = arith.constant 0 : i32
    %1 = arith.cmpi eq, %arg2, %c0_i32_0 : i32
    %2 = arith.andi %0, %1 : i1
    %3 = arith.extui %2 : i1 to i32
    %c0_i32_1 = arith.constant 0 : i32
    %4 = arith.cmpi ne, %3, %c0_i32_1 : i32
    scf.if %4 {
      %cst = arith.constant 0.000000e+00 : f32
      %16 = vector.broadcast %cst : f32 to vector<1x128xf32>
      %c0 = arith.constant 0 : index
      %c0_8 = arith.constant 0 : index
      %17 = vector.load %arg11[%c0, %c0_8] : memref<1x128xf32, #tpu.memory_space<vmem>>, vector<1x128xf32>
      tpu.vector_store %arg11[%c0, %c0_8], %16 {strides = array<i32>} : memref<1x128xf32, #tpu.memory_space<vmem>>, vector<1x128xf32>,
    } else {
    }
    %c0_i32_2 = arith.constant 0 : i32
    %5 = arith.cmpi eq, %arg1, %c0_i32_2 : i32
    %6 = arith.extui %5 : i1 to i32
    %c0_i32_3 = arith.constant 0 : i32
    %7 = arith.cmpi ne, %6, %c0_i32_3 : i32
    scf.if %7 {
      %c0 = arith.constant 0 : index
      %c0_8 = arith.constant 0 : index
      %c0_9 = arith.constant 0 : index
      %16 = vector.load %arg3[%c0, %c0_8, %c0_9] : memref<1x128x64xf32, #tpu.memory_space<vmem>>, vector<1x128x64xf32>
      %c0_10 = arith.constant 0 : index
      %c0_11 = arith.constant 0 : index
      %17 = vector.load %arg11[%c0_10, %c0_11] : memref<1x128xf32, #tpu.memory_space<vmem>>, vector<1x128xf32>
      %cst = arith.constant dense<0.000000e+00> : vector<1x128xf32>
      %18 = vector.multi_reduction <add>, %16, %cst [2] : vector<1x128x64xf32> to vector<1x128xf32>
      %19 = arith.addf %17, %18 : vector<1x128xf32>
      %c0_12 = arith.constant 0 : index
      %c0_13 = arith.constant 0 : index
      %20 = vector.load %arg11[%c0_12, %c0_13] : memref<1x128xf32, #tpu.memory_space<vmem>>, vector<1x128xf32>
      tpu.vector_store %arg11[%c0_12, %c0_13], %19 {strides = array<i32>} : memref<1x128xf32, #tpu.memory_space<vmem>>, vector<1x128xf32>,
    } else {
    }
    %c0_i32_4 = arith.constant 0 : i32
    %8 = arith.cmpi eq, %arg1, %c0_i32_4 : i32
    %c0_i32_5 = arith.constant 0 : i32
    %9 = arith.cmpi eq, %arg2, %c0_i32_5 : i32
    %10 = arith.andi %8, %9 : i1
    %11 = arith.extui %10 : i1 to i32
    %c0_i32_6 = arith.constant 0 : i32
    %12 = arith.cmpi ne, %11, %c0_i32_6 : i32
    scf.if %12 {
      %c0 = arith.constant 0 : index
      %c0_8 = arith.constant 0 : index
      %16 = vector.load %arg11[%c0, %c0_8] : memref<1x128xf32, #tpu.memory_space<vmem>>, vector<1x128xf32>
      %c0_9 = arith.constant 0 : index
      %c0_10 = arith.constant 0 : index
      %17 = vector.load %arg4[%c0_9, %c0_10] : memref<128x32xf32, #tpu.memory_space<vmem>>, vector<128x32xf32>
      %cst = arith.constant dense<0.000000e+00> : vector<1x32xf32>
      %18 = tpu.matmul %16, %17, %cst {dimension_numbers = #tpu.dot_dimension_numbers<[1], [0], [0], [1], [0, 0, 1, 1], [], []>} : vector<1x128xf32>, vector<128x32xf32>, vector<1x32xf32> -> vector<1x32xf32>
      %c0_11 = arith.constant 0 : index
      %c0_12 = arith.constant 0 : index
      %19 = vector.load %arg5[%c0_11, %c0_12] : memref<1x32xf32, #tpu.memory_space<vmem>>, vector<1x32xf32>
      %20 = arith.addf %18, %19 : vector<1x32xf32>
      %cst_13 = arith.constant 0.000000e+00 : f32
      %21 = vector.broadcast %cst_13 : f32 to vector<1x32xf32>
      %22 = arith.maximumf %20, %21 : vector<1x32xf32>
      %c0_14 = arith.constant 0 : index
      %c0_15 = arith.constant 0 : index
      %23 = vector.load %arg6[%c0_14, %c0_15] : memref<32x256xf32, #tpu.memory_space<vmem>>, vector<32x256xf32>
      %cst_16 = arith.constant dense<0.000000e+00> : vector<1x256xf32>
      %24 = tpu.matmul %22, %23, %cst_16 {dimension_numbers = #tpu.dot_dimension_numbers<[1], [0], [0], [1], [0, 0, 1, 1], [], []>} : vector<1x32xf32>, vector<32x256xf32>, vector<1x256xf32> -> vector<1x256xf32>
      %c0_17 = arith.constant 0 : index
      %c0_18 = arith.constant 0 : index
      %25 = vector.load %arg7[%c0_17, %c0_18] : memref<1x256xf32, #tpu.memory_space<vmem>>, vector<1x256xf32>
      %26 = arith.addf %24, %25 : vector<1x256xf32>
      %27 = arith.negf %26 : vector<1x256xf32>
      %28 = math.exp %27 : vector<1x256xf32>
      %cst_19 = arith.constant 1.000000e+00 : f32
      %29 = vector.broadcast %cst_19 : f32 to vector<1x256xf32>
      %30 = arith.addf %29, %28 : vector<1x256xf32>
      %31 = arith.divf %29, %30 : vector<1x256xf32>
      %32 = vector.extract_strided_slice %31 {offsets = [0, 0], sizes = [1, 128], strides = [1, 1]} : vector<1x256xf32> to vector<1x128xf32>
      %c0_20 = arith.constant 0 : index
      %c0_21 = arith.constant 0 : index
      %33 = vector.load %arg12[%c0_20, %c0_21] : memref<1x128xf32, #tpu.memory_space<vmem>>, vector<1x128xf32>
      tpu.vector_store %arg12[%c0_20, %c0_21], %32 {strides = array<i32>} : memref<1x128xf32, #tpu.memory_space<vmem>>, vector<1x128xf32>,
      %34 = vector.extract_strided_slice %31 {offsets = [0, 0], sizes = [1, 128], strides = [1, 1]} : vector<1x256xf32> to vector<1x128xf32>
      %c0_22 = arith.constant 0 : index
      %c0_23 = arith.constant 0 : index
      %c0_24 = arith.constant 0 : index
      %35 = vector.load %arg9[%c0_22, %c0_23, %c0_24] : memref<1x1x128xf32, #tpu.memory_space<vmem>>, vector<1x1x128xf32>
      %36 = vector.shape_cast %35 : vector<1x1x128xf32> to vector<1x128xf32>
      %37 = vector.shape_cast %34 : vector<1x128xf32> to vector<1x1x128xf32>
      tpu.vector_store %arg9[%c0_22, %c0_23, %c0_24], %37 {strides = array<i32>} : memref<1x1x128xf32, #tpu.memory_space<vmem>>, vector<1x1x128xf32>,
      %38 = vector.extract_strided_slice %31 {offsets = [0, 128], sizes = [1, 128], strides = [1, 1]} : vector<1x256xf32> to vector<1x128xf32>
      %c0_25 = arith.constant 0 : index
      %c0_26 = arith.constant 0 : index
      %c0_27 = arith.constant 0 : index
      %39 = vector.load %arg10[%c0_25, %c0_26, %c0_27] : memref<1x1x128xf32, #tpu.memory_space<vmem>>, vector<1x1x128xf32>
      %40 = vector.shape_cast %39 : vector<1x1x128xf32> to vector<1x128xf32>
      %41 = vector.shape_cast %38 : vector<1x128xf32> to vector<1x1x128xf32>
      tpu.vector_store %arg10[%c0_25, %c0_26, %c0_27], %41 {strides = array<i32>} : memref<1x1x128xf32, #tpu.memory_space<vmem>>, vector<1x1x128xf32>,
    } else {
    }
    %c1_i32 = arith.constant 1 : i32
    %13 = arith.cmpi eq, %arg1, %c1_i32 : i32
    %14 = arith.extui %13 : i1 to i32
    %c0_i32_7 = arith.constant 0 : i32
    %15 = arith.cmpi ne, %14, %c0_i32_7 : i32
    scf.if %15 {
      %c0 = arith.constant 0 : index
      %c0_8 = arith.constant 0 : index
      %c0_9 = arith.constant 0 : index
      %16 = vector.load %arg3[%c0, %c0_8, %c0_9] : memref<1x128x64xf32, #tpu.memory_space<vmem>>, vector<1x128x64xf32>
      %c0_10 = arith.constant 0 : index
      %c0_11 = arith.constant 0 : index
      %17 = vector.load %arg12[%c0_10, %c0_11] : memref<1x128xf32, #tpu.memory_space<vmem>>, vector<1x128xf32>
      %18 = vector.shape_cast %17 : vector<1x128xf32> to vector<1x128x1xf32>
      %19 = vector.broadcast %18 : vector<1x128x1xf32> to vector<1x128x64xf32>
      %20 = arith.mulf %16, %19 : vector<1x128x64xf32>
      %c0_12 = arith.constant 0 : index
      %c0_13 = arith.constant 0 : index
      %c0_14 = arith.constant 0 : index
      %21 = vector.load %arg8[%c0_12, %c0_13, %c0_14] : memref<1x128x64xf32, #tpu.memory_space<vmem>>, vector<1x128x64xf32>
      tpu.vector_store %arg8[%c0_12, %c0_13, %c0_14], %20 {strides = array<i32>} : memref<1x128x64xf32, #tpu.memory_space<vmem>>, vector<1x128x64xf32>,
    } else {
    }
    return
  }
  func.func @transform_0(%arg0: i32, %arg1: i32, %arg2: i32) -> (i32, i32, i32) {
    %c1_i32 = arith.constant 1 : i32
    %0 = arith.subi %c1_i32, %arg1 : i32
    %1 = arith.muli %0, %arg2 : i32
    %c0_i32 = arith.constant 0 : i32
    %2 = arith.subi %c0_i32, %arg2 : i32
    %3 = arith.muli %arg1, %2 : i32
    %4 = arith.addi %1, %3 : i32
    %c0_i32_0 = arith.constant 0 : i32
    %c0_i32_1 = arith.constant 0 : i32
    return %arg0, %c0_i32_0, %4 : i32, i32, i32
  }
  func.func @transform_1(%arg0: i32, %arg1: i32, %arg2: i32) -> (i32, i32) {
    %c0_i32 = arith.constant 0 : i32
    %c0_i32_0 = arith.constant 0 : i32
    %c0_i32_1 = arith.constant 0 : i32
    return %c0_i32, %c0_i32_0 : i32, i32
  }
  func.func @transform_2(%arg0: i32, %arg1: i32, %arg2: i32) -> (i32, i32) {
    %c0_i32 = arith.constant 0 : i32
    %c0_i32_0 = arith.constant 0 : i32
    %c0_i32_1 = arith.constant 0 : i32
    return %c0_i32, %c0_i32_0 : i32, i32
  }
  func.func @transform_3(%arg0: i32, %arg1: i32, %arg2: i32) -> (i32, i32) {
    %c0_i32 = arith.constant 0 : i32
    %c0_i32_0 = arith.constant 0 : i32
    %c0_i32_1 = arith.constant 0 : i32
    return %c0_i32, %c0_i32_0 : i32, i32
  }
  func.func @transform_4(%arg0: i32, %arg1: i32, %arg2: i32) -> (i32, i32) {
    %c0_i32 = arith.constant 0 : i32
    %c0_i32_0 = arith.constant 0 : i32
    %c0_i32_1 = arith.constant 0 : i32
    return %c0_i32, %c0_i32_0 : i32, i32
  }
  func.func @transform_5(%arg0: i32, %arg1: i32, %arg2: i32) -> (i32, i32, i32) {
    %0 = arith.muli %arg1, %arg2 : i32
    %c0_i32 = arith.constant 0 : i32
    %1 = arith.subi %c0_i32, %0 : i32
    %c0_i32_0 = arith.constant 0 : i32
    %c0_i32_1 = arith.constant 0 : i32
    return %arg0, %c0_i32_0, %1 : i32, i32, i32
  }
  func.func @transform_6(%arg0: i32, %arg1: i32, %arg2: i32) -> (i32, i32, i32) {
    %c0_i32 = arith.constant 0 : i32
    %c0_i32_0 = arith.constant 0 : i32
    %c0_i32_1 = arith.constant 0 : i32
    return %arg0, %c0_i32, %c0_i32_0 : i32, i32, i32
  }
  func.func @transform_7(%arg0: i32, %arg1: i32, %arg2: i32) -> (i32, i32, i32) {
    %c0_i32 = arith.constant 0 : i32
    %c0_i32_0 = arith.constant 0 : i32
    %c0_i32_1 = arith.constant 0 : i32
    return %arg0, %c0_i32, %c0_i32_0 : i32, i32, i32
  }
}

</mosaic_0001>

<bundles_post_ra>
// kernel: tpu_custom_call.1
= control target key start
LH: loop header
LB: loop body
LE: loop exit
PB: predicated region body
PF: predicated region fallthrough
CT: control target
= control target key end

     0   :  { %s3487_s0 = inlined_call_operand.vmem [shape: f32[2,128,64], index: 0, kind: input, shape index: {}]   ;;  %s3488_s1 = inlined_call_operand.vmem [shape: f32[128,32], index: 1, kind: input, shape index: {}]   ;;  %s3489_s2 = inlined_call_operand.vmem [shape: f32[1,32], index: 2, kind: input, shape index: {}]   ;;  %s3490_s3 = inlined_call_operand.vmem [shape: f32[32,256], index: 3, kind: input, shape index: {}]   ;;  %s3491_s4 = inlined_call_operand.vmem [shape: f32[1,256], index: 4, kind: input, shape index: {}]   ;;  %s3492_s5 = inlined_call_operand.vmem [shape: f32[2,128,64], index: 5, kind: output, shape index: {0}]   ;;  %s3493_s6 = inlined_call_operand.hbm [shape: f32[2,1,128], index: 6, kind: output, shape index: {1}]   ;;  %s3494_s7 = inlined_call_operand.hbm [shape: f32[2,1,128], index: 7, kind: output, shape index: {2}]  }
   0x1   :  { %3497 = sst [smem:[#allocation13_spill]] %s3487_s0 }
   0x2   :  { %3498 = sst [smem:[#allocation14_spill]] %s3492_s5 }
   0x3   :  { %13 = vsyncpa [#allocation5], 0 }
   0x4   :  { %15 = vsyncpa [#allocation5 + $0x1], 0 }
   0x5   :  { %16 = vsyncpa [#allocation7], 0 }
   0x6   :  { %18 = vsyncpa [#allocation7 + $0x1], 0  ;;  %s2828_s24 = smov 0   ;;  %s2830_s25 = smov 0  }
   0x7   :  { %s2832_s26 = smov 0   ;;  %s2834_s27 = smov 0  }
   0x8   :  { %s2836_s28 = smov 0   ;;  %s2838_s29 = smov 0  }
   0x9   :  { %s2840_s30 = smov 0   ;;  %s2842_s8 = smov 0  }
   0xa LB: > { %3499 = sst [smem:[#allocation10_spill]] %s2774_s30  ;;  %s2453_s9 = sadd.s32 4294967295, %s2778_s8   ;;  %s2778_s8 = sphi %s2842_s8, %s24_s8   ;;  %s2774_s30 = sphi %s2840_s30, %s3512_s30   ;;  %s2770_s29 = sphi %s2838_s29, %s3517_s29   ;;  %s2766_s28 = sphi %s2836_s28, %s3510_s28   ;;  %s2762_s27 = sphi %s2834_s27, %s3516_s27   ;;  %s2758_s26 = sphi %s2832_s26, %s3515_s26   ;;  %s2754_s25 = sphi %s2830_s25, %s3514_s25   ;;  %s2750_s24 = sphi %s2828_s24, %s3513_s24  }
   0xb   : > { %s2454_s10 = sadd.s32 4294967294, %s2778_s8   ;;  %s39_s11 = sadd.s32 1, %s2770_s29 }
   0xc   : > { %p41_p0 = scmp.ge.s32.totalorder %s39_s11, 2  ;;  %s43_s12 = sadd.s32 1, %s2774_s30 }
   0xd   : > { %p214_p1 = scmp.ne.s32.totalorder %s2758_s26, %s2754_s25  ;;  %p215_p2 = scmp.eq.s32.totalorder %s2453_s9, 3 }
   0xe   : > { %s3519_s11 = smov (%p41_p0, %s39_s11), 0  ;;  %s3521_s12 = smov (!%p41_p0, %s43_s12), %s2774_s30 }
   0xf   : > { %3500 = sst [smem:[#allocation11_spill]] %s3519_s11  ;;  %p2877_p3 = por %p215_p2, %p214_p1 }
  0x10   : > { %p220_p4 = scmp.ne.s32.totalorder %s2754_s25, %s2750_s24  ;;  %p45_p5 = scmp.ge.s32.totalorder %s3521_s12, 2 }
  0x11   : > { %p221_p6 = scmp.eq.s32.totalorder %s2454_s10, 3  ;;  %p2457_p7 = scmp.ge.s32.totalorder %s2778_s8, 1 }
  0x12   : > { %p298_p8 = scmp.lt.s32.totalorder %s2778_s8, 5  ;;  %s3523_s12 = smov (%p45_p5, %s3521_s12), 0 }
  0x13   : > { %3502 = sst [smem:[#allocation12_spill]] %s3523_s12  ;;  %p2887_p9 = por %p221_p6, %p220_p4 }
  0x14   : > { %p299_p10 = pnand %p2457_p7, %p298_p8  ;;  %s201_s15 = ssub.s32 %s2774_s30, %s3523_s12 }
  0x15   : > { %s204_s16 = sadd.s32 1, %s2758_s26  ;;  %p202_p11 = scmp.eq.s32.totalorder %s201_s15, 0 }
  0x16   : > { %302 = sbr.rel (%p299_p10) target bundleno = 1105 (0x451), region = 40  ;;  %s2898_s18 = sand.u32 (!%p299_p10), 1, %s2754_s25  }
  0x17   : > { %s2895_s17 = scalar_select %p202_p11, %s2758_s26, %s204_s16  }
  0x18   : > { %p356_p12 = scmp.lt.s32.totalorder (!%p299_p10), %s2766_s28, 1  ;;  %p381_p13 = scmp.eq.s32.totalorder (!%p299_p10), %s2762_s27, 0 }
  0x19   : > { %s3504_s0 = sld [smem:[#allocation13_spill]] (!%p299_p10)  ;;  %s3505_s5 = sld [smem:[#allocation14_spill]] (!%p299_p10) }
  0x1d   : > { %s357_s19 = scalar_select %p356_p12, %s2766_s28, 1 }
  0x1e   : > { %386 = sbr.rel (!%p381_p13) target bundleno = 37 (0x25), region = 44  ;;  %v2780_v0 = vmov (%p381_p13), 0.0  }
  0x1f   : > { %s2473_s20 = sshll.u32 %s357_s19, 7  ;;  %387 = vst [vmem:[#allocation2] sm:$0x1] (%p381_p13), %v2780_v0 }
  0x20   : > { %s2906_s23 = scalar_lea.vmem %s3504_s0, %s2473_s20  ;;  %s2911_s15 = scalar_lea.vmem %s3505_s5, %s2473_s20 }
  0x25 PF: > { %p2463_p0 = scmp.ne.s32.totalorder %s2762_s27, 0 }
  0x26   : > { %v391_v1 = vld [vmem:[%s2906_s23] sm:$0xff] (!%p2463_p0)  ;;  %vm408_vm0 = vcmask (!%p2463_p0), 523264   ;;  %v393_v2 = vld [vmem:[%s2906_s23 + $0x10] sm:$0xff] (!%p2463_p0)  ;;  %v392_v3 = vld [vmem:[%s2906_s23 + $0x8] sm:$0xff] (!%p2463_p0)  ;;  %v2781_v31 = vmov (!%p2463_p0), 0   ;;  %v473_v34 = vlaneseq (!%p2463_p0)  ;;  %vm1828_vm1 = vcmask (!%p2463_p0), 130112  }
  0x27   : > { %390 = sbr.rel (%p2463_p0) target bundleno = 412 (0x19c), region = 48  ;;  %v409_v4 = vsel (!%p2463_p0), %vm408_vm0, %v391_v1, 0.0  ;;  %v415_v5 = vsel (!%p2463_p0), %vm408_vm0, %v393_v2, 0.0  ;;  %v394_v6 = vld [vmem:[%s2906_s23 + $0x18] sm:$0xff] (!%p2463_p0)  ;;  %v412_v7 = vsel (!%p2463_p0), %vm408_vm0, %v392_v3, 0.0  ;;  %v396_v9 = vld [vmem:[%s2906_s23 + $0x28] sm:$0xff] (!%p2463_p0)  ;;  %2642 = vset.pattern.permute.xlu0 (!%p2463_p0), %v2781_v31  ;;  %2643 = vset.pattern.permute.xlu1 (!%p2463_p0), %v2781_v31 }
  0x28   : > { %410 = vadd.xlane.f32.xlu0 (!%p2463_p0), %v409_v4  ;;  %416 = vadd.xlane.f32.xlu1 (!%p2463_p0), %v415_v5  ;;  %v418_v8 = vsel (!%p2463_p0), %vm408_vm0, %v394_v6, 0.0  ;;  %v395_v10 = vld [vmem:[%s2906_s23 + $0x20] sm:$0xff] (!%p2463_p0)  ;;  %v424_v11 = vsel (!%p2463_p0), %vm408_vm0, %v396_v9, 0.0  ;;  %v398_v13 = vld [vmem:[%s2906_s23 + $0x38] sm:$0xff] (!%p2463_p0)  ;;  %v397_v14 = vld [vmem:[%s2906_s23 + $0x30] sm:$0xff] (!%p2463_p0)  ;;  %v2951_v37 = vshrl.u32 (!%p2463_p0), %v473_v34, 7 }
  0x29   : > { %v421_v12 = vsel (!%p2463_p0), %vm408_vm0, %v395_v10, 0.0  ;;  %v430_v15 = vsel (!%p2463_p0), %vm408_vm0, %v398_v13, 0.0  ;;  %v427_v16 = vsel (!%p2463_p0), %vm408_vm0, %v397_v14, 0.0  ;;  %v400_v17 = vld [vmem:[%s2906_s23 + $0x48] sm:$0xff] (!%p2463_p0)  ;;  %v399_v18 = vld [vmem:[%s2906_s23 + $0x40] sm:$0xff] (!%p2463_p0)  ;;  %v402_v21 = vld [vmem:[%s2906_s23 + $0x58] sm:$0xff] (!%p2463_p0) }
  0x2a   : > { %v436_v19 = vsel (!%p2463_p0), %vm408_vm0, %v400_v17, 0.0  ;;  %v433_v20 = vsel (!%p2463_p0), %vm408_vm0, %v399_v18, 0.0  ;;  %v401_v22 = vld [vmem:[%s2906_s23 + $0x50] sm:$0xff] (!%p2463_p0)  ;;  %v442_v23 = vsel (!%p2463_p0), %vm408_vm0, %v402_v21, 0.0  ;;  %v404_v25 = vld [vmem:[%s2906_s23 + $0x68] sm:$0xff] (!%p2463_p0)  ;;  %v403_v26 = vld [vmem:[%s2906_s23 + $0x60] sm:$0xff] (!%p2463_p0) }
  0x2b   : > { %v439_v24 = vsel (!%p2463_p0), %vm408_vm0, %v401_v22, 0.0  ;;  %v448_v27 = vsel (!%p2463_p0), %vm408_vm0, %v404_v25, 0.0  ;;  %v445_v28 = vsel (!%p2463_p0), %vm408_vm0, %v403_v26, 0.0  ;;  %v406_v29 = vld [vmem:[%s2906_s23 + $0x78] sm:$0xff] (!%p2463_p0)  ;;  %v405_v30 = vld [vmem:[%s2906_s23 + $0x70] sm:$0xff] (!%p2463_p0)  ;;  %v2954_v39 = vsub.s32 (!%p2463_p0), 0, %v2951_v37 }
  0x2c   : > { %413 = vadd.xlane.f32.xlu0 (!%p2463_p0), %v412_v7  ;;  %419 = vadd.xlane.f32.xlu1 (!%p2463_p0), %v418_v8  ;;  %v454_v32 = vsel (!%p2463_p0), %vm408_vm0, %v406_v29, 0.0  ;;  %v451_v33 = vsel (!%p2463_p0), %vm408_vm0, %v405_v30, 0.0  ;;  %v2782_v35 = vmov (!%p2463_p0), 1966171168   ;;  %v2957_v40 = vsub.s32 (!%p2463_p0), 1, %v2951_v37 }
  0x2d   : > { %v990_v36 = vunpack.c.l.s4 (!%p2463_p0), %v2782_v35  ;;  %v2960_v41 = vsub.s32 (!%p2463_p0), 2, %v2951_v37  ;;  %v2963_v42 = vsub.s32 (!%p2463_p0), 3, %v2951_v37  ;;  %v2966_v43 = vsub.s32 (!%p2463_p0), 4, %v2951_v37 }
  0x2e   : > { %v2969_v44 = vsub.s32 5, %v2951_v37  ;;  %v2972_v45 = vsub.s32 6, %v2951_v37  ;;  %v2975_v46 = vsub.s32 7, %v2951_v37  ;;  %vm1835_vm2 = vcmask 195712  }
  0x2f   : > { %v991_v38 = vunpack.c.0.s8 %v990_v36  ;;  %vm1842_vm3 = vcmask 261312   ;;  %vm1849_vm4 = vcmask 326912   ;;  %vm1856_vm5 = vcmask 392512  }
  0x30   : > { %425 = vadd.xlane.f32.xlu1 %v424_v11  ;;  %422 = vadd.xlane.f32.xlu0 %v421_v12  ;;  %vm1863_vm6 = vcmask 458112   ;;  %vm1870_vm7 = vcmask 523712   ;;  %vm1877_vm8 = vcmask 589312   ;;  %vm1884_vm9 = vcmask 654912  }
  0x31   : > { %v2978_v49 = vsub.s32 %v991_v38, %v2951_v37  ;;  %vm1891_vm10 = vcmask 720512   ;;  %vm1898_vm11 = vcmask 786112   ;;  %vm1905_vm12 = vcmask 851712  }
  0x32   : > { %vm1912_vm13 = vcmask 917312   ;;  %vm1919_vm14 = vcmask 982912   ;;  %vm1926_vm15 = vcmask 1048512  }
  0x34   : > { %431 = vadd.xlane.f32.xlu1 %v430_v15  ;;  %428 = vadd.xlane.f32.xlu0 %v427_v16 }
  0x38   : > { %437 = vadd.xlane.f32.xlu1 %v436_v19  ;;  %434 = vadd.xlane.f32.xlu0 %v433_v20 }
  0x3c   : > { %443 = vadd.xlane.f32.xlu1 %v442_v23  ;;  %440 = vadd.xlane.f32.xlu0 %v439_v24 }
  0x40   : > { %449 = vadd.xlane.f32.xlu1 %v448_v27  ;;  %446 = vadd.xlane.f32.xlu0 %v445_v28 }
  0x44   : > { %455 = vadd.xlane.f32.xlu1 %v454_v32  ;;  %452 = vadd.xlane.f32.xlu0 %v451_v33 }
  0xb5   : > { %v411_v47 = vpop.xlane.xlu0 %410  ;;  %v417_v48 = vpop.xlane.xlu1 %416 }
  0xb6   : > { %v476_v50 = vrot.slane %v411_v47, %v2954_v39  ;;  %v480_v51 = vrot.slane %v411_v47, %v2957_v40  ;;  %v484_v52 = vrot.slane %v411_v47, %v2960_v41  ;;  %v488_v53 = vrot.slane %v411_v47, %v2963_v42 }
  0xb7   : > { %v492_v54 = vrot.slane %v411_v47, %v2966_v43  ;;  %v496_v55 = vrot.slane %v411_v47, %v2969_v44  ;;  %v500_v56 = vrot.slane %v411_v47, %v2972_v45  ;;  %v504_v57 = vrot.slane %v411_v47, %v2975_v46 }
  0xb8   : > { %v985_v58 = vcombine.low %v476_v50, %v480_v51  ;;  %v986_v59 = vcombine.low %v484_v52, %v488_v53  ;;  %v540_v60 = vrot.slane %v417_v48, %v2954_v39  ;;  %v544_v61 = vrot.slane %v417_v48, %v2957_v40 }
  0xb9   : > { %v414_v62 = vpop.xlane.xlu0 %413  ;;  %v2990_v63 = vpop.xlane.xlu1 %419  ;;  %v987_v0 = vcombine.low %v492_v54, %v496_v55  ;;  %v988_v1 = vcombine.low %v500_v56, %v504_v57  ;;  %v548_v2 = vrot.slane %v417_v48, %v2960_v41  ;;  %v552_v3 = vrot.slane %v417_v48, %v2963_v42 }
  0xba   : > { %v995_v4 = vrot.slane %v985_v58, %v2978_v49  ;;  %v1002_v5 = vrot.slane %v986_v59, %v2978_v49  ;;  %v508_v6 = vrot.slane %v414_v62, %v2954_v39  ;;  %v512_v7 = vrot.slane %v414_v62, %v2957_v40 }
  0xbb   : > { %v1009_v8 = vrot.slane %v987_v0, %v2978_v49  ;;  %v1016_v9 = vrot.slane %v988_v1, %v2978_v49  ;;  %v516_v10 = vrot.slane %v414_v62, %v2960_v41  ;;  %v520_v11 = vrot.slane %v414_v62, %v2963_v42 }
  0xbc   : > { %v1017_v12 = vcombine.low %v995_v4, %v1002_v5  ;;  %v524_v13 = vrot.slane %v414_v62, %v2966_v43  ;;  %v528_v14 = vrot.slane %v414_v62, %v2969_v44  ;;  %v532_v15 = vrot.slane %v414_v62, %v2972_v45 }
  0xbd   : > { %v3005_v16 = vpop.xlane.xlu1 %425  ;;  %v1018_v17 = vcombine.low %v1009_v8, %v1016_v9  ;;  %v536_v18 = vrot.slane %v414_v62, %v2975_v46  ;;  %v1034_v19 = vcombine.low %v508_v6, %v512_v7  ;;  %v1035_v20 = vcombine.low %v516_v10, %v520_v11 }
  0xbe   : > { %v1025_v21 = vrot.slane %v1017_v12, %v2978_v49  ;;  %v1036_v22 = vcombine.low %v524_v13, %v528_v14  ;;  %v556_v23 = vrot.slane %v417_v48, %v2966_v43  ;;  %v560_v24 = vrot.slane %v417_v48, %v2969_v44 }
  0xbf   : > { %v1032_v25 = vrot.slane %v1018_v17, %v2978_v49  ;;  %v1037_v26 = vcombine.low %v532_v15, %v536_v18  ;;  %v1044_v27 = vrot.slane %v1034_v19, %v2978_v49  ;;  %v1051_v28 = vrot.slane %v1035_v20, %v2978_v49 }
  0xc0   : > { %v1058_v29 = vrot.slane %v1036_v22, %v2978_v49  ;;  %v564_v30 = vrot.slane %v417_v48, %v2972_v45  ;;  %v568_v31 = vrot.slane %v417_v48, %v2975_v46  ;;  %v1083_v32 = vcombine.low %v540_v60, %v544_v61  ;;  %v423_v61 = vpop.xlane.xlu0 %422 }
  0xc1   : > { %v1033_v33 = vcombine.low %v1025_v21, %v1032_v25  ;;  %v1065_v35 = vrot.slane %v1037_v26, %v2978_v49  ;;  %v1066_v36 = vcombine.low %v1044_v27, %v1051_v28  ;;  %v1084_v38 = vcombine.low %v548_v2, %v552_v3  ;;  %v3021_v53 = vpop.xlane.xlu1 %431 }
  0xc2   : > { %v1085_v47 = vcombine.low %v556_v23, %v560_v24  ;;  %v1086_v50 = vcombine.low %v564_v30, %v568_v31  ;;  %v1093_v51 = vrot.slane %v1083_v32, %v2978_v49  ;;  %v572_v52 = vrot.slane %v2990_v63, %v2954_v39 }
  0xc3   : > { %1770 = vperm.xlu0 %2642, %v1033_v33   ;;  %v1067_v54 = vcombine.low %v1058_v29, %v1065_v35  ;;  %v1074_v55 = vrot.slane %v1066_v36, %v2978_v49  ;;  %v1100_v48 = vrot.slane %v1084_v38, %v2978_v49  ;;  %v576_v56 = vrot.slane %v2990_v63, %v2957_v40 }
  0xc4   : > { %v1107_v57 = vrot.slane %v1085_v47, %v2978_v49  ;;  %v1114_v58 = vrot.slane %v1086_v50, %v2978_v49  ;;  %v580_v59 = vrot.slane %v2990_v63, %v2960_v41  ;;  %v584_v60 = vrot.slane %v2990_v63, %v2963_v42 }
  0xc5   : > { %v1081_v62 = vrot.slane %v1067_v54, %v2978_v49  ;;  %v1115_v0 = vcombine.low %v1093_v51, %v1100_v48  ;;  %v588_v1 = vrot.slane %v2990_v63, %v2966_v43  ;;  %v592_v2 = vrot.slane %v2990_v63, %v2969_v44  ;;  %v438_v15 = vpop.xlane.xlu1 %437 }
  0xc6   : > { %v1116_v3 = vcombine.low %v1107_v57, %v1114_v58  ;;  %v596_v4 = vrot.slane %v2990_v63, %v2972_v45  ;;  %v600_v5 = vrot.slane %v2990_v63, %v2975_v46  ;;  %v1132_v6 = vcombine.low %v572_v52, %v576_v56 }
  0xc7   : > { %v1082_v7 = vcombine.low %v1074_v55, %v1081_v62  ;;  %v1123_v8 = vrot.slane %v1115_v0, %v2978_v49  ;;  %v1133_v9 = vcombine.low %v580_v59, %v584_v60  ;;  %v1134_v10 = vcombine.low %v588_v1, %v592_v2 }
  0xc8   : > { %v1130_v11 = vrot.slane %v1116_v3, %v2978_v49  ;;  %v1135_v12 = vcombine.low %v596_v4, %v600_v5  ;;  %v1142_v13 = vrot.slane %v1132_v6, %v2978_v49  ;;  %v604_v14 = vrot.slane %v423_v61, %v2954_v39 }
  0xc9   : > { %1773 = vperm.xlu1 %2643, %v1082_v7   ;;  %v1149_v17 = vrot.slane %v1133_v9, %v2978_v49  ;;  %v1156_v18 = vrot.slane %v1134_v10, %v2978_v49  ;;  %v608_v63 = vrot.slane %v423_v61, %v2957_v40  ;;  %v612_v19 = vrot.slane %v423_v61, %v2960_v41  ;;  %v444_v9 = vpop.xlane.xlu1 %443 }
  0xca   : > { %v1131_v20 = vcombine.low %v1123_v8, %v1130_v11  ;;  %v1163_v21 = vrot.slane %v1135_v12, %v2978_v49  ;;  %v616_v22 = vrot.slane %v423_v61, %v2963_v42  ;;  %v620_v23 = vrot.slane %v423_v61, %v2966_v43 }
  0xcb   : > { %v1164_v24 = vcombine.low %v1142_v13, %v1149_v17  ;;  %v624_v25 = vrot.slane %v423_v61, %v2969_v44  ;;  %v628_v26 = vrot.slane %v423_v61, %v2972_v45  ;;  %v632_v27 = vrot.slane %v423_v61, %v2975_v46 }
  0xcc   : > { %v1165_v28 = vcombine.low %v1156_v18, %v1163_v21  ;;  %v1181_v29 = vcombine.low %v604_v14, %v608_v63  ;;  %v1182_v30 = vcombine.low %v612_v19, %v616_v22  ;;  %v764_v31 = vrot.slane %v438_v15, %v2954_v39 }
  0xcd   : > { %1776 = vperm.xlu1 %2643, %v1131_v20   ;;  %v1172_v32 = vrot.slane %v1164_v24, %v2978_v49  ;;  %v1183_v33 = vcombine.low %v620_v23, %v624_v25  ;;  %v1184_v35 = vcombine.low %v628_v26, %v632_v27  ;;  %v768_v36 = vrot.slane %v438_v15, %v2957_v40 }
  0xce   : > { %v1179_v38 = vrot.slane %v1165_v28, %v2978_v49  ;;  %v1191_v47 = vrot.slane %v1181_v29, %v2978_v49  ;;  %v1198_v50 = vrot.slane %v1182_v30, %v2978_v49  ;;  %v772_v51 = vrot.slane %v438_v15, %v2960_v41 }
  0xcf   : > { %v1205_v52 = vrot.slane %v1183_v33, %v2978_v49  ;;  %v1212_v54 = vrot.slane %v1184_v35, %v2978_v49  ;;  %v776_v55 = vrot.slane %v438_v15, %v2963_v42  ;;  %v780_v48 = vrot.slane %v438_v15, %v2966_v43  ;;  %v429_v33 = vpop.xlane.xlu0 %428 }
  0xd0   : > { %v1180_v56 = vcombine.low %v1172_v32, %v1179_v38  ;;  %v1213_v57 = vcombine.low %v1191_v47, %v1198_v50  ;;  %v784_v58 = vrot.slane %v438_v15, %v2969_v44  ;;  %v788_v59 = vrot.slane %v438_v15, %v2972_v45 }
  0xd1   : > { %v1214_v60 = vcombine.low %v1205_v52, %v1212_v54  ;;  %v792_v61 = vrot.slane %v438_v15, %v2975_v46  ;;  %v1426_v62 = vcombine.low %v764_v31, %v768_v36  ;;  %v1427_v0 = vcombine.low %v772_v51, %v776_v55 }
  0xd2   : > { %1779 = vperm.xlu1 %2643, %v1180_v56   ;;  %v1221_v1 = vrot.slane %v1213_v57, %v2978_v49  ;;  %v1428_v2 = vcombine.low %v780_v48, %v784_v58  ;;  %v636_v3 = vrot.slane %v3005_v16, %v2954_v39  ;;  %v640_v4 = vrot.slane %v3005_v16, %v2957_v40 }
  0xd3   : > { %v1228_v5 = vrot.slane %v1214_v60, %v2978_v49  ;;  %v1429_v6 = vcombine.low %v788_v59, %v792_v61  ;;  %v1436_v7 = vrot.slane %v1426_v62, %v2978_v49  ;;  %v1443_v8 = vrot.slane %v1427_v0, %v2978_v49 }
  0xd4   : > { %v1450_v10 = vrot.slane %v1428_v2, %v2978_v49  ;;  %v644_v11 = vrot.slane %v3005_v16, %v2960_v41  ;;  %v648_v12 = vrot.slane %v3005_v16, %v2963_v42  ;;  %v652_v13 = vrot.slane %v3005_v16, %v2966_v43 }
  0xd5   : > { %v1229_v14 = vcombine.low %v1221_v1, %v1228_v5  ;;  %v1457_v15 = vrot.slane %v1429_v6, %v2978_v49  ;;  %v1458_v17 = vcombine.low %v1436_v7, %v1443_v8  ;;  %v656_v18 = vrot.slane %v3005_v16, %v2969_v44 }
  0xd6   : > { %v660_v63 = vrot.slane %v3005_v16, %v2972_v45  ;;  %v664_v19 = vrot.slane %v3005_v16, %v2975_v46  ;;  %v1230_v20 = vcombine.low %v636_v3, %v640_v4  ;;  %v1231_v21 = vcombine.low %v644_v11, %v648_v12  ;;  %v450_v3 = vpop.xlane.xlu1 %449 }
  0xd7   : > { %1782 = vperm.xlu1 %2643, %v1229_v14   ;;  %v1459_v22 = vcombine.low %v1450_v10, %v1457_v15  ;;  %v1466_v23 = vrot.slane %v1458_v17, %v2978_v49  ;;  %v1232_v24 = vcombine.low %v652_v13, %v656_v18  ;;  %v828_v25 = vrot.slane %v444_v9, %v2954_v39 }
  0xd8   : > { %v1233_v26 = vcombine.low %v660_v63, %v664_v19  ;;  %v1240_v27 = vrot.slane %v1230_v20, %v2978_v49  ;;  %v1247_v28 = vrot.slane %v1231_v21, %v2978_v49  ;;  %v832_v29 = vrot.slane %v444_v9, %v2957_v40 }
  0xd9   : > { %v1473_v30 = vrot.slane %v1459_v22, %v2978_v49  ;;  %v1254_v16 = vrot.slane %v1232_v24, %v2978_v49  ;;  %v836_v31 = vrot.slane %v444_v9, %v2960_v41  ;;  %v840_v32 = vrot.slane %v444_v9, %v2963_v42 }
  0xda   : > { %v1261_v35 = vrot.slane %v1233_v26, %v2978_v49  ;;  %v1262_v36 = vcombine.low %v1240_v27, %v1247_v28  ;;  %v844_v38 = vrot.slane %v444_v9, %v2966_v43  ;;  %v848_v47 = vrot.slane %v444_v9, %v2969_v44 }
  0xdb   : > { %v1474_v50 = vcombine.low %v1466_v23, %v1473_v30  ;;  %v852_v51 = vrot.slane %v444_v9, %v2972_v45  ;;  %v856_v52 = vrot.slane %v444_v9, %v2975_v46  ;;  %v1524_v54 = vcombine.low %v828_v25, %v832_v29 }
  0xdc   : > { %v1263_v55 = vcombine.low %v1254_v16, %v1261_v35  ;;  %v1270_v48 = vrot.slane %v1262_v36, %v2978_v49  ;;  %v1525_v56 = vcombine.low %v836_v31, %v840_v32  ;;  %v1526_v57 = vcombine.low %v844_v38, %v848_v47 }
  0xdd   : > { %1797 = vperm.xlu0 %2642, %v1474_v50   ;;  %v1527_v58 = vcombine.low %v852_v51, %v856_v52  ;;  %v1534_v59 = vrot.slane %v1524_v54, %v2978_v49  ;;  %v668_v60 = vrot.slane %v429_v33, %v2954_v39  ;;  %v672_v61 = vrot.slane %v429_v33, %v2957_v40 }
  0xde   : > { %v1277_v62 = vrot.slane %v1263_v55, %v2978_v49  ;;  %v1541_v0 = vrot.slane %v1525_v56, %v2978_v49  ;;  %v1548_v1 = vrot.slane %v1526_v57, %v2978_v49  ;;  %v676_v2 = vrot.slane %v429_v33, %v2960_v41 }
  0xdf   : > { %v1555_v4 = vrot.slane %v1527_v58, %v2978_v49  ;;  %v680_v5 = vrot.slane %v429_v33, %v2963_v42  ;;  %v684_v6 = vrot.slane %v429_v33, %v2966_v43  ;;  %v688_v7 = vrot.slane %v429_v33, %v2969_v44 }
  0xe0   : > { %v1278_v8 = vcombine.low %v1270_v48, %v1277_v62  ;;  %v1556_v9 = vcombine.low %v1534_v59, %v1541_v0  ;;  %v692_v10 = vrot.slane %v429_v33, %v2972_v45  ;;  %v696_v11 = vrot.slane %v429_v33, %v2975_v46  ;;  %v456_v48 = vpop.xlane.xlu1 %455 }
  0xe1   : > { %v1557_v12 = vcombine.low %v1548_v1, %v1555_v4  ;;  %v1279_v13 = vcombine.low %v668_v60, %v672_v61  ;;  %v1280_v14 = vcombine.low %v676_v2, %v680_v5  ;;  %v1281_v15 = vcombine.low %v684_v6, %v688_v7  ;;  %v435_v5 = vpop.xlane.xlu0 %434 }
  0xe2   : > { %1785 = vperm.xlu1 %2643, %v1278_v8   ;;  %v1564_v17 = vrot.slane %v1556_v9, %v2978_v49  ;;  %v1282_v18 = vcombine.low %v692_v10, %v696_v11  ;;  %v892_v63 = vrot.slane %v450_v3, %v2954_v39  ;;  %v896_v19 = vrot.slane %v450_v3, %v2957_v40 }
  0xe3   : > { %v1571_v20 = vrot.slane %v1557_v12, %v2978_v49  ;;  %v1289_v21 = vrot.slane %v1279_v13, %v2978_v49  ;;  %v1296_v22 = vrot.slane %v1280_v14, %v2978_v49  ;;  %v1303_v23 = vrot.slane %v1281_v15, %v2978_v49 }
  0xe4   : > { %v1310_v24 = vrot.slane %v1282_v18, %v2978_v49  ;;  %v900_v25 = vrot.slane %v450_v3, %v2960_v41  ;;  %v904_v26 = vrot.slane %v450_v3, %v2963_v42  ;;  %v908_v27 = vrot.slane %v450_v3, %v2966_v43 }
  0xe5   : > { %v1572_v28 = vcombine.low %v1564_v17, %v1571_v20  ;;  %v1311_v29 = vcombine.low %v1289_v21, %v1296_v22  ;;  %v912_v30 = vrot.slane %v450_v3, %v2969_v44  ;;  %v916_v16 = vrot.slane %v450_v3, %v2972_v45 }
  0xe6   : > { %v1312_v31 = vcombine.low %v1303_v23, %v1310_v24  ;;  %v920_v32 = vrot.slane %v450_v3, %v2975_v46  ;;  %v1622_v33 = vcombine.low %v892_v63, %v896_v19  ;;  %v1623_v35 = vcombine.low %v900_v25, %v904_v26 }
  0xe7   : > { %1803 = vperm.xlu0 %2642, %v1572_v28   ;;  %v1319_v36 = vrot.slane %v1311_v29, %v2978_v49  ;;  %v1624_v38 = vcombine.low %v908_v27, %v912_v30  ;;  %v700_v47 = vrot.slane %v3021_v53, %v2954_v39  ;;  %v704_v50 = vrot.slane %v3021_v53, %v2957_v40  ;;  %v441_v29 = vpop.xlane.xlu0 %440 }
  0xe8   : > { %v1326_v51 = vrot.slane %v1312_v31, %v2978_v49  ;;  %v1625_v52 = vcombine.low %v916_v16, %v920_v32  ;;  %v1632_v54 = vrot.slane %v1622_v33, %v2978_v49  ;;  %v1639_v55 = vrot.slane %v1623_v35, %v2978_v49 }
  0xe9   : > { %v1646_v56 = vrot.slane %v1624_v38, %v2978_v49  ;;  %v708_v57 = vrot.slane %v3021_v53, %v2960_v41  ;;  %v712_v58 = vrot.slane %v3021_v53, %v2963_v42  ;;  %v716_v59 = vrot.slane %v3021_v53, %v2966_v43 }
  0xea   : > { %v1327_v60 = vcombine.low %v1319_v36, %v1326_v51  ;;  %v1653_v61 = vrot.slane %v1625_v52, %v2978_v49  ;;  %v1654_v62 = vcombine.low %v1632_v54, %v1639_v55  ;;  %v720_v0 = vrot.slane %v3021_v53, %v2969_v44 }
  0xeb   : > { %v724_v1 = vrot.slane %v3021_v53, %v2972_v45  ;;  %v728_v2 = vrot.slane %v3021_v53, %v2975_v46  ;;  %v1328_v3 = vcombine.low %v700_v47, %v704_v50  ;;  %v1329_v4 = vcombine.low %v708_v57, %v712_v58 }
  0xec   : > { %1788 = vperm.xlu1 %2643, %v1327_v60   ;;  %v1655_v6 = vcombine.low %v1646_v56, %v1653_v61  ;;  %v1662_v7 = vrot.slane %v1654_v62, %v2978_v49  ;;  %v1330_v8 = vcombine.low %v716_v59, %v720_v0  ;;  %v956_v9 = vrot.slane %v456_v48, %v2954_v39 }
  0xed   : > { %v1331_v10 = vcombine.low %v724_v1, %v728_v2  ;;  %v1338_v11 = vrot.slane %v1328_v3, %v2978_v49  ;;  %v1345_v12 = vrot.slane %v1329_v4, %v2978_v49  ;;  %v960_v13 = vrot.slane %v456_v48, %v2957_v40  ;;  %v447_v2 = vpop.xlane.xlu0 %446 }
  0xee   : > { %v1669_v14 = vrot.slane %v1655_v6, %v2978_v49  ;;  %v1352_v53 = vrot.slane %v1330_v8, %v2978_v49  ;;  %v964_v15 = vrot.slane %v456_v48, %v2960_v41  ;;  %v968_v17 = vrot.slane %v456_v48, %v2963_v42 }
  0xef   : > { %v1359_v18 = vrot.slane %v1331_v10, %v2978_v49  ;;  %v1360_v63 = vcombine.low %v1338_v11, %v1345_v12  ;;  %v972_v19 = vrot.slane %v456_v48, %v2966_v43  ;;  %v976_v20 = vrot.slane %v456_v48, %v2969_v44 }
  0xf0   : > { %v1670_v21 = vcombine.low %v1662_v7, %v1669_v14  ;;  %v980_v22 = vrot.slane %v456_v48, %v2972_v45  ;;  %v984_v23 = vrot.slane %v456_v48, %v2975_v46  ;;  %v1720_v24 = vcombine.low %v956_v9, %v960_v13 }
  0xf1   : > { %v1361_v25 = vcombine.low %v1352_v53, %v1359_v18  ;;  %v1368_v26 = vrot.slane %v1360_v63, %v2978_v49  ;;  %v1721_v27 = vcombine.low %v964_v15, %v968_v17  ;;  %v1722_v28 = vcombine.low %v972_v19, %v976_v20 }
  0xf2   : > { %1809 = vperm.xlu0 %2642, %v1670_v21   ;;  %v1723_v30 = vcombine.low %v980_v22, %v984_v23  ;;  %v1730_v16 = vrot.slane %v1720_v24, %v2978_v49  ;;  %v732_v31 = vrot.slane %v435_v5, %v2954_v39  ;;  %v736_v32 = vrot.slane %v435_v5, %v2957_v40 }
  0xf3   : > { %v1375_v33 = vrot.slane %v1361_v25, %v2978_v49  ;;  %v1737_v35 = vrot.slane %v1721_v27, %v2978_v49  ;;  %v1744_v36 = vrot.slane %v1722_v28, %v2978_v49  ;;  %v740_v38 = vrot.slane %v435_v5, %v2960_v41 }
  0xf4   : > { %v1751_v47 = vrot.slane %v1723_v30, %v2978_v49  ;;  %v744_v50 = vrot.slane %v435_v5, %v2963_v42  ;;  %v748_v51 = vrot.slane %v435_v5, %v2966_v43  ;;  %v752_v52 = vrot.slane %v435_v5, %v2969_v44 }
  0xf5   : > { %v1376_v54 = vcombine.low %v1368_v26, %v1375_v33  ;;  %v1752_v55 = vcombine.low %v1730_v16, %v1737_v35  ;;  %v756_v48 = vrot.slane %v435_v5, %v2972_v45  ;;  %v760_v56 = vrot.slane %v435_v5, %v2975_v46  ;;  %v453_v26 = vpop.xlane.xlu0 %452 }
  0xf6   : > { %v1753_v57 = vcombine.low %v1744_v36, %v1751_v47  ;;  %v1377_v58 = vcombine.low %v732_v31, %v736_v32  ;;  %v1378_v59 = vcombine.low %v740_v38, %v744_v50  ;;  %v1379_v60 = vcombine.low %v748_v51, %v752_v52 }
  0xf7   : > { %1791 = vperm.xlu1 %2643, %v1376_v54   ;;  %v1760_v61 = vrot.slane %v1752_v55, %v2978_v49  ;;  %v1380_v62 = vcombine.low %v756_v48, %v760_v56  ;;  %v796_v0 = vrot.slane %v441_v29, %v2954_v39  ;;  %v800_v1 = vrot.slane %v441_v29, %v2957_v40 }
  0xf8   : > { %v1767_v3 = vrot.slane %v1753_v57, %v2978_v49  ;;  %v1387_v4 = vrot.slane %v1377_v58, %v2978_v49  ;;  %v1394_v6 = vrot.slane %v1378_v59, %v2978_v49  ;;  %v1401_v5 = vrot.slane %v1379_v60, %v2978_v49 }
  0xf9   : > { %v1408_v7 = vrot.slane %v1380_v62, %v2978_v49  ;;  %v804_v8 = vrot.slane %v441_v29, %v2960_v41  ;;  %v808_v9 = vrot.slane %v441_v29, %v2963_v42  ;;  %v812_v10 = vrot.slane %v441_v29, %v2966_v43 }
  0xfa   : > { %v1768_v11 = vcombine.low %v1760_v61, %v1767_v3  ;;  %v1409_v12 = vcombine.low %v1387_v4, %v1394_v6  ;;  %v816_v13 = vrot.slane %v441_v29, %v2969_v44  ;;  %v820_v14 = vrot.slane %v441_v29, %v2972_v45 }
  0xfb   : > { %v1410_v53 = vcombine.low %v1401_v5, %v1408_v7  ;;  %v824_v15 = vrot.slane %v441_v29, %v2975_v46  ;;  %v1475_v17 = vcombine.low %v796_v0, %v800_v1  ;;  %v1476_v18 = vcombine.low %v804_v8, %v808_v9 }
  0xfc   : > { %1815 = vperm.xlu0 %2642, %v1768_v11   ;;  %v1417_v63 = vrot.slane %v1409_v12, %v2978_v49  ;;  %v1477_v19 = vcombine.low %v812_v10, %v816_v13  ;;  %v860_v20 = vrot.slane %v447_v2, %v2954_v39  ;;  %v864_v21 = vrot.slane %v447_v2, %v2957_v40 }
  0xfd   : > { %v1424_v22 = vrot.slane %v1410_v53, %v2978_v49  ;;  %v1478_v23 = vcombine.low %v820_v14, %v824_v15  ;;  %v1485_v24 = vrot.slane %v1475_v17, %v2978_v49  ;;  %v1492_v25 = vrot.slane %v1476_v18, %v2978_v49 }
  0xfe   : > { %v1499_v27 = vrot.slane %v1477_v19, %v2978_v49  ;;  %v868_v28 = vrot.slane %v447_v2, %v2960_v41  ;;  %v872_v29 = vrot.slane %v447_v2, %v2963_v42  ;;  %v876_v30 = vrot.slane %v447_v2, %v2966_v43 }
  0xff   : > { %v1425_v16 = vcombine.low %v1417_v63, %v1424_v22  ;;  %v1506_v31 = vrot.slane %v1478_v23, %v2978_v49  ;;  %v1507_v32 = vcombine.low %v1485_v24, %v1492_v25  ;;  %v880_v33 = vrot.slane %v447_v2, %v2969_v44 }
 0x100   : > { %v884_v35 = vrot.slane %v447_v2, %v2972_v45  ;;  %v888_v36 = vrot.slane %v447_v2, %v2975_v46  ;;  %v1573_v38 = vcombine.low %v860_v20, %v864_v21  ;;  %v1574_v47 = vcombine.low %v868_v28, %v872_v29 }
 0x101   : > { %1794 = vperm.xlu1 %2643, %v1425_v16   ;;  %v1508_v50 = vcombine.low %v1499_v27, %v1506_v31  ;;  %v1515_v51 = vrot.slane %v1507_v32, %v2978_v49  ;;  %v1575_v52 = vcombine.low %v876_v30, %v880_v33  ;;  %v924_v54 = vrot.slane %v453_v26, %v2954_v39 }
 0x102   : > { %v1576_v55 = vcombine.low %v884_v35, %v888_v36  ;;  %v1583_v48 = vrot.slane %v1573_v38, %v2978_v49  ;;  %v1590_v56 = vrot.slane %v1574_v47, %v2978_v49  ;;  %v928_v57 = vrot.slane %v453_v26, %v2957_v40 }
 0x103   : > { %v1522_v58 = vrot.slane %v1508_v50, %v2978_v49  ;;  %v1597_v59 = vrot.slane %v1575_v52, %v2978_v49  ;;  %v932_v60 = vrot.slane %v453_v26, %v2960_v41  ;;  %v936_v61 = vrot.slane %v453_v26, %v2963_v42 }
 0x104   : > { %v1604_v62 = vrot.slane %v1576_v55, %v2978_v49  ;;  %v1605_v0 = vcombine.low %v1583_v48, %v1590_v56  ;;  %v940_v39 = vrot.slane %v453_v26, %v2966_v43  ;;  %v944_v1 = vrot.slane %v453_v26, %v2969_v44 }
 0x105   : > { %v1523_v2 = vcombine.low %v1515_v51, %v1522_v58  ;;  %v948_v3 = vrot.slane %v453_v26, %v2972_v45  ;;  %v952_v40 = vrot.slane %v453_v26, %v2975_v46  ;;  %v1671_v4 = vcombine.low %v924_v54, %v928_v57 }
 0x106   : > { %v1606_v6 = vcombine.low %v1597_v59, %v1604_v62  ;;  %v1613_v5 = vrot.slane %v1605_v0, %v2978_v49  ;;  %v1672_v7 = vcombine.low %v932_v60, %v936_v61  ;;  %v1673_v41 = vcombine.low %v940_v39, %v944_v1 }
 0x107   : > { %1800 = vperm.xlu1 %2643, %v1523_v2   ;;  %v1674_v42 = vcombine.low %v948_v3, %v952_v40  ;;  %v1681_v8 = vrot.slane %v1671_v4, %v2978_v49  ;;  %v3235_v19 = vand.u32 127, %v473_v34 }
 0x108   : > { %v1620_v9 = vrot.slane %v1606_v6, %v2978_v49  ;;  %v1688_v43 = vrot.slane %v1672_v7, %v2978_v49  ;;  %v1695_v44 = vrot.slane %v1673_v41, %v2978_v49 }
 0x109   : > { %v1702_v45 = vrot.slane %v1674_v42, %v2978_v49  ;;  %v1823_v20 = vadd.s32 4294967288, %v3235_v19  ;;  %v1830_v22 = vadd.s32 4294967280, %v3235_v19  ;;  %v1837_v23 = vadd.s32 4294967272, %v3235_v19 }
 0x10a   : > { %v1621_v10 = vcombine.low %v1613_v5, %v1620_v9  ;;  %v1703_v46 = vcombine.low %v1681_v8, %v1688_v43  ;;  %v1844_v24 = vadd.s32 4294967264, %v3235_v19  ;;  %v1851_v26 = vadd.s32 4294967256, %v3235_v19 }
 0x10b   : > { %v1704_v11 = vcombine.low %v1695_v44, %v1702_v45  ;;  %v1826_v25 = vsub.s32 %v1823_v20, %v2951_v37  ;;  %v1833_v28 = vsub.s32 %v1830_v22, %v2951_v37  ;;  %v1858_v29 = vadd.s32 4294967248, %v3235_v19 }
 0x10c   : > { %1806 = vperm.xlu1 %2643, %v1621_v10   ;;  %v1711_v12 = vrot.slane %v1703_v46, %v2978_v49  ;;  %v1821_v34 = vsub.s32 %v3235_v19, %v2951_v37  ;;  %v1840_v30 = vsub.s32 %v1837_v23, %v2951_v37  ;;  %v1865_v16 = vadd.s32 4294967240, %v3235_v19 }
 0x10d   : > { %v1718_v13 = vrot.slane %v1704_v11, %v2978_v49  ;;  %v1847_v32 = vsub.s32 %v1844_v24, %v2951_v37  ;;  %v1872_v33 = vadd.s32 4294967232, %v3235_v19  ;;  %v1854_v36 = vsub.s32 %v1851_v26, %v2951_v37 }
 0x10e   : > { %v1861_v50 = vsub.s32 %v1858_v29, %v2951_v37  ;;  %v1868_v54 = vsub.s32 %v1865_v16, %v2951_v37  ;;  %v1886_v56 = vadd.s32 4294967216, %v3235_v19  ;;  %v1879_v58 = vadd.s32 4294967224, %v3235_v19  ;;  %v407_v16 = vld [vmem:[#allocation2] sm:$0x1] }
 0x10f   : > { %v1719_v14 = vcombine.low %v1711_v12, %v1718_v13  ;;  %v1875_v48 = vsub.s32 %v1872_v33, %v2951_v37  ;;  %v1893_v39 = vadd.s32 4294967208, %v3235_v19  ;;  %v1900_v7 = vadd.s32 4294967200, %v3235_v19 }
 0x110   : > { %v1889_v4 = vsub.s32 %v1886_v56, %v2951_v37  ;;  %v1882_v6 = vsub.s32 %v1879_v58, %v2951_v37  ;;  %v1907_v9 = vadd.s32 4294967192, %v3235_v19  ;;  %v1914_v12 = vadd.s32 4294967184, %v3235_v19 }
 0x111   : > { %1812 = vperm.xlu1 %2643, %v1719_v14   ;;  %v1896_v10 = vsub.s32 %v1893_v39, %v2951_v37  ;;  %v1903_v46 = vsub.s32 %v1900_v7, %v2951_v37  ;;  %v1921_v13 = vadd.s32 4294967176, %v3235_v19 }
 0x112   : > { %v1917_v20 = vsub.s32 %v1914_v12, %v2951_v37 }
 0x142   : > { %v1771_v27 = vpop.permute.xlu0 %1770 }
 0x143   : > { %v1822_v51 = vrot.slane %v1771_v27, %v1821_v34 }
 0x148   : > { %v1774_v53 = vpop.permute.xlu1 %1773 }
 0x149   : > { %v1827_v35 = vrot.slane %v1774_v53, %v1826_v25 }
 0x14b   : > { %v1829_v57 = vsel %vm1828_vm1, %v1827_v35, %v1822_v51 }
 0x14c   : > { %v1777_v15 = vpop.permute.xlu1 %1776 }
 0x14d   : > { %v1834_v38 = vrot.slane %v1777_v15, %v1833_v28 }
 0x14f   : > { %v1836_v61 = vsel %vm1835_vm2, %v1834_v38, %v1829_v57 }
 0x151   : > { %v1780_v17 = vpop.permute.xlu1 %1779 }
 0x152   : > { %v1841_v52 = vrot.slane %v1780_v17, %v1840_v30 }
 0x154   : > { %v1843_v0 = vsel %vm1842_vm3, %v1841_v52, %v1836_v61 }
 0x156   : > { %v1783_v18 = vpop.permute.xlu1 %1782 }
 0x157   : > { %v1848_v55 = vrot.slane %v1783_v18, %v1847_v32  ;;  %v1910_v18 = vsub.s32 %v1907_v9, %v2951_v37 }
 0x159   : > { %v1850_v2 = vsel %vm1849_vm4, %v1848_v55, %v1843_v0 }
 0x15c   : > { %v1798_v47 = vpop.permute.xlu0 %1797 }
 0x15d   : > { %v1883_v45 = vrot.slane %v1798_v47, %v1882_v6 }
 0x161   : > { %v1786_v63 = vpop.permute.xlu1 %1785 }
 0x162   : > { %v1855_v59 = vrot.slane %v1786_v63, %v1854_v36 }
 0x164   : > { %v1857_v5 = vsel %vm1856_vm5, %v1855_v59, %v1850_v2 }
 0x166   : > { %v1804_v3 = vpop.permute.xlu0 %1803 }
 0x167   : > { %v1897_v17 = vrot.slane %v1804_v3, %v1896_v10 }
 0x16b   : > { %v1789_v21 = vpop.permute.xlu1 %1788 }
 0x16c   : > { %v1862_v62 = vrot.slane %v1789_v21, %v1861_v50  ;;  %v1924_v21 = vsub.s32 %v1921_v13, %v2951_v37 }
 0x16e   : > { %v1864_v41 = vsel %vm1863_vm6, %v1862_v62, %v1857_v5 }
 0x171   : > { %v1810_v11 = vpop.permute.xlu0 %1809 }
 0x172   : > { %v1911_v25 = vrot.slane %v1810_v11, %v1910_v18 }
 0x176   : > { %v1792_v31 = vpop.permute.xlu1 %1791 }
 0x177   : > { %v1869_v1 = vrot.slane %v1792_v31, %v1868_v54 }
 0x179   : > { %v1871_v42 = vsel %vm1870_vm7, %v1869_v1, %v1864_v41 }
 0x17b   : > { %v1816_v23 = vpop.permute.xlu0 %1815 }
 0x17c   : > { %v1925_v27 = vrot.slane %v1816_v23, %v1924_v21 }
 0x180   : > { %v1795_v60 = vpop.permute.xlu1 %1794 }
 0x181   : > { %v1876_v40 = vrot.slane %v1795_v60, %v1875_v48 }
 0x183   : > { %v1878_v43 = vsel %vm1877_vm8, %v1876_v40, %v1871_v42 }
 0x184   : > { %v1885_v14 = vsel %vm1884_vm9, %v1883_v45, %v1878_v43 }
 0x186   : > { %v1801_v8 = vpop.permute.xlu1 %1800 }
 0x187   : > { %v1890_v44 = vrot.slane %v1801_v8, %v1889_v4 }
 0x189   : > { %v1892_v53 = vsel %vm1891_vm10, %v1890_v44, %v1885_v14 }
 0x18a   : > { %v1899_v22 = vsel %vm1898_vm11, %v1897_v17, %v1892_v53 }
 0x18b   : > { %v1807_v15 = vpop.permute.xlu1 %1806 }
 0x18c   : > { %v1904_v63 = vrot.slane %v1807_v15, %v1903_v46 }
 0x18e   : > { %v1906_v24 = vsel %vm1905_vm12, %v1904_v63, %v1899_v22 }
 0x18f   : > { %v1913_v28 = vsel %vm1912_vm13, %v1911_v25, %v1906_v24 }
 0x190   : > { %v1813_v19 = vpop.permute.xlu1 %1812 }
 0x191   : > { %v1918_v26 = vrot.slane %v1813_v19, %v1917_v20 }
 0x193   : > { %v1920_v29 = vsel %vm1919_vm14, %v1918_v26, %v1913_v28 }
 0x194   : > { %v1927_v34 = vsel %vm1926_vm15, %v1925_v27, %v1920_v29 }
 0x195   : > { %v1934_v30 = vrot.slane %v1927_v34, %v2978_v49 }
 0x197   : > { %v1941_v31 = vrot.slane %v1934_v30, %v2978_v49 }
 0x199   : > { %v1943_v32 = vadd.f32 %v1941_v31, %v407_v16 }
 0x19b   : > { %1944 = vst [vmem:[#allocation2] sm:$0x1] %v1943_v32 }
 0x19c PF: > { %1946 = sbr.rel (!%p381_p13) target bundleno = 904 (0x388), region = 52  ;;  %v1948_v37 = vld [vmem:[%s3488_s1] sm:$0xff] (%p381_p13)  ;;  %v1949_v33 = vld [vmem:[%s3488_s1 + $0x8] sm:$0xff] (%p381_p13)  ;;  %v1950_v35 = vld [vmem:[%s3488_s1 + $0x10] sm:$0xff] (%p381_p13)  ;;  %v2783_v36 = vmov (%p381_p13), 0.0|0.0   ;;  %vm2784_vm0 = vmmov (%p381_p13), 0   ;;  %v2046_v15 = vlaneseq (%p381_p13) }
 0x19d   : > { %2528 = vmatprep.subr.bf16.mxu0 (%p381_p13), %v2783_v36  ;;  %v2529_v49 = vpack.c.bf16 (%p381_p13), %v1949_v33, %v1948_v37  ;;  %v1951_v38 = vld [vmem:[%s3488_s1 + $0x18] sm:$0xff] (%p381_p13)  ;;  %v2785_v47 = vmov (%p381_p13), 0.0   ;;  %v1952_v51 = vld [vmem:[%s3488_s1 + $0x20] sm:$0xff] (%p381_p13)  ;;  %v1953_v52 = vld [vmem:[%s3488_s1 + $0x28] sm:$0xff] (%p381_p13)  ;;  %vm2056_vm1 = vcmask (%p381_p13), 261120   ;;  %s3506_s9 = scalar_lea.vmem (%p381_p13), [#allocation4], %s2898_s18 }
 0x19e   : > { %2525 = vmatprep.mubr.msk.f32.mxu0 (%p381_p13), %vm2784_vm0, %v2785_v47  ;;  %2124 = vmatprep.mubr.f32.mxu1 (%p381_p13), %v2785_v47  ;;  %v2532_v50 = vpack.c.bf16 (%p381_p13), %v1951_v38, %v1950_v35  ;;  %v2037_v54 = vld [vmem:[%s3490_s3 + $0x8] sm:$0xff] (%p381_p13)  ;;  %v2039_v55 = vld [vmem:[%s3490_s3 + $0x18] sm:$0xff] (%p381_p13)  ;;  %v2036_v48 = vld [vmem:[%s3490_s3] sm:$0xff] (%p381_p13)  ;;  %v2535_v57 = vpack.c.bf16 (%p381_p13), %v1953_v52, %v1952_v51  ;;  %v2047_v17 = vshrl.u32 (%p381_p13), %v2046_v15, 7  ;;  %s3507_s10 = scalar_lea.vmem (%p381_p13), [#allocation6], %s2898_s18 }
 0x19f   : > { %2530 = vmatpush3.bf16.msra.mxu0 (%p381_p13), %v2529_v49  ;;  %v2038_v56 = vld [vmem:[%s3490_s3 + $0x10] sm:$0xff] (%p381_p13)  ;;  %v2552_v58 = vpack.c.bf16 (%p381_p13), %v2039_v55, %v2037_v54  ;;  %v1955_v61 = vld [vmem:[%s3488_s1 + $0x38] sm:$0xff] (%p381_p13)  ;;  %v1956_v0 = vld [vmem:[%s3488_s1 + $0x40] sm:$0xff] (%p381_p13) }
 0x1a0   : > { %2531 = vmatprep.subr.bf16.mxu0 (%p381_p13), %v2783_v36  ;;  %v2554_v59 = vpack.c.bf16 (%p381_p13), %v2038_v56, %v2036_v48  ;;  %v1954_v60 = vld [vmem:[%s3488_s1 + $0x30] sm:$0xff] (%p381_p13)  ;;  %v1957_v39 = vld [vmem:[%s3488_s1 + $0x48] sm:$0xff] (%p381_p13)  ;;  %v1959_v3 = vld [vmem:[%s3488_s1 + $0x58] sm:$0xff] (%p381_p13)  ;;  %v2048_v18 = vsub.s32 (%p381_p13), 0, %v2047_v17  ;;  %v2052_v20 = vsub.s32 (%p381_p13), 1, %v2047_v17 }
 0x1a1   : > { %2553 = vmatprep.subr.bf16.mxu1 (%p381_p13), %v2552_v58  ;;  %v2538_v62 = vpack.c.bf16 (%p381_p13), %v1955_v61, %v1954_v60  ;;  %v2541_v1 = vpack.c.bf16 (%p381_p13), %v1957_v39, %v1956_v0  ;;  %v1958_v2 = vld [vmem:[%s3488_s1 + $0x50] sm:$0xff] (%p381_p13)  ;;  %v1960_v4 = vld [vmem:[%s3488_s1 + $0x60] sm:$0xff] (%p381_p13)  ;;  %v1961_v6 = vld [vmem:[%s3488_s1 + $0x68] sm:$0xff] (%p381_p13) }
 0x1a2   : > { %2555 = vmatpush1.bf16.msra.mxu1 (%p381_p13), %v2554_v59  ;;  %v2544_v40 = vpack.c.bf16 (%p381_p13), %v1959_v3, %v1958_v2  ;;  %v2547_v5 = vpack.c.bf16 (%p381_p13), %v1961_v6, %v1960_v4  ;;  %v1962_v7 = vld [vmem:[%s3488_s1 + $0x70] sm:$0xff] (%p381_p13)  ;;  %v1963_v41 = vld [vmem:[%s3488_s1 + $0x78] sm:$0xff] (%p381_p13)  ;;  %v1947_v8 = vld [vmem:[#allocation2] sm:$0x1] (%p381_p13) }
 0x1a3   : > { %2533 = vmatpush3.bf16.msra.mxu0 %v2532_v50  ;;  %v2550_v42 = vpack.c.bf16 %v1963_v41, %v1962_v7  ;;  %v2041_v9 = vld [vmem:[%s3490_s3 + $0x28] sm:$0xff]  ;;  %v2043_v43 = vld [vmem:[%s3490_s3 + $0x38] sm:$0xff]  ;;  %v2040_v45 = vld [vmem:[%s3490_s3 + $0x20] sm:$0xff] }
 0x1a4   : > { %2534 = vmatprep.subr.bf16.mxu0 %v2783_v36  ;;  %v2556_v44 = vpack.c.bf16 %v2043_v43, %v2041_v9  ;;  %v2042_v10 = vld [vmem:[%s3490_s3 + $0x30] sm:$0xff]  ;;  %v1964_v11 = vld [vmem:[%s3489_s2] sm:$0x1] }
 0x1a5   : > { %v2558_v46 = vpack.c.bf16 %v2042_v10, %v2040_v45  ;;  %v2044_v63 = vld [vmem:[%s3491_s4] sm:$0x3] }
 0x1a6   : > { %2557 = vmatprep.subr.bf16.mxu1 %v2556_v44  ;;  %v2049_v21 = vrot.slane %v2044_v63, %v2048_v18  ;;  %v2053_v22 = vrot.slane %v2044_v63, %v2052_v20 }
 0x1a7   : > { %2536 = vmatpush3.bf16.msra.mxu0 %v2535_v57  ;;  %2559 = vmatpush1.bf16.msra.mxu1 %v2558_v46 }
 0x1a8   : > { %2537 = vmatprep.subr.bf16.mxu0 %v2783_v36 }
 0x1ab   : > { %2539 = vmatpush3.bf16.msra.mxu0 %v2538_v62 }
 0x1ac   : > { %2540 = vmatprep.subr.bf16.mxu0 %v2783_v36 }
 0x1af   : > { %2542 = vmatpush3.bf16.msra.mxu0 %v2541_v1 }
 0x1b0   : > { %2543 = vmatprep.subr.bf16.mxu0 %v2783_v36 }
 0x1b3   : > { %2545 = vmatpush3.bf16.msra.mxu0 %v2544_v40 }
 0x1b4   : > { %2546 = vmatprep.subr.bf16.mxu0 %v2783_v36 }
 0x1b7   : > { %2548 = vmatpush3.bf16.msra.mxu0 %v2547_v5 }
 0x1b8   : > { %2549 = vmatprep.subr.bf16.mxu0 %v2783_v36 }
 0x1bb   : > { %2551 = vmatpush3.bf16.msra.mxu0 %v2550_v42 }
 0x1be   : > { %2526 = vmatmul.mubr.f32.vlgmr.msra.gmra.mrb[0].mxu0 %v1947_v8 }
 0x291   : > { %v2031_v12 = vpop.f32.mrb[0].mxu0 }
 0x292   : > { %v2032_v13 = vadd.f32 %v2031_v12, %v1964_v11  ;;  %v2527_v14 = vpop.f32.mrb[1].mxu0 }
 0x294   : > { %v2035_v53 = vmax.f32 %v2032_v13, 0.0 }
 0x296   : > { %2464 = vmatmul.mubr.msk.f32.vlgmr.msra.gmra.mrb[0].mxu1 %vm2056_vm1, %v2035_v53 }
 0x369   : > { %v2126_v23 = vpop.f32.mrb[0].mxu1 }
 0x36a   : > { %v2127_v24 = vadd.f32 %v2126_v23, %v2049_v21  ;;  %v2128_v25 = vpop.f32.mrb[1].mxu1 }
 0x36b   : > { %v2129_v19 = vadd.f32 %v2128_v25, %v2053_v22 }
 0x36c   : > { %v2465_v26 = vmul.f32 -1.442695, %v2127_v24 }
 0x36d   : > { %v2466_v27 = vmul.f32 -1.442695, %v2129_v19 }
 0x36e   : > { %2644 = vpow2.f32 %v2465_v26 }
 0x36f   : > { %2646 = vpow2.f32 %v2466_v27 }
 0x378   : > { %v2645_v28 = vpop.eup %2644 }
 0x379   : > { %v2647_v29 = vpop.eup %2646  ;;  %v2137_v34 = vadd.f32 1.0, %v2645_v28 }
 0x37a   : > { %v2138_v30 = vadd.f32 1.0, %v2647_v29 }
 0x37b   : > { %2648 = vrcp.f32 %v2137_v34 }
 0x37c   : > { %2650 = vrcp.f32 %v2138_v30 }
 0x385   : > { %v2649_v16 = vpop.eup %2648 }
 0x386   : > { %v2651_v31 = vpop.eup %2650  ;;  %2143 = vst [vmem:[#allocation3] sm:$0x1] %v2649_v16  ;;  %2144 = vst [vmem:[%s3506_s9] sm:$0x1] %v2649_v16 }
 0x387   : > { %2145 = vst [vmem:[%s3507_s10] sm:$0x1] %v2651_v31 }
 0x388 PF: > { %p2467_p1 = scmp.ne.s32.totalorder %s2762_s27, 1 }
 0x389   : > { %v2152_v37 = vld [vmem:[%s2906_s23 + $0x10] sm:$0xff] (!%p2467_p1)  ;;  %v2150_v33 = vld [vmem:[%s2906_s23] sm:$0xff] (!%p2467_p1)  ;;  %vm2250_vm2 = vcmask (!%p2467_p1), 523264   ;;  %v2153_v47 = vld [vmem:[%s2906_s23 + $0x18] sm:$0xff] (!%p2467_p1) }
 0x38a   : > { %2149 = sbr.rel (%p2467_p1) target bundleno = 1056 (0x420), region = 56  ;;  %v2151_v50 = vld [vmem:[%s2906_s23 + $0x8] sm:$0xff] (!%p2467_p1)  ;;  %v2154_v56 = vld [vmem:[%s2906_s23 + $0x20] sm:$0xff] (!%p2467_p1)  ;;  %v2157_v61 = vld [vmem:[%s2906_s23 + $0x38] sm:$0xff] (!%p2467_p1) }
 0x38b   : > { %v2155_v48 = vld [vmem:[%s2906_s23 + $0x28] sm:$0xff] (!%p2467_p1)  ;;  %v2156_v62 = vld [vmem:[%s2906_s23 + $0x30] sm:$0xff] (!%p2467_p1)  ;;  %v2158_v40 = vld [vmem:[%s2906_s23 + $0x40] sm:$0xff] (!%p2467_p1) }
 0x38c   : > { %v2159_v3 = vld [vmem:[%s2906_s23 + $0x48] sm:$0xff] (!%p2467_p1)  ;;  %v2161_v41 = vld [vmem:[%s2906_s23 + $0x58] sm:$0xff] (!%p2467_p1)  ;;  %v2160_v42 = vld [vmem:[%s2906_s23 + $0x50] sm:$0xff] (!%p2467_p1) }
 0x38d   : > { %v2468_v32 = vld [vmem:[#allocation3] ss:$0 sm:$0xff] (!%p2467_p1)  ;;  %v2163_v45 = vld [vmem:[%s2906_s23 + $0x68] sm:$0xff] (!%p2467_p1)  ;;  %v2165_v14 = vld [vmem:[%s2906_s23 + $0x78] sm:$0xff] (!%p2467_p1) }
 0x38e   : > { %2180 = vbcast.lane.b32.xlu1 (!%p2467_p1), %v2468_v32, 272  ;;  %2172 = vbcast.lane.b32.xlu0 (!%p2467_p1), %v2468_v32, 256  ;;  %v2162_v10 = vld [vmem:[%s2906_s23 + $0x60] sm:$0xff] (!%p2467_p1)  ;;  %v2164_v53 = vld [vmem:[%s2906_s23 + $0x70] sm:$0xff] (!%p2467_p1) }
 0x392   : > { %2184 = vbcast.lane.b32.xlu1 %v2468_v32, 280  ;;  %2176 = vbcast.lane.b32.xlu0 %v2468_v32, 264 }
 0x396   : > { %2192 = vbcast.lane.b32.xlu1 %v2468_v32, 296  ;;  %2188 = vbcast.lane.b32.xlu0 %v2468_v32, 288 }
 0x39a   : > { %2200 = vbcast.lane.b32.xlu1 %v2468_v32, 312  ;;  %2196 = vbcast.lane.b32.xlu0 %v2468_v32, 304 }
 0x39e   : > { %2208 = vbcast.lane.b32.xlu1 %v2468_v32, 328  ;;  %2204 = vbcast.lane.b32.xlu0 %v2468_v32, 320 }
 0x3a2   : > { %2216 = vbcast.lane.b32.xlu1 %v2468_v32, 344  ;;  %2212 = vbcast.lane.b32.xlu0 %v2468_v32, 336 }
 0x3a6   : > { %2224 = vbcast.lane.b32.xlu1 %v2468_v32, 360  ;;  %2220 = vbcast.lane.b32.xlu0 %v2468_v32, 352 }
 0x3aa   : > { %2232 = vbcast.lane.b32.xlu1 %v2468_v32, 376  ;;  %2228 = vbcast.lane.b32.xlu0 %v2468_v32, 368 }
 0x400   : > { %v2181_v35 = vpop.permute.xlu1 %2180  ;;  %v2173_v36 = vpop.permute.xlu0 %2172 }
 0x401   : > { %v2236_v49 = vmul.f32 %v2181_v35, %v2152_v37  ;;  %v2234_v38 = vmul.f32 %v2173_v36, %v2150_v33 }
 0x403   : > { %2253 = vst.msk [vmem:[%s2911_s15 + $0x10] sm:$0xff] %vm2250_vm2, %v2236_v49  ;;  %2251 = vst.msk [vmem:[%s2911_s15] sm:$0xff] %vm2250_vm2, %v2234_v38 }
 0x404   : > { %v2185_v51 = vpop.permute.xlu1 %2184  ;;  %v2177_v52 = vpop.permute.xlu0 %2176 }
 0x405   : > { %v2237_v54 = vmul.f32 %v2185_v51, %v2153_v47  ;;  %v2235_v55 = vmul.f32 %v2177_v52, %v2151_v50 }
 0x407   : > { %2254 = vst.msk [vmem:[%s2911_s15 + $0x18] sm:$0xff] %vm2250_vm2, %v2237_v54  ;;  %2252 = vst.msk [vmem:[%s2911_s15 + $0x8] sm:$0xff] %vm2250_vm2, %v2235_v55 }
 0x408   : > { %v2193_v57 = vpop.permute.xlu1 %2192  ;;  %v2189_v58 = vpop.permute.xlu0 %2188 }
 0x409   : > { %v2239_v59 = vmul.f32 %v2193_v57, %v2155_v48  ;;  %v2238_v60 = vmul.f32 %v2189_v58, %v2154_v56 }
 0x40b   : > { %2256 = vst.msk [vmem:[%s2911_s15 + $0x28] sm:$0xff] %vm2250_vm2, %v2239_v59  ;;  %2255 = vst.msk [vmem:[%s2911_s15 + $0x20] sm:$0xff] %vm2250_vm2, %v2238_v60 }
 0x40c   : > { %v2201_v0 = vpop.permute.xlu1 %2200  ;;  %v2197_v39 = vpop.permute.xlu0 %2196 }
 0x40d   : > { %v2241_v1 = vmul.f32 %v2201_v0, %v2157_v61  ;;  %v2240_v2 = vmul.f32 %v2197_v39, %v2156_v62 }
 0x40f   : > { %2258 = vst.msk [vmem:[%s2911_s15 + $0x38] sm:$0xff] %vm2250_vm2, %v2241_v1  ;;  %2257 = vst.msk [vmem:[%s2911_s15 + $0x30] sm:$0xff] %vm2250_vm2, %v2240_v2 }
 0x410   : > { %v2209_v4 = vpop.permute.xlu1 %2208  ;;  %v2205_v6 = vpop.permute.xlu0 %2204 }
 0x411   : > { %v2243_v5 = vmul.f32 %v2209_v4, %v2159_v3  ;;  %v2242_v7 = vmul.f32 %v2205_v6, %v2158_v40 }
 0x413   : > { %2260 = vst.msk [vmem:[%s2911_s15 + $0x48] sm:$0xff] %vm2250_vm2, %v2243_v5  ;;  %2259 = vst.msk [vmem:[%s2911_s15 + $0x40] sm:$0xff] %vm2250_vm2, %v2242_v7 }
 0x414   : > { %v2217_v8 = vpop.permute.xlu1 %2216  ;;  %v2213_v9 = vpop.permute.xlu0 %2212 }
 0x415   : > { %v2245_v43 = vmul.f32 %v2217_v8, %v2161_v41  ;;  %v2244_v44 = vmul.f32 %v2213_v9, %v2160_v42 }
 0x417   : > { %2262 = vst.msk [vmem:[%s2911_s15 + $0x58] sm:$0xff] %vm2250_vm2, %v2245_v43  ;;  %2261 = vst.msk [vmem:[%s2911_s15 + $0x50] sm:$0xff] %vm2250_vm2, %v2244_v44 }
 0x418   : > { %v2225_v46 = vpop.permute.xlu1 %2224  ;;  %v2221_v11 = vpop.permute.xlu0 %2220 }
 0x419   : > { %v2247_v12 = vmul.f32 %v2225_v46, %v2163_v45  ;;  %v2246_v13 = vmul.f32 %v2221_v11, %v2162_v10 }
 0x41b   : > { %2264 = vst.msk [vmem:[%s2911_s15 + $0x68] sm:$0xff] %vm2250_vm2, %v2247_v12  ;;  %2263 = vst.msk [vmem:[%s2911_s15 + $0x60] sm:$0xff] %vm2250_vm2, %v2246_v13 }
 0x41c   : > { %v2233_v15 = vpop.permute.xlu1 %2232  ;;  %v2229_v17 = vpop.permute.xlu0 %2228 }
 0x41d   : > { %v2249_v18 = vmul.f32 %v2233_v15, %v2165_v14  ;;  %v2248_v63 = vmul.f32 %v2229_v17, %v2164_v53 }
 0x41f   : > { %2266 = vst.msk [vmem:[%s2911_s15 + $0x78] sm:$0xff] %vm2250_vm2, %v2249_v18  ;;  %2265 = vst.msk [vmem:[%s2911_s15 + $0x70] sm:$0xff] %vm2250_vm2, %v2248_v63 }
 0x420 PF: > { %s2469_s27 = sshll.u32 %s2766_s28, 4  ;;  %s3508_s19 = scalar_lea.vmem [#allocation4], %s2898_s18 }
 0x421   : > { %s3410_s16 = scalar_lea.hbm %s3493_s6, %s2469_s27  ;;  %s2299_s20 = sshll.u32 %s3508_s19, 4  ;;  %s2300_s20 = int_to_ptr.vmem [resolvable:$true] %s2299_s20 }
 0x422   : > { %s2278_s21 = scalar_lea.sflag [#allocation5], %s2898_s18  ;;  %s2652_s22 = scalar_lea.vmem %s2300_s20, 16 }
 0x423   : > { %p2653_p2 = scmp.ne.s32.totalorder %s2300_s20, %s2652_s22  ;;  %s2786_s15 = smov [#allocation4]  }
 0x424   : > { %s2656_s0 = sshll.u32 %s2786_s15, 4  ;;  %s2657_s0 = int_to_ptr.vmem [resolvable:$false] %s2656_s0 }
 0x425   : > { %p2654_p4 = pnand %p2653_p2, %p2877_p3  ;;  %s2658_s5 = scalar_lea.vmem %s2657_s0, 32 }
 0x426   : > { %p2659_p6 = scmp.lt.s32.totalorder %s2300_s20, %s2657_s0  ;;  %p2660_p7 = scmp.lt.s32.totalorder %s2658_s5, %s2652_s22 }
 0x427   : > { %p2655_p5 = pneg %p2654_p4 }
 0x428   : > { %p2661_p8 = por %p2660_p7, %p2659_p6 }
 0x42a   : > { %p2662_p10 = pnand %p2661_p8, %p2655_p5 }
 0x42c   : > { %2665 = shalt.err (!%p2662_p10)
}
 0x42d   : > { %s2666_s30 = scalar_lea.hbm %s3410_s16, 16  ;;  %s2670_s10 = scalar_lea.hbm %s3493_s6, 32 }
 0x42e   : > { %p2667_p11 = scmp.ne.s32.totalorder %s3410_s16, %s2666_s30  ;;  %p2671_p0 = scmp.lt.u32.totalorder %s3410_s16, %s3493_s6 }
 0x42f   : > { %p2672_p1 = scmp.lt.u32.totalorder %s2670_s10, %s2666_s30  ;;  %p2674_p4 = scmp.lt.u32.totalorder %s2666_s30, %s3410_s16 }
 0x430   : > { %p2668_p12 = pnand %p2667_p11, %p2877_p3 }
 0x431   : > { %p2673_p2 = por %p2672_p1, %p2671_p0 }
 0x432   : > { %p2669_p13 = pneg %p2668_p12 }
 0x433   : > { %p2675_p5 = por %p2674_p4, %p2673_p2 }
 0x435   : > { %p2676_p6 = pnand %p2675_p5, %p2669_p13 }
 0x437   : > { %2679 = shalt.err (!%p2676_p6)
}
 0x438   : > { %2560 = dma.vmem_to_hbm [thread:$0]  (%p2877_p3), %s2300_s20, 16, %s3410_s16, %s2278_s21  }
 0x439   : > { %s3437_s15 = scalar_lea.hbm %s3494_s7, %s2469_s27  ;;  %s3509_s0 = scalar_lea.vmem [#allocation6], %s2898_s18 }
 0x43a   : > { %s2312_s5 = sshll.u32 %s3509_s0, 4  ;;  %s2282_s30 = scalar_lea.sflag [#allocation7], %s2898_s18  ;;  %s2313_s5 = int_to_ptr.vmem [resolvable:$true] %s2312_s5 }
 0x43b   : > { %s2680_s11 = scalar_lea.vmem %s2313_s5, 16  ;;  %s2787_s9 = smov [#allocation6]  }
 0x43c   : > { %p2681_p7 = scmp.ne.s32.totalorder %s2313_s5, %s2680_s11  ;;  %s2684_s10 = sshll.u32 %s2787_s9, 4  ;;  %s2685_s10 = int_to_ptr.vmem [resolvable:$false] %s2684_s10 }
 0x43d   : > { %s2686_s23 = scalar_lea.vmem %s2685_s10, 32  ;;  %p2687_p11 = scmp.lt.s32.totalorder %s2313_s5, %s2685_s10 }
 0x43e   : > { %p2682_p8 = pnand %p2681_p7, %p2877_p3  ;;  %p2688_p12 = scmp.lt.s32.totalorder %s2686_s23, %s2680_s11 }
 0x440   : > { %p2683_p10 = pneg %p2682_p8  ;;  %p2689_p13 = por %p2688_p12, %p2687_p11 }
 0x442   : > { %p2690_p0 = pnand %p2689_p13, %p2683_p10 }
 0x444   : > { %2693 = shalt.err (!%p2690_p0)
}
 0x445   : > { %s2694_s28 = scalar_lea.hbm %s3437_s15, 16  ;;  %s2698_s16 = scalar_lea.hbm %s3494_s7, 32 }
 0x446   : > { %p2695_p1 = scmp.ne.s32.totalorder %s3437_s15, %s2694_s28  ;;  %p2699_p5 = scmp.lt.u32.totalorder %s3437_s15, %s3494_s7 }
 0x447   : > { %p2700_p6 = scmp.lt.u32.totalorder %s2698_s16, %s2694_s28  ;;  %p2702_p8 = scmp.lt.u32.totalorder %s2694_s28, %s3437_s15 }
 0x448   : > { %p2696_p2 = pnand %p2695_p1, %p2877_p3 }
 0x449   : > { %p2701_p7 = por %p2700_p6, %p2699_p5 }
 0x44a   : > { %p2697_p4 = pneg %p2696_p2 }
 0x44b   : > { %p2703_p10 = por %p2702_p8, %p2701_p7 }
 0x44d   : > { %p2704_p11 = pnand %p2703_p10, %p2697_p4 }
 0x44f   : > { %2707 = shalt.err (!%p2704_p11)
}
 0x450   : > { %2561 = dma.vmem_to_hbm [thread:$0]  (%p2877_p3), %s2313_s5, 16, %s3437_s15, %s2282_s30  }
 0x451 PF: > { %p2571_p12 = scmp.ge.s32.totalorder %s2778_s8, 2  ;;  %s2337_s12 = sand.u32 1, %s2750_s24  }
 0x452   : > { %s2338_s19 = scalar_lea.sflag [#allocation5], %s2337_s12 }
 0x453   : > { %p2565_p13 = pnand %p2571_p12, %p2887_p9 }
 0x455   : > { %2741 = dma.done.wait (!%p2565_p13), %s2338_s19, 16  }
 0x456   : > { %2743 = vsyncadd (!%p2565_p13), %s2338_s19, 4294967280  ;;  %s2346_s22 = scalar_lea.sflag [#allocation7], %s2337_s12 }
 0x457   : > { %2745 = dma.done.wait (!%p2565_p13), %s2346_s22, 16  }
 0x458   : > { %2747 = vsyncadd (!%p2565_p13), %s2346_s22, 4294967280  ;;  %s24_s8 = sadd.s32 1, %s2778_s8   ;;  %s3510_s28 = sld [smem:[#allocation10_spill]] }
 0x459   : > { %p21_p0 = scmp.ge.s32.totalorder %s24_s8, 6   ;;  %s3511_s13 = sld [smem:[#allocation11_spill]] }
 0x45a   : > { %s3512_s30 = sld [smem:[#allocation12_spill]]  ;;  %s3513_s24 = smov %s2754_s25 }
 0x45b   : > { %s3514_s25 = smov %s2758_s26  ;;  %s3515_s26 = smov %s2895_s17 }
 0x45c   : > { %s3516_s27 = smov %s2770_s29  ;;  %23 = sbr.rel (!%p21_p0) target bundleno = 10 (0xa), region = 120 }
 0x45f   : > { %s3517_s29 = smov %s3511_s13 }
 0x463   :  { %2350 = vsyncpa [#allocation5], 1 }
 0x464   :  { %2352 = vsyncpa [#allocation5 + $0x1], 1 }
 0x465   :  { %2353 = vsyncpa [#allocation7], 1 }
 0x466   :  { %2355 = vsyncpa [#allocation7 + $0x1], 1 }

// kernel: tpu_custom_call.1
= control target key start
LH: loop header
LB: loop body
LE: loop exit
PB: predicated region body
PF: predicated region fallthrough
CT: control target
= control target key end

     0   :  { %s3487_s0 = inlined_call_operand.vmem [shape: f32[2,128,64], index: 0, kind: input, shape index: {}]   ;;  %s3488_s1 = inlined_call_operand.vmem [shape: f32[128,32], index: 1, kind: input, shape index: {}]   ;;  %s3489_s2 = inlined_call_operand.vmem [shape: f32[1,32], index: 2, kind: input, shape index: {}]   ;;  %s3490_s3 = inlined_call_operand.vmem [shape: f32[32,256], index: 3, kind: input, shape index: {}]   ;;  %s3491_s4 = inlined_call_operand.vmem [shape: f32[1,256], index: 4, kind: input, shape index: {}]   ;;  %s3492_s5 = inlined_call_operand.vmem [shape: f32[2,128,64], index: 5, kind: output, shape index: {0}]   ;;  %s3493_s6 = inlined_call_operand.hbm [shape: f32[2,1,128], index: 6, kind: output, shape index: {1}]   ;;  %s3494_s7 = inlined_call_operand.hbm [shape: f32[2,1,128], index: 7, kind: output, shape index: {2}]  }
   0x1   :  { %3497 = sst [smem:[#allocation13_spill]] %s3487_s0 }
   0x2   :  { %3498 = sst [smem:[#allocation14_spill]] %s3492_s5 }
   0x3   :  { %13 = vsyncpa [#allocation5], 0 }
   0x4   :  { %15 = vsyncpa [#allocation5 + $0x1], 0 }
   0x5   :  { %16 = vsyncpa [#allocation7], 0 }
   0x6   :  { %18 = vsyncpa [#allocation7 + $0x1], 0  ;;  %s2828_s24 = smov 0   ;;  %s2830_s25 = smov 0  }
   0x7   :  { %s2832_s26 = smov 0   ;;  %s2834_s27 = smov 0  }
   0x8   :  { %s2836_s28 = smov 0   ;;  %s2838_s29 = smov 0  }
   0x9   :  { %s2840_s30 = smov 0   ;;  %s2842_s8 = smov 0  }
   0xa LB: > { %3499 = sst [smem:[#allocation10_spill]] %s2774_s30  ;;  %s2453_s9 = sadd.s32 4294967295, %s2778_s8   ;;  %s2778_s8 = sphi %s2842_s8, %s24_s8   ;;  %s2774_s30 = sphi %s2840_s30, %s3512_s30   ;;  %s2770_s29 = sphi %s2838_s29, %s3517_s29   ;;  %s2766_s28 = sphi %s2836_s28, %s3510_s28   ;;  %s2762_s27 = sphi %s2834_s27, %s3516_s27   ;;  %s2758_s26 = sphi %s2832_s26, %s3515_s26   ;;  %s2754_s25 = sphi %s2830_s25, %s3514_s25   ;;  %s2750_s24 = sphi %s2828_s24, %s3513_s24  }
   0xb   : > { %s2454_s10 = sadd.s32 4294967294, %s2778_s8   ;;  %s39_s11 = sadd.s32 1, %s2770_s29 }
   0xc   : > { %p41_p0 = scmp.ge.s32.totalorder %s39_s11, 2  ;;  %s43_s12 = sadd.s32 1, %s2774_s30 }
   0xd   : > { %p214_p1 = scmp.ne.s32.totalorder %s2758_s26, %s2754_s25  ;;  %p215_p2 = scmp.eq.s32.totalorder %s2453_s9, 3 }
   0xe   : > { %s3519_s11 = smov (%p41_p0, %s39_s11), 0  ;;  %s3521_s12 = smov (!%p41_p0, %s43_s12), %s2774_s30 }
   0xf   : > { %3500 = sst [smem:[#allocation11_spill]] %s3519_s11  ;;  %p2877_p3 = por %p215_p2, %p214_p1 }
  0x10   : > { %p220_p4 = scmp.ne.s32.totalorder %s2754_s25, %s2750_s24  ;;  %p45_p5 = scmp.ge.s32.totalorder %s3521_s12, 2 }
  0x11   : > { %p221_p6 = scmp.eq.s32.totalorder %s2454_s10, 3  ;;  %p2457_p7 = scmp.ge.s32.totalorder %s2778_s8, 1 }
  0x12   : > { %p298_p8 = scmp.lt.s32.totalorder %s2778_s8, 5  ;;  %s3523_s12 = smov (%p45_p5, %s3521_s12), 0 }
  0x13   : > { %3502 = sst [smem:[#allocation12_spill]] %s3523_s12  ;;  %p2887_p9 = por %p221_p6, %p220_p4 }
  0x14   : > { %p299_p10 = pnand %p2457_p7, %p298_p8  ;;  %s201_s15 = ssub.s32 %s2774_s30, %s3523_s12 }
  0x15   : > { %s204_s16 = sadd.s32 1, %s2758_s26  ;;  %p202_p11 = scmp.eq.s32.totalorder %s201_s15, 0 }
  0x16   : > { %302 = sbr.rel (%p299_p10) target bundleno = 1105 (0x451), region = 40  ;;  %s2898_s18 = sand.u32 (!%p299_p10), 1, %s2754_s25  }
  0x17   : > { %s2895_s17 = scalar_select %p202_p11, %s2758_s26, %s204_s16  }
  0x18   : > { %p356_p12 = scmp.lt.s32.totalorder (!%p299_p10), %s2766_s28, 1  ;;  %p381_p13 = scmp.eq.s32.totalorder (!%p299_p10), %s2762_s27, 0 }
  0x19   : > { %s3504_s0 = sld [smem:[#allocation13_spill]] (!%p299_p10)  ;;  %s3505_s5 = sld [smem:[#allocation14_spill]] (!%p299_p10) }
  0x1d   : > { %s357_s19 = scalar_select %p356_p12, %s2766_s28, 1 }
  0x1e   : > { %386 = sbr.rel (!%p381_p13) target bundleno = 37 (0x25), region = 44  ;;  %v2780_v0 = vmov (%p381_p13), 0.0  }
  0x1f   : > { %s2473_s20 = sshll.u32 %s357_s19, 7  ;;  %387 = vst [vmem:[#allocation2] sm:$0x1] (%p381_p13), %v2780_v0 }
  0x20   : > { %s2906_s23 = scalar_lea.vmem %s3504_s0, %s2473_s20  ;;  %s2911_s15 = scalar_lea.vmem %s3505_s5, %s2473_s20 }
  0x25 PF: > { %p2463_p0 = scmp.ne.s32.totalorder %s2762_s27, 0 }
  0x26   : > { %v391_v1 = vld [vmem:[%s2906_s23] sm:$0xff] (!%p2463_p0)  ;;  %vm408_vm0 = vcmask (!%p2463_p0), 523264   ;;  %v393_v2 = vld [vmem:[%s2906_s23 + $0x10] sm:$0xff] (!%p2463_p0)  ;;  %v392_v3 = vld [vmem:[%s2906_s23 + $0x8] sm:$0xff] (!%p2463_p0)  ;;  %v2781_v31 = vmov (!%p2463_p0), 0   ;;  %v473_v34 = vlaneseq (!%p2463_p0)  ;;  %vm1828_vm1 = vcmask (!%p2463_p0), 130112  }
  0x27   : > { %390 = sbr.rel (%p2463_p0) target bundleno = 412 (0x19c), region = 48  ;;  %v409_v4 = vsel (!%p2463_p0), %vm408_vm0, %v391_v1, 0.0  ;;  %v415_v5 = vsel (!%p2463_p0), %vm408_vm0, %v393_v2, 0.0  ;;  %v394_v6 = vld [vmem:[%s2906_s23 + $0x18] sm:$0xff] (!%p2463_p0)  ;;  %v412_v7 = vsel (!%p2463_p0), %vm408_vm0, %v392_v3, 0.0  ;;  %v396_v9 = vld [vmem:[%s2906_s23 + $0x28] sm:$0xff] (!%p2463_p0)  ;;  %2642 = vset.pattern.permute.xlu0 (!%p2463_p0), %v2781_v31  ;;  %2643 = vset.pattern.permute.xlu1 (!%p2463_p0), %v2781_v31 }
  0x28   : > { %410 = vadd.xlane.f32.xlu0 (!%p2463_p0), %v409_v4  ;;  %416 = vadd.xlane.f32.xlu1 (!%p2463_p0), %v415_v5  ;;  %v418_v8 = vsel (!%p2463_p0), %vm408_vm0, %v394_v6, 0.0  ;;  %v395_v10 = vld [vmem:[%s2906_s23 + $0x20] sm:$0xff] (!%p2463_p0)  ;;  %v424_v11 = vsel (!%p2463_p0), %vm408_vm0, %v396_v9, 0.0  ;;  %v398_v13 = vld [vmem:[%s2906_s23 + $0x38] sm:$0xff] (!%p2463_p0)  ;;  %v397_v14 = vld [vmem:[%s2906_s23 + $0x30] sm:$0xff] (!%p2463_p0)  ;;  %v2951_v37 = vshrl.u32 (!%p2463_p0), %v473_v34, 7 }
  0x29   : > { %v421_v12 = vsel (!%p2463_p0), %vm408_vm0, %v395_v10, 0.0  ;;  %v430_v15 = vsel (!%p2463_p0), %vm408_vm0, %v398_v13, 0.0  ;;  %v427_v16 = vsel (!%p2463_p0), %vm408_vm0, %v397_v14, 0.0  ;;  %v400_v17 = vld [vmem:[%s2906_s23 + $0x48] sm:$0xff] (!%p2463_p0)  ;;  %v399_v18 = vld [vmem:[%s2906_s23 + $0x40] sm:$0xff] (!%p2463_p0)  ;;  %v402_v21 = vld [vmem:[%s2906_s23 + $0x58] sm:$0xff] (!%p2463_p0) }
  0x2a   : > { %v436_v19 = vsel (!%p2463_p0), %vm408_vm0, %v400_v17, 0.0  ;;  %v433_v20 = vsel (!%p2463_p0), %vm408_vm0, %v399_v18, 0.0  ;;  %v401_v22 = vld [vmem:[%s2906_s23 + $0x50] sm:$0xff] (!%p2463_p0)  ;;  %v442_v23 = vsel (!%p2463_p0), %vm408_vm0, %v402_v21, 0.0  ;;  %v404_v25 = vld [vmem:[%s2906_s23 + $0x68] sm:$0xff] (!%p2463_p0)  ;;  %v403_v26 = vld [vmem:[%s2906_s23 + $0x60] sm:$0xff] (!%p2463_p0) }
  0x2b   : > { %v439_v24 = vsel (!%p2463_p0), %vm408_vm0, %v401_v22, 0.0  ;;  %v448_v27 = vsel (!%p2463_p0), %vm408_vm0, %v404_v25, 0.0  ;;  %v445_v28 = vsel (!%p2463_p0), %vm408_vm0, %v403_v26, 0.0  ;;  %v406_v29 = vld [vmem:[%s2906_s23 + $0x78] sm:$0xff] (!%p2463_p0)  ;;  %v405_v30 = vld [vmem:[%s2906_s23 + $0x70] sm:$0xff] (!%p2463_p0)  ;;  %v2954_v39 = vsub.s32 (!%p2463_p0), 0, %v2951_v37 }
  0x2c   : > { %413 = vadd.xlane.f32.xlu0 (!%p2463_p0), %v412_v7  ;;  %419 = vadd.xlane.f32.xlu1 (!%p2463_p0), %v418_v8  ;;  %v454_v32 = vsel (!%p2463_p0), %vm408_vm0, %v406_v29, 0.0  ;;  %v451_v33 = vsel (!%p2463_p0), %vm408_vm0, %v405_v30, 0.0  ;;  %v2782_v35 = vmov (!%p2463_p0), 1966171168   ;;  %v2957_v40 = vsub.s32 (!%p2463_p0), 1, %v2951_v37 }
  0x2d   : > { %v990_v36 = vunpack.c.l.s4 (!%p2463_p0), %v2782_v35  ;;  %v2960_v41 = vsub.s32 (!%p2463_p0), 2, %v2951_v37  ;;  %v2963_v42 = vsub.s32 (!%p2463_p0), 3, %v2951_v37  ;;  %v2966_v43 = vsub.s32 (!%p2463_p0), 4, %v2951_v37 }
  0x2e   : > { %v2969_v44 = vsub.s32 5, %v2951_v37  ;;  %v2972_v45 = vsub.s32 6, %v2951_v37  ;;  %v2975_v46 = vsub.s32 7, %v2951_v37  ;;  %vm1835_vm2 = vcmask 195712  }
  0x2f   : > { %v991_v38 = vunpack.c.0.s8 %v990_v36  ;;  %vm1842_vm3 = vcmask 261312   ;;  %vm1849_vm4 = vcmask 326912   ;;  %vm1856_vm5 = vcmask 392512  }
  0x30   : > { %425 = vadd.xlane.f32.xlu1 %v424_v11  ;;  %422 = vadd.xlane.f32.xlu0 %v421_v12  ;;  %vm1863_vm6 = vcmask 458112   ;;  %vm1870_vm7 = vcmask 523712   ;;  %vm1877_vm8 = vcmask 589312   ;;  %vm1884_vm9 = vcmask 654912  }
  0x31   : > { %v2978_v49 = vsub.s32 %v991_v38, %v2951_v37  ;;  %vm1891_vm10 = vcmask 720512   ;;  %vm1898_vm11 = vcmask 786112   ;;  %vm1905_vm12 = vcmask 851712  }
  0x32   : > { %vm1912_vm13 = vcmask 917312   ;;  %vm1919_vm14 = vcmask 982912   ;;  %vm1926_vm15 = vcmask 1048512  }
  0x34   : > { %431 = vadd.xlane.f32.xlu1 %v430_v15  ;;  %428 = vadd.xlane.f32.xlu0 %v427_v16 }
  0x38   : > { %437 = vadd.xlane.f32.xlu1 %v436_v19  ;;  %434 = vadd.xlane.f32.xlu0 %v433_v20 }
  0x3c   : > { %443 = vadd.xlane.f32.xlu1 %v442_v23  ;;  %440 = vadd.xlane.f32.xlu0 %v439_v24 }
  0x40   : > { %449 = vadd.xlane.f32.xlu1 %v448_v27  ;;  %446 = vadd.xlane.f32.xlu0 %v445_v28 }
  0x44   : > { %455 = vadd.xlane.f32.xlu1 %v454_v32  ;;  %452 = vadd.xlane.f32.xlu0 %v451_v33 }
  0xb5   : > { %v411_v47 = vpop.xlane.xlu0 %410  ;;  %v417_v48 = vpop.xlane.xlu1 %416 }
  0xb6   : > { %v476_v50 = vrot.slane %v411_v47, %v2954_v39  ;;  %v480_v51 = vrot.slane %v411_v47, %v2957_v40  ;;  %v484_v52 = vrot.slane %v411_v47, %v2960_v41  ;;  %v488_v53 = vrot.slane %v411_v47, %v2963_v42 }
  0xb7   : > { %v492_v54 = vrot.slane %v411_v47, %v2966_v43  ;;  %v496_v55 = vrot.slane %v411_v47, %v2969_v44  ;;  %v500_v56 = vrot.slane %v411_v47, %v2972_v45  ;;  %v504_v57 = vrot.slane %v411_v47, %v2975_v46 }
  0xb8   : > { %v985_v58 = vcombine.low %v476_v50, %v480_v51  ;;  %v986_v59 = vcombine.low %v484_v52, %v488_v53  ;;  %v540_v60 = vrot.slane %v417_v48, %v2954_v39  ;;  %v544_v61 = vrot.slane %v417_v48, %v2957_v40 }
  0xb9   : > { %v414_v62 = vpop.xlane.xlu0 %413  ;;  %v2990_v63 = vpop.xlane.xlu1 %419  ;;  %v987_v0 = vcombine.low %v492_v54, %v496_v55  ;;  %v988_v1 = vcombine.low %v500_v56, %v504_v57  ;;  %v548_v2 = vrot.slane %v417_v48, %v2960_v41  ;;  %v552_v3 = vrot.slane %v417_v48, %v2963_v42 }
  0xba   : > { %v995_v4 = vrot.slane %v985_v58, %v2978_v49  ;;  %v1002_v5 = vrot.slane %v986_v59, %v2978_v49  ;;  %v508_v6 = vrot.slane %v414_v62, %v2954_v39  ;;  %v512_v7 = vrot.slane %v414_v62, %v2957_v40 }
  0xbb   : > { %v1009_v8 = vrot.slane %v987_v0, %v2978_v49  ;;  %v1016_v9 = vrot.slane %v988_v1, %v2978_v49  ;;  %v516_v10 = vrot.slane %v414_v62, %v2960_v41  ;;  %v520_v11 = vrot.slane %v414_v62, %v2963_v42 }
  0xbc   : > { %v1017_v12 = vcombine.low %v995_v4, %v1002_v5  ;;  %v524_v13 = vrot.slane %v414_v62, %v2966_v43  ;;  %v528_v14 = vrot.slane %v414_v62, %v2969_v44  ;;  %v532_v15 = vrot.slane %v414_v62, %v2972_v45 }
  0xbd   : > { %v3005_v16 = vpop.xlane.xlu1 %425  ;;  %v1018_v17 = vcombine.low %v1009_v8, %v1016_v9  ;;  %v536_v18 = vrot.slane %v414_v62, %v2975_v46  ;;  %v1034_v19 = vcombine.low %v508_v6, %v512_v7  ;;  %v1035_v20 = vcombine.low %v516_v10, %v520_v11 }
  0xbe   : > { %v1025_v21 = vrot.slane %v1017_v12, %v2978_v49  ;;  %v1036_v22 = vcombine.low %v524_v13, %v528_v14  ;;  %v556_v23 = vrot.slane %v417_v48, %v2966_v43  ;;  %v560_v24 = vrot.slane %v417_v48, %v2969_v44 }
  0xbf   : > { %v1032_v25 = vrot.slane %v1018_v17, %v2978_v49  ;;  %v1037_v26 = vcombine.low %v532_v15, %v536_v18  ;;  %v1044_v27 = vrot.slane %v1034_v19, %v2978_v49  ;;  %v1051_v28 = vrot.slane %v1035_v20, %v2978_v49 }
  0xc0   : > { %v1058_v29 = vrot.slane %v1036_v22, %v2978_v49  ;;  %v564_v30 = vrot.slane %v417_v48, %v2972_v45  ;;  %v568_v31 = vrot.slane %v417_v48, %v2975_v46  ;;  %v1083_v32 = vcombine.low %v540_v60, %v544_v61  ;;  %v423_v61 = vpop.xlane.xlu0 %422 }
  0xc1   : > { %v1033_v33 = vcombine.low %v1025_v21, %v1032_v25  ;;  %v1065_v35 = vrot.slane %v1037_v26, %v2978_v49  ;;  %v1066_v36 = vcombine.low %v1044_v27, %v1051_v28  ;;  %v1084_v38 = vcombine.low %v548_v2, %v552_v3  ;;  %v3021_v53 = vpop.xlane.xlu1 %431 }
  0xc2   : > { %v1085_v47 = vcombine.low %v556_v23, %v560_v24  ;;  %v1086_v50 = vcombine.low %v564_v30, %v568_v31  ;;  %v1093_v51 = vrot.slane %v1083_v32, %v2978_v49  ;;  %v572_v52 = vrot.slane %v2990_v63, %v2954_v39 }
  0xc3   : > { %1770 = vperm.xlu0 %2642, %v1033_v33   ;;  %v1067_v54 = vcombine.low %v1058_v29, %v1065_v35  ;;  %v1074_v55 = vrot.slane %v1066_v36, %v2978_v49  ;;  %v1100_v48 = vrot.slane %v1084_v38, %v2978_v49  ;;  %v576_v56 = vrot.slane %v2990_v63, %v2957_v40 }
  0xc4   : > { %v1107_v57 = vrot.slane %v1085_v47, %v2978_v49  ;;  %v1114_v58 = vrot.slane %v1086_v50, %v2978_v49  ;;  %v580_v59 = vrot.slane %v2990_v63, %v2960_v41  ;;  %v584_v60 = vrot.slane %v2990_v63, %v2963_v42 }
  0xc5   : > { %v1081_v62 = vrot.slane %v1067_v54, %v2978_v49  ;;  %v1115_v0 = vcombine.low %v1093_v51, %v1100_v48  ;;  %v588_v1 = vrot.slane %v2990_v63, %v2966_v43  ;;  %v592_v2 = vrot.slane %v2990_v63, %v2969_v44  ;;  %v438_v15 = vpop.xlane.xlu1 %437 }
  0xc6   : > { %v1116_v3 = vcombine.low %v1107_v57, %v1114_v58  ;;  %v596_v4 = vrot.slane %v2990_v63, %v2972_v45  ;;  %v600_v5 = vrot.slane %v2990_v63, %v2975_v46  ;;  %v1132_v6 = vcombine.low %v572_v52, %v576_v56 }
  0xc7   : > { %v1082_v7 = vcombine.low %v1074_v55, %v1081_v62  ;;  %v1123_v8 = vrot.slane %v1115_v0, %v2978_v49  ;;  %v1133_v9 = vcombine.low %v580_v59, %v584_v60  ;;  %v1134_v10 = vcombine.low %v588_v1, %v592_v2 }
  0xc8   : > { %v1130_v11 = vrot.slane %v1116_v3, %v2978_v49  ;;  %v1135_v12 = vcombine.low %v596_v4, %v600_v5  ;;  %v1142_v13 = vrot.slane %v1132_v6, %v2978_v49  ;;  %v604_v14 = vrot.slane %v423_v61, %v2954_v39 }
  0xc9   : > { %1773 = vperm.xlu1 %2643, %v1082_v7   ;;  %v1149_v17 = vrot.slane %v1133_v9, %v2978_v49  ;;  %v1156_v18 = vrot.slane %v1134_v10, %v2978_v49  ;;  %v608_v63 = vrot.slane %v423_v61, %v2957_v40  ;;  %v612_v19 = vrot.slane %v423_v61, %v2960_v41  ;;  %v444_v9 = vpop.xlane.xlu1 %443 }
  0xca   : > { %v1131_v20 = vcombine.low %v1123_v8, %v1130_v11  ;;  %v1163_v21 = vrot.slane %v1135_v12, %v2978_v49  ;;  %v616_v22 = vrot.slane %v423_v61, %v2963_v42  ;;  %v620_v23 = vrot.slane %v423_v61, %v2966_v43 }
  0xcb   : > { %v1164_v24 = vcombine.low %v1142_v13, %v1149_v17  ;;  %v624_v25 = vrot.slane %v423_v61, %v2969_v44  ;;  %v628_v26 = vrot.slane %v423_v61, %v2972_v45  ;;  %v632_v27 = vrot.slane %v423_v61, %v2975_v46 }
  0xcc   : > { %v1165_v28 = vcombine.low %v1156_v18, %v1163_v21  ;;  %v1181_v29 = vcombine.low %v604_v14, %v608_v63  ;;  %v1182_v30 = vcombine.low %v612_v19, %v616_v22  ;;  %v764_v31 = vrot.slane %v438_v15, %v2954_v39 }
  0xcd   : > { %1776 = vperm.xlu1 %2643, %v1131_v20   ;;  %v1172_v32 = vrot.slane %v1164_v24, %v2978_v49  ;;  %v1183_v33 = vcombine.low %v620_v23, %v624_v25  ;;  %v1184_v35 = vcombine.low %v628_v26, %v632_v27  ;;  %v768_v36 = vrot.slane %v438_v15, %v2957_v40 }
  0xce   : > { %v1179_v38 = vrot.slane %v1165_v28, %v2978_v49  ;;  %v1191_v47 = vrot.slane %v1181_v29, %v2978_v49  ;;  %v1198_v50 = vrot.slane %v1182_v30, %v2978_v49  ;;  %v772_v51 = vrot.slane %v438_v15, %v2960_v41 }
  0xcf   : > { %v1205_v52 = vrot.slane %v1183_v33, %v2978_v49  ;;  %v1212_v54 = vrot.slane %v1184_v35, %v2978_v49  ;;  %v776_v55 = vrot.slane %v438_v15, %v2963_v42  ;;  %v780_v48 = vrot.slane %v438_v15, %v2966_v43  ;;  %v429_v33 = vpop.xlane.xlu0 %428 }
  0xd0   : > { %v1180_v56 = vcombine.low %v1172_v32, %v1179_v38  ;;  %v1213_v57 = vcombine.low %v1191_v47, %v1198_v50  ;;  %v784_v58 = vrot.slane %v438_v15, %v2969_v44  ;;  %v788_v59 = vrot.slane %v438_v15, %v2972_v45 }
  0xd1   : > { %v1214_v60 = vcombine.low %v1205_v52, %v1212_v54  ;;  %v792_v61 = vrot.slane %v438_v15, %v2975_v46  ;;  %v1426_v62 = vcombine.low %v764_v31, %v768_v36  ;;  %v1427_v0 = vcombine.low %v772_v51, %v776_v55 }
  0xd2   : > { %1779 = vperm.xlu1 %2643, %v1180_v56   ;;  %v1221_v1 = vrot.slane %v1213_v57, %v2978_v49  ;;  %v1428_v2 = vcombine.low %v780_v48, %v784_v58  ;;  %v636_v3 = vrot.slane %v3005_v16, %v2954_v39  ;;  %v640_v4 = vrot.slane %v3005_v16, %v2957_v40 }
  0xd3   : > { %v1228_v5 = vrot.slane %v1214_v60, %v2978_v49  ;;  %v1429_v6 = vcombine.low %v788_v59, %v792_v61  ;;  %v1436_v7 = vrot.slane %v1426_v62, %v2978_v49  ;;  %v1443_v8 = vrot.slane %v1427_v0, %v2978_v49 }
  0xd4   : > { %v1450_v10 = vrot.slane %v1428_v2, %v2978_v49  ;;  %v644_v11 = vrot.slane %v3005_v16, %v2960_v41  ;;  %v648_v12 = vrot.slane %v3005_v16, %v2963_v42  ;;  %v652_v13 = vrot.slane %v3005_v16, %v2966_v43 }
  0xd5   : > { %v1229_v14 = vcombine.low %v1221_v1, %v1228_v5  ;;  %v1457_v15 = vrot.slane %v1429_v6, %v2978_v49  ;;  %v1458_v17 = vcombine.low %v1436_v7, %v1443_v8  ;;  %v656_v18 = vrot.slane %v3005_v16, %v2969_v44 }
  0xd6   : > { %v660_v63 = vrot.slane %v3005_v16, %v2972_v45  ;;  %v664_v19 = vrot.slane %v3005_v16, %v2975_v46  ;;  %v1230_v20 = vcombine.low %v636_v3, %v640_v4  ;;  %v1231_v21 = vcombine.low %v644_v11, %v648_v12  ;;  %v450_v3 = vpop.xlane.xlu1 %449 }
  0xd7   : > { %1782 = vperm.xlu1 %2643, %v1229_v14   ;;  %v1459_v22 = vcombine.low %v1450_v10, %v1457_v15  ;;  %v1466_v23 = vrot.slane %v1458_v17, %v2978_v49  ;;  %v1232_v24 = vcombine.low %v652_v13, %v656_v18  ;;  %v828_v25 = vrot.slane %v444_v9, %v2954_v39 }
  0xd8   : > { %v1233_v26 = vcombine.low %v660_v63, %v664_v19  ;;  %v1240_v27 = vrot.slane %v1230_v20, %v2978_v49  ;;  %v1247_v28 = vrot.slane %v1231_v21, %v2978_v49  ;;  %v832_v29 = vrot.slane %v444_v9, %v2957_v40 }
  0xd9   : > { %v1473_v30 = vrot.slane %v1459_v22, %v2978_v49  ;;  %v1254_v16 = vrot.slane %v1232_v24, %v2978_v49  ;;  %v836_v31 = vrot.slane %v444_v9, %v2960_v41  ;;  %v840_v32 = vrot.slane %v444_v9, %v2963_v42 }
  0xda   : > { %v1261_v35 = vrot.slane %v1233_v26, %v2978_v49  ;;  %v1262_v36 = vcombine.low %v1240_v27, %v1247_v28  ;;  %v844_v38 = vrot.slane %v444_v9, %v2966_v43  ;;  %v848_v47 = vrot.slane %v444_v9, %v2969_v44 }
  0xdb   : > { %v1474_v50 = vcombine.low %v1466_v23, %v1473_v30  ;;  %v852_v51 = vrot.slane %v444_v9, %v2972_v45  ;;  %v856_v52 = vrot.slane %v444_v9, %v2975_v46  ;;  %v1524_v54 = vcombine.low %v828_v25, %v832_v29 }
  0xdc   : > { %v1263_v55 = vcombine.low %v1254_v16, %v1261_v35  ;;  %v1270_v48 = vrot.slane %v1262_v36, %v2978_v49  ;;  %v1525_v56 = vcombine.low %v836_v31, %v840_v32  ;;  %v1526_v57 = vcombine.low %v844_v38, %v848_v47 }
  0xdd   : > { %1797 = vperm.xlu0 %2642, %v1474_v50   ;;  %v1527_v58 = vcombine.low %v852_v51, %v856_v52  ;;  %v1534_v59 = vrot.slane %v1524_v54, %v2978_v49  ;;  %v668_v60 = vrot.slane %v429_v33, %v2954_v39  ;;  %v672_v61 = vrot.slane %v429_v33, %v2957_v40 }
  0xde   : > { %v1277_v62 = vrot.slane %v1263_v55, %v2978_v49  ;;  %v1541_v0 = vrot.slane %v1525_v56, %v2978_v49  ;;  %v1548_v1 = vrot.slane %v1526_v57, %v2978_v49  ;;  %v676_v2 = vrot.slane %v429_v33, %v2960_v41 }
  0xdf   : > { %v1555_v4 = vrot.slane %v1527_v58, %v2978_v49  ;;  %v680_v5 = vrot.slane %v429_v33, %v2963_v42  ;;  %v684_v6 = vrot.slane %v429_v33, %v2966_v43  ;;  %v688_v7 = vrot.slane %v429_v33, %v2969_v44 }
  0xe0   : > { %v1278_v8 = vcombine.low %v1270_v48, %v1277_v62  ;;  %v1556_v9 = vcombine.low %v1534_v59, %v1541_v0  ;;  %v692_v10 = vrot.slane %v429_v33, %v2972_v45  ;;  %v696_v11 = vrot.slane %v429_v33, %v2975_v46  ;;  %v456_v48 = vpop.xlane.xlu1 %455 }
  0xe1   : > { %v1557_v12 = vcombine.low %v1548_v1, %v1555_v4  ;;  %v1279_v13 = vcombine.low %v668_v60, %v672_v61  ;;  %v1280_v14 = vcombine.low %v676_v2, %v680_v5  ;;  %v1281_v15 = vcombine.low %v684_v6, %v688_v7  ;;  %v435_v5 = vpop.xlane.xlu0 %434 }
  0xe2   : > { %1785 = vperm.xlu1 %2643, %v1278_v8   ;;  %v1564_v17 = vrot.slane %v1556_v9, %v2978_v49  ;;  %v1282_v18 = vcombine.low %v692_v10, %v696_v11  ;;  %v892_v63 = vrot.slane %v450_v3, %v2954_v39  ;;  %v896_v19 = vrot.slane %v450_v3, %v2957_v40 }
  0xe3   : > { %v1571_v20 = vrot.slane %v1557_v12, %v2978_v49  ;;  %v1289_v21 = vrot.slane %v1279_v13, %v2978_v49  ;;  %v1296_v22 = vrot.slane %v1280_v14, %v2978_v49  ;;  %v1303_v23 = vrot.slane %v1281_v15, %v2978_v49 }
  0xe4   : > { %v1310_v24 = vrot.slane %v1282_v18, %v2978_v49  ;;  %v900_v25 = vrot.slane %v450_v3, %v2960_v41  ;;  %v904_v26 = vrot.slane %v450_v3, %v2963_v42  ;;  %v908_v27 = vrot.slane %v450_v3, %v2966_v43 }
  0xe5   : > { %v1572_v28 = vcombine.low %v1564_v17, %v1571_v20  ;;  %v1311_v29 = vcombine.low %v1289_v21, %v1296_v22  ;;  %v912_v30 = vrot.slane %v450_v3, %v2969_v44  ;;  %v916_v16 = vrot.slane %v450_v3, %v2972_v45 }
  0xe6   : > { %v1312_v31 = vcombine.low %v1303_v23, %v1310_v24  ;;  %v920_v32 = vrot.slane %v450_v3, %v2975_v46  ;;  %v1622_v33 = vcombine.low %v892_v63, %v896_v19  ;;  %v1623_v35 = vcombine.low %v900_v25, %v904_v26 }
  0xe7   : > { %1803 = vperm.xlu0 %2642, %v1572_v28   ;;  %v1319_v36 = vrot.slane %v1311_v29, %v2978_v49  ;;  %v1624_v38 = vcombine.low %v908_v27, %v912_v30  ;;  %v700_v47 = vrot.slane %v3021_v53, %v2954_v39  ;;  %v704_v50 = vrot.slane %v3021_v53, %v2957_v40  ;;  %v441_v29 = vpop.xlane.xlu0 %440 }
  0xe8   : > { %v1326_v51 = vrot.slane %v1312_v31, %v2978_v49  ;;  %v1625_v52 = vcombine.low %v916_v16, %v920_v32  ;;  %v1632_v54 = vrot.slane %v1622_v33, %v2978_v49  ;;  %v1639_v55 = vrot.slane %v1623_v35, %v2978_v49 }
  0xe9   : > { %v1646_v56 = vrot.slane %v1624_v38, %v2978_v49  ;;  %v708_v57 = vrot.slane %v3021_v53, %v2960_v41  ;;  %v712_v58 = vrot.slane %v3021_v53, %v2963_v42  ;;  %v716_v59 = vrot.slane %v3021_v53, %v2966_v43 }
  0xea   : > { %v1327_v60 = vcombine.low %v1319_v36, %v1326_v51  ;;  %v1653_v61 = vrot.slane %v1625_v52, %v2978_v49  ;;  %v1654_v62 = vcombine.low %v1632_v54, %v1639_v55  ;;  %v720_v0 = vrot.slane %v3021_v53, %v2969_v44 }
  0xeb   : > { %v724_v1 = vrot.slane %v3021_v53, %v2972_v45  ;;  %v728_v2 = vrot.slane %v3021_v53, %v2975_v46  ;;  %v1328_v3 = vcombine.low %v700_v47, %v704_v50  ;;  %v1329_v4 = vcombine.low %v708_v57, %v712_v58 }
  0xec   : > { %1788 = vperm.xlu1 %2643, %v1327_v60   ;;  %v1655_v6 = vcombine.low %v1646_v56, %v1653_v61  ;;  %v1662_v7 = vrot.slane %v1654_v62, %v2978_v49  ;;  %v1330_v8 = vcombine.low %v716_v59, %v720_v0  ;;  %v956_v9 = vrot.slane %v456_v48, %v2954_v39 }
  0xed   : > { %v1331_v10 = vcombine.low %v724_v1, %v728_v2  ;;  %v1338_v11 = vrot.slane %v1328_v3, %v2978_v49  ;;  %v1345_v12 = vrot.slane %v1329_v4, %v2978_v49  ;;  %v960_v13 = vrot.slane %v456_v48, %v2957_v40  ;;  %v447_v2 = vpop.xlane.xlu0 %446 }
  0xee   : > { %v1669_v14 = vrot.slane %v1655_v6, %v2978_v49  ;;  %v1352_v53 = vrot.slane %v1330_v8, %v2978_v49  ;;  %v964_v15 = vrot.slane %v456_v48, %v2960_v41  ;;  %v968_v17 = vrot.slane %v456_v48, %v2963_v42 }
  0xef   : > { %v1359_v18 = vrot.slane %v1331_v10, %v2978_v49  ;;  %v1360_v63 = vcombine.low %v1338_v11, %v1345_v12  ;;  %v972_v19 = vrot.slane %v456_v48, %v2966_v43  ;;  %v976_v20 = vrot.slane %v456_v48, %v2969_v44 }
  0xf0   : > { %v1670_v21 = vcombine.low %v1662_v7, %v1669_v14  ;;  %v980_v22 = vrot.slane %v456_v48, %v2972_v45  ;;  %v984_v23 = vrot.slane %v456_v48, %v2975_v46  ;;  %v1720_v24 = vcombine.low %v956_v9, %v960_v13 }
  0xf1   : > { %v1361_v25 = vcombine.low %v1352_v53, %v1359_v18  ;;  %v1368_v26 = vrot.slane %v1360_v63, %v2978_v49  ;;  %v1721_v27 = vcombine.low %v964_v15, %v968_v17  ;;  %v1722_v28 = vcombine.low %v972_v19, %v976_v20 }
  0xf2   : > { %1809 = vperm.xlu0 %2642, %v1670_v21   ;;  %v1723_v30 = vcombine.low %v980_v22, %v984_v23  ;;  %v1730_v16 = vrot.slane %v1720_v24, %v2978_v49  ;;  %v732_v31 = vrot.slane %v435_v5, %v2954_v39  ;;  %v736_v32 = vrot.slane %v435_v5, %v2957_v40 }
  0xf3   : > { %v1375_v33 = vrot.slane %v1361_v25, %v2978_v49  ;;  %v1737_v35 = vrot.slane %v1721_v27, %v2978_v49  ;;  %v1744_v36 = vrot.slane %v1722_v28, %v2978_v49  ;;  %v740_v38 = vrot.slane %v435_v5, %v2960_v41 }
  0xf4   : > { %v1751_v47 = vrot.slane %v1723_v30, %v2978_v49  ;;  %v744_v50 = vrot.slane %v435_v5, %v2963_v42  ;;  %v748_v51 = vrot.slane %v435_v5, %v2966_v43  ;;  %v752_v52 = vrot.slane %v435_v5, %v2969_v44 }
  0xf5   : > { %v1376_v54 = vcombine.low %v1368_v26, %v1375_v33  ;;  %v1752_v55 = vcombine.low %v1730_v16, %v1737_v35  ;;  %v756_v48 = vrot.slane %v435_v5, %v2972_v45  ;;  %v760_v56 = vrot.slane %v435_v5, %v2975_v46  ;;  %v453_v26 = vpop.xlane.xlu0 %452 }
  0xf6   : > { %v1753_v57 = vcombine.low %v1744_v36, %v1751_v47  ;;  %v1377_v58 = vcombine.low %v732_v31, %v736_v32  ;;  %v1378_v59 = vcombine.low %v740_v38, %v744_v50  ;;  %v1379_v60 = vcombine.low %v748_v51, %v752_v52 }
  0xf7   : > { %1791 = vperm.xlu1 %2643, %v1376_v54   ;;  %v1760_v61 = vrot.slane %v1752_v55, %v2978_v49  ;;  %v1380_v62 = vcombine.low %v756_v48, %v760_v56  ;;  %v796_v0 = vrot.slane %v441_v29, %v2954_v39  ;;  %v800_v1 = vrot.slane %v441_v29, %v2957_v40 }
  0xf8   : > { %v1767_v3 = vrot.slane %v1753_v57, %v2978_v49  ;;  %v1387_v4 = vrot.slane %v1377_v58, %v2978_v49  ;;  %v1394_v6 = vrot.slane %v1378_v59, %v2978_v49  ;;  %v1401_v5 = vrot.slane %v1379_v60, %v2978_v49 }
  0xf9   : > { %v1408_v7 = vrot.slane %v1380_v62, %v2978_v49  ;;  %v804_v8 = vrot.slane %v441_v29, %v2960_v41  ;;  %v808_v9 = vrot.slane %v441_v29, %v2963_v42  ;;  %v812_v10 = vrot.slane %v441_v29, %v2966_v43 }
  0xfa   : > { %v1768_v11 = vcombine.low %v1760_v61, %v1767_v3  ;;  %v1409_v12 = vcombine.low %v1387_v4, %v1394_v6  ;;  %v816_v13 = vrot.slane %v441_v29, %v2969_v44  ;;  %v820_v14 = vrot.slane %v441_v29, %v2972_v45 }
  0xfb   : > { %v1410_v53 = vcombine.low %v1401_v5, %v1408_v7  ;;  %v824_v15 = vrot.slane %v441_v29, %v2975_v46  ;;  %v1475_v17 = vcombine.low %v796_v0, %v800_v1  ;;  %v1476_v18 = vcombine.low %v804_v8, %v808_v9 }
  0xfc   : > { %1815 = vperm.xlu0 %2642, %v1768_v11   ;;  %v1417_v63 = vrot.slane %v1409_v12, %v2978_v49  ;;  %v1477_v19 = vcombine.low %v812_v10, %v816_v13  ;;  %v860_v20 = vrot.slane %v447_v2, %v2954_v39  ;;  %v864_v21 = vrot.slane %v447_v2, %v2957_v40 }
  0xfd   : > { %v1424_v22 = vrot.slane %v1410_v53, %v2978_v49  ;;  %v1478_v23 = vcombine.low %v820_v14, %v824_v15  ;;  %v1485_v24 = vrot.slane %v1475_v17, %v2978_v49  ;;  %v1492_v25 = vrot.slane %v1476_v18, %v2978_v49 }
  0xfe   : > { %v1499_v27 = vrot.slane %v1477_v19, %v2978_v49  ;;  %v868_v28 = vrot.slane %v447_v2, %v2960_v41  ;;  %v872_v29 = vrot.slane %v447_v2, %v2963_v42  ;;  %v876_v30 = vrot.slane %v447_v2, %v2966_v43 }
  0xff   : > { %v1425_v16 = vcombine.low %v1417_v63, %v1424_v22  ;;  %v1506_v31 = vrot.slane %v1478_v23, %v2978_v49  ;;  %v1507_v32 = vcombine.low %v1485_v24, %v1492_v25  ;;  %v880_v33 = vrot.slane %v447_v2, %v2969_v44 }
 0x100   : > { %v884_v35 = vrot.slane %v447_v2, %v2972_v45  ;;  %v888_v36 = vrot.slane %v447_v2, %v2975_v46  ;;  %v1573_v38 = vcombine.low %v860_v20, %v864_v21  ;;  %v1574_v47 = vcombine.low %v868_v28, %v872_v29 }
 0x101   : > { %1794 = vperm.xlu1 %2643, %v1425_v16   ;;  %v1508_v50 = vcombine.low %v1499_v27, %v1506_v31  ;;  %v1515_v51 = vrot.slane %v1507_v32, %v2978_v49  ;;  %v1575_v52 = vcombine.low %v876_v30, %v880_v33  ;;  %v924_v54 = vrot.slane %v453_v26, %v2954_v39 }
 0x102   : > { %v1576_v55 = vcombine.low %v884_v35, %v888_v36  ;;  %v1583_v48 = vrot.slane %v1573_v38, %v2978_v49  ;;  %v1590_v56 = vrot.slane %v1574_v47, %v2978_v49  ;;  %v928_v57 = vrot.slane %v453_v26, %v2957_v40 }
 0x103   : > { %v1522_v58 = vrot.slane %v1508_v50, %v2978_v49  ;;  %v1597_v59 = vrot.slane %v1575_v52, %v2978_v49  ;;  %v932_v60 = vrot.slane %v453_v26, %v2960_v41  ;;  %v936_v61 = vrot.slane %v453_v26, %v2963_v42 }
 0x104   : > { %v1604_v62 = vrot.slane %v1576_v55, %v2978_v49  ;;  %v1605_v0 = vcombine.low %v1583_v48, %v1590_v56  ;;  %v940_v39 = vrot.slane %v453_v26, %v2966_v43  ;;  %v944_v1 = vrot.slane %v453_v26, %v2969_v44 }
 0x105   : > { %v1523_v2 = vcombine.low %v1515_v51, %v1522_v58  ;;  %v948_v3 = vrot.slane %v453_v26, %v2972_v45  ;;  %v952_v40 = vrot.slane %v453_v26, %v2975_v46  ;;  %v1671_v4 = vcombine.low %v924_v54, %v928_v57 }
 0x106   : > { %v1606_v6 = vcombine.low %v1597_v59, %v1604_v62  ;;  %v1613_v5 = vrot.slane %v1605_v0, %v2978_v49  ;;  %v1672_v7 = vcombine.low %v932_v60, %v936_v61  ;;  %v1673_v41 = vcombine.low %v940_v39, %v944_v1 }
 0x107   : > { %1800 = vperm.xlu1 %2643, %v1523_v2   ;;  %v1674_v42 = vcombine.low %v948_v3, %v952_v40  ;;  %v1681_v8 = vrot.slane %v1671_v4, %v2978_v49  ;;  %v3235_v19 = vand.u32 127, %v473_v34 }
 0x108   : > { %v1620_v9 = vrot.slane %v1606_v6, %v2978_v49  ;;  %v1688_v43 = vrot.slane %v1672_v7, %v2978_v49  ;;  %v1695_v44 = vrot.slane %v1673_v41, %v2978_v49 }
 0x109   : > { %v1702_v45 = vrot.slane %v1674_v42, %v2978_v49  ;;  %v1823_v20 = vadd.s32 4294967288, %v3235_v19  ;;  %v1830_v22 = vadd.s32 4294967280, %v3235_v19  ;;  %v1837_v23 = vadd.s32 4294967272, %v3235_v19 }
 0x10a   : > { %v1621_v10 = vcombine.low %v1613_v5, %v1620_v9  ;;  %v1703_v46 = vcombine.low %v1681_v8, %v1688_v43  ;;  %v1844_v24 = vadd.s32 4294967264, %v3235_v19  ;;  %v1851_v26 = vadd.s32 4294967256, %v3235_v19 }
 0x10b   : > { %v1704_v11 = vcombine.low %v1695_v44, %v1702_v45  ;;  %v1826_v25 = vsub.s32 %v1823_v20, %v2951_v37  ;;  %v1833_v28 = vsub.s32 %v1830_v22, %v2951_v37  ;;  %v1858_v29 = vadd.s32 4294967248, %v3235_v19 }
 0x10c   : > { %1806 = vperm.xlu1 %2643, %v1621_v10   ;;  %v1711_v12 = vrot.slane %v1703_v46, %v2978_v49  ;;  %v1821_v34 = vsub.s32 %v3235_v19, %v2951_v37  ;;  %v1840_v30 = vsub.s32 %v1837_v23, %v2951_v37  ;;  %v1865_v16 = vadd.s32 4294967240, %v3235_v19 }
 0x10d   : > { %v1718_v13 = vrot.slane %v1704_v11, %v2978_v49  ;;  %v1847_v32 = vsub.s32 %v1844_v24, %v2951_v37  ;;  %v1872_v33 = vadd.s32 4294967232, %v3235_v19  ;;  %v1854_v36 = vsub.s32 %v1851_v26, %v2951_v37 }
 0x10e   : > { %v1861_v50 = vsub.s32 %v1858_v29, %v2951_v37  ;;  %v1868_v54 = vsub.s32 %v1865_v16, %v2951_v37  ;;  %v1886_v56 = vadd.s32 4294967216, %v3235_v19  ;;  %v1879_v58 = vadd.s32 4294967224, %v3235_v19  ;;  %v407_v16 = vld [vmem:[#allocation2] sm:$0x1] }
 0x10f   : > { %v1719_v14 = vcombine.low %v1711_v12, %v1718_v13  ;;  %v1875_v48 = vsub.s32 %v1872_v33, %v2951_v37  ;;  %v1893_v39 = vadd.s32 4294967208, %v3235_v19  ;;  %v1900_v7 = vadd.s32 4294967200, %v3235_v19 }
 0x110   : > { %v1889_v4 = vsub.s32 %v1886_v56, %v2951_v37  ;;  %v1882_v6 = vsub.s32 %v1879_v58, %v2951_v37  ;;  %v1907_v9 = vadd.s32 4294967192, %v3235_v19  ;;  %v1914_v12 = vadd.s32 4294967184, %v3235_v19 }
 0x111   : > { %1812 = vperm.xlu1 %2643, %v1719_v14   ;;  %v1896_v10 = vsub.s32 %v1893_v39, %v2951_v37  ;;  %v1903_v46 = vsub.s32 %v1900_v7, %v2951_v37  ;;  %v1921_v13 = vadd.s32 4294967176, %v3235_v19 }
 0x112   : > { %v1917_v20 = vsub.s32 %v1914_v12, %v2951_v37 }
 0x142   : > { %v1771_v27 = vpop.permute.xlu0 %1770 }
 0x143   : > { %v1822_v51 = vrot.slane %v1771_v27, %v1821_v34 }
 0x148   : > { %v1774_v53 = vpop.permute.xlu1 %1773 }
 0x149   : > { %v1827_v35 = vrot.slane %v1774_v53, %v1826_v25 }
 0x14b   : > { %v1829_v57 = vsel %vm1828_vm1, %v1827_v35, %v1822_v51 }
 0x14c   : > { %v1777_v15 = vpop.permute.xlu1 %1776 }
 0x14d   : > { %v1834_v38 = vrot.slane %v1777_v15, %v1833_v28 }
 0x14f   : > { %v1836_v61 = vsel %vm1835_vm2, %v1834_v38, %v1829_v57 }
 0x151   : > { %v1780_v17 = vpop.permute.xlu1 %1779 }
 0x152   : > { %v1841_v52 = vrot.slane %v1780_v17, %v1840_v30 }
 0x154   : > { %v1843_v0 = vsel %vm1842_vm3, %v1841_v52, %v1836_v61 }
 0x156   : > { %v1783_v18 = vpop.permute.xlu1 %1782 }
 0x157   : > { %v1848_v55 = vrot.slane %v1783_v18, %v1847_v32  ;;  %v1910_v18 = vsub.s32 %v1907_v9, %v2951_v37 }
 0x159   : > { %v1850_v2 = vsel %vm1849_vm4, %v1848_v55, %v1843_v0 }
 0x15c   : > { %v1798_v47 = vpop.permute.xlu0 %1797 }
 0x15d   : > { %v1883_v45 = vrot.slane %v1798_v47, %v1882_v6 }
 0x161   : > { %v1786_v63 = vpop.permute.xlu1 %1785 }
 0x162   : > { %v1855_v59 = vrot.slane %v1786_v63, %v1854_v36 }
 0x164   : > { %v1857_v5 = vsel %vm1856_vm5, %v1855_v59, %v1850_v2 }
 0x166   : > { %v1804_v3 = vpop.permute.xlu0 %1803 }
 0x167   : > { %v1897_v17 = vrot.slane %v1804_v3, %v1896_v10 }
 0x16b   : > { %v1789_v21 = vpop.permute.xlu1 %1788 }
 0x16c   : > { %v1862_v62 = vrot.slane %v1789_v21, %v1861_v50  ;;  %v1924_v21 = vsub.s32 %v1921_v13, %v2951_v37 }
 0x16e   : > { %v1864_v41 = vsel %vm1863_vm6, %v1862_v62, %v1857_v5 }
 0x171   : > { %v1810_v11 = vpop.permute.xlu0 %1809 }
 0x172   : > { %v1911_v25 = vrot.slane %v1810_v11, %v1910_v18 }
 0x176   : > { %v1792_v31 = vpop.permute.xlu1 %1791 }
 0x177   : > { %v1869_v1 = vrot.slane %v1792_v31, %v1868_v54 }
 0x179   : > { %v1871_v42 = vsel %vm1870_vm7, %v1869_v1, %v1864_v41 }
 0x17b   : > { %v1816_v23 = vpop.permute.xlu0 %1815 }
 0x17c   : > { %v1925_v27 = vrot.slane %v1816_v23, %v1924_v21 }
 0x180   : > { %v1795_v60 = vpop.permute.xlu1 %1794 }
 0x181   : > { %v1876_v40 = vrot.slane %v1795_v60, %v1875_v48 }
 0x183   : > { %v1878_v43 = vsel %vm1877_vm8, %v1876_v40, %v1871_v42 }
 0x184   : > { %v1885_v14 = vsel %vm1884_vm9, %v1883_v45, %v1878_v43 }
 0x186   : > { %v1801_v8 = vpop.permute.xlu1 %1800 }
 0x187   : > { %v1890_v44 = vrot.slane %v1801_v8, %v1889_v4 }
 0x189   : > { %v1892_v53 = vsel %vm1891_vm10, %v1890_v44, %v1885_v14 }
 0x18a   : > { %v1899_v22 = vsel %vm1898_vm11, %v1897_v17, %v1892_v53 }
 0x18b   : > { %v1807_v15 = vpop.permute.xlu1 %1806 }
 0x18c   : > { %v1904_v63 = vrot.slane %v1807_v15, %v1903_v46 }
 0x18e   : > { %v1906_v24 = vsel %vm1905_vm12, %v1904_v63, %v1899_v22 }
 0x18f   : > { %v1913_v28 = vsel %vm1912_vm13, %v1911_v25, %v1906_v24 }
 0x190   : > { %v1813_v19 = vpop.permute.xlu1 %1812 }
 0x191   : > { %v1918_v26 = vrot.slane %v1813_v19, %v1917_v20 }
 0x193   : > { %v1920_v29 = vsel %vm1919_vm14, %v1918_v26, %v1913_v28 }
 0x194   : > { %v1927_v34 = vsel %vm1926_vm15, %v1925_v27, %v1920_v29 }
 0x195   : > { %v1934_v30 = vrot.slane %v1927_v34, %v2978_v49 }
 0x197   : > { %v1941_v31 = vrot.slane %v1934_v30, %v2978_v49 }
 0x199   : > { %v1943_v32 = vadd.f32 %v1941_v31, %v407_v16 }
 0x19b   : > { %1944 = vst [vmem:[#allocation2] sm:$0x1] %v1943_v32 }
 0x19c PF: > { %1946 = sbr.rel (!%p381_p13) target bundleno = 904 (0x388), region = 52  ;;  %v1948_v37 = vld [vmem:[%s3488_s1] sm:$0xff] (%p381_p13)  ;;  %v1949_v33 = vld [vmem:[%s3488_s1 + $0x8] sm:$0xff] (%p381_p13)  ;;  %v1950_v35 = vld [vmem:[%s3488_s1 + $0x10] sm:$0xff] (%p381_p13)  ;;  %v2783_v36 = vmov (%p381_p13), 0.0|0.0   ;;  %vm2784_vm0 = vmmov (%p381_p13), 0   ;;  %v2046_v15 = vlaneseq (%p381_p13) }
 0x19d   : > { %2528 = vmatprep.subr.bf16.mxu0 (%p381_p13), %v2783_v36  ;;  %v2529_v49 = vpack.c.bf16 (%p381_p13), %v1949_v33, %v1948_v37  ;;  %v1951_v38 = vld [vmem:[%s3488_s1 + $0x18] sm:$0xff] (%p381_p13)  ;;  %v2785_v47 = vmov (%p381_p13), 0.0   ;;  %v1952_v51 = vld [vmem:[%s3488_s1 + $0x20] sm:$0xff] (%p381_p13)  ;;  %v1953_v52 = vld [vmem:[%s3488_s1 + $0x28] sm:$0xff] (%p381_p13)  ;;  %vm2056_vm1 = vcmask (%p381_p13), 261120   ;;  %s3506_s9 = scalar_lea.vmem (%p381_p13), [#allocation4], %s2898_s18 }
 0x19e   : > { %2525 = vmatprep.mubr.msk.f32.mxu0 (%p381_p13), %vm2784_vm0, %v2785_v47  ;;  %2124 = vmatprep.mubr.f32.mxu1 (%p381_p13), %v2785_v47  ;;  %v2532_v50 = vpack.c.bf16 (%p381_p13), %v1951_v38, %v1950_v35  ;;  %v2037_v54 = vld [vmem:[%s3490_s3 + $0x8] sm:$0xff] (%p381_p13)  ;;  %v2039_v55 = vld [vmem:[%s3490_s3 + $0x18] sm:$0xff] (%p381_p13)  ;;  %v2036_v48 = vld [vmem:[%s3490_s3] sm:$0xff] (%p381_p13)  ;;  %v2535_v57 = vpack.c.bf16 (%p381_p13), %v1953_v52, %v1952_v51  ;;  %v2047_v17 = vshrl.u32 (%p381_p13), %v2046_v15, 7  ;;  %s3507_s10 = scalar_lea.vmem (%p381_p13), [#allocation6], %s2898_s18 }
 0x19f   : > { %2530 = vmatpush3.bf16.msra.mxu0 (%p381_p13), %v2529_v49  ;;  %v2038_v56 = vld [vmem:[%s3490_s3 + $0x10] sm:$0xff] (%p381_p13)  ;;  %v2552_v58 = vpack.c.bf16 (%p381_p13), %v2039_v55, %v2037_v54  ;;  %v1955_v61 = vld [vmem:[%s3488_s1 + $0x38] sm:$0xff] (%p381_p13)  ;;  %v1956_v0 = vld [vmem:[%s3488_s1 + $0x40] sm:$0xff] (%p381_p13) }
 0x1a0   : > { %2531 = vmatprep.subr.bf16.mxu0 (%p381_p13), %v2783_v36  ;;  %v2554_v59 = vpack.c.bf16 (%p381_p13), %v2038_v56, %v2036_v48  ;;  %v1954_v60 = vld [vmem:[%s3488_s1 + $0x30] sm:$0xff] (%p381_p13)  ;;  %v1957_v39 = vld [vmem:[%s3488_s1 + $0x48] sm:$0xff] (%p381_p13)  ;;  %v1959_v3 = vld [vmem:[%s3488_s1 + $0x58] sm:$0xff] (%p381_p13)  ;;  %v2048_v18 = vsub.s32 (%p381_p13), 0, %v2047_v17  ;;  %v2052_v20 = vsub.s32 (%p381_p13), 1, %v2047_v17 }
 0x1a1   : > { %2553 = vmatprep.subr.bf16.mxu1 (%p381_p13), %v2552_v58  ;;  %v2538_v62 = vpack.c.bf16 (%p381_p13), %v1955_v61, %v1954_v60  ;;  %v2541_v1 = vpack.c.bf16 (%p381_p13), %v1957_v39, %v1956_v0  ;;  %v1958_v2 = vld [vmem:[%s3488_s1 + $0x50] sm:$0xff] (%p381_p13)  ;;  %v1960_v4 = vld [vmem:[%s3488_s1 + $0x60] sm:$0xff] (%p381_p13)  ;;  %v1961_v6 = vld [vmem:[%s3488_s1 + $0x68] sm:$0xff] (%p381_p13) }
 0x1a2   : > { %2555 = vmatpush1.bf16.msra.mxu1 (%p381_p13), %v2554_v59  ;;  %v2544_v40 = vpack.c.bf16 (%p381_p13), %v1959_v3, %v1958_v2  ;;  %v2547_v5 = vpack.c.bf16 (%p381_p13), %v1961_v6, %v1960_v4  ;;  %v1962_v7 = vld [vmem:[%s3488_s1 + $0x70] sm:$0xff] (%p381_p13)  ;;  %v1963_v41 = vld [vmem:[%s3488_s1 + $0x78] sm:$0xff] (%p381_p13)  ;;  %v1947_v8 = vld [vmem:[#allocation2] sm:$0x1] (%p381_p13) }
 0x1a3   : > { %2533 = vmatpush3.bf16.msra.mxu0 %v2532_v50  ;;  %v2550_v42 = vpack.c.bf16 %v1963_v41, %v1962_v7  ;;  %v2041_v9 = vld [vmem:[%s3490_s3 + $0x28] sm:$0xff]  ;;  %v2043_v43 = vld [vmem:[%s3490_s3 + $0x38] sm:$0xff]  ;;  %v2040_v45 = vld [vmem:[%s3490_s3 + $0x20] sm:$0xff] }
 0x1a4   : > { %2534 = vmatprep.subr.bf16.mxu0 %v2783_v36  ;;  %v2556_v44 = vpack.c.bf16 %v2043_v43, %v2041_v9  ;;  %v2042_v10 = vld [vmem:[%s3490_s3 + $0x30] sm:$0xff]  ;;  %v1964_v11 = vld [vmem:[%s3489_s2] sm:$0x1] }
 0x1a5   : > { %v2558_v46 = vpack.c.bf16 %v2042_v10, %v2040_v45  ;;  %v2044_v63 = vld [vmem:[%s3491_s4] sm:$0x3] }
 0x1a6   : > { %2557 = vmatprep.subr.bf16.mxu1 %v2556_v44  ;;  %v2049_v21 = vrot.slane %v2044_v63, %v2048_v18  ;;  %v2053_v22 = vrot.slane %v2044_v63, %v2052_v20 }
 0x1a7   : > { %2536 = vmatpush3.bf16.msra.mxu0 %v2535_v57  ;;  %2559 = vmatpush1.bf16.msra.mxu1 %v2558_v46 }
 0x1a8   : > { %2537 = vmatprep.subr.bf16.mxu0 %v2783_v36 }
 0x1ab   : > { %2539 = vmatpush3.bf16.msra.mxu0 %v2538_v62 }
 0x1ac   : > { %2540 = vmatprep.subr.bf16.mxu0 %v2783_v36 }
 0x1af   : > { %2542 = vmatpush3.bf16.msra.mxu0 %v2541_v1 }
 0x1b0   : > { %2543 = vmatprep.subr.bf16.mxu0 %v2783_v36 }
 0x1b3   : > { %2545 = vmatpush3.bf16.msra.mxu0 %v2544_v40 }
 0x1b4   : > { %2546 = vmatprep.subr.bf16.mxu0 %v2783_v36 }
 0x1b7   : > { %2548 = vmatpush3.bf16.msra.mxu0 %v2547_v5 }
 0x1b8   : > { %2549 = vmatprep.subr.bf16.mxu0 %v2783_v36 }
 0x1bb   : > { %2551 = vmatpush3.bf16.msra.mxu0 %v2550_v42 }
 0x1be   : > { %2526 = vmatmul.mubr.f32.vlgmr.msra.gmra.mrb[0].mxu0 %v1947_v8 }
 0x291   : > { %v2031_v12 = vpop.f32.mrb[0].mxu0 }
 0x292   : > { %v2032_v13 = vadd.f32 %v2031_v12, %v1964_v11  ;;  %v2527_v14 = vpop.f32.mrb[1].mxu0 }
 0x294   : > { %v2035_v53 = vmax.f32 %v2032_v13, 0.0 }
 0x296   : > { %2464 = vmatmul.mubr.msk.f32.vlgmr.msra.gmra.mrb[0].mxu1 %vm2056_vm1, %v2035_v53 }
 0x369   : > { %v2126_v23 = vpop.f32.mrb[0].mxu1 }
 0x36a   : > { %v2127_v24 = vadd.f32 %v2126_v23, %v2049_v21  ;;  %v2128_v25 = vpop.f32.mrb[1].mxu1 }
 0x36b   : > { %v2129_v19 = vadd.f32 %v2128_v25, %v2053_v22 }
 0x36c   : > { %v2465_v26 = vmul.f32 -1.442695, %v2127_v24 }
 0x36d   : > { %v2466_v27 = vmul.f32 -1.442695, %v2129_v19 }
 0x36e   : > { %2644 = vpow2.f32 %v2465_v26 }
 0x36f   : > { %2646 = vpow2.f32 %v2466_v27 }
 0x378   : > { %v2645_v28 = vpop.eup %2644 }
 0x379   : > { %v2647_v29 = vpop.eup %2646  ;;  %v2137_v34 = vadd.f32 1.0, %v2645_v28 }
 0x37a   : > { %v2138_v30 = vadd.f32 1.0, %v2647_v29 }
 0x37b   : > { %2648 = vrcp.f32 %v2137_v34 }
 0x37c   : > { %2650 = vrcp.f32 %v2138_v30 }
 0x385   : > { %v2649_v16 = vpop.eup %2648 }
 0x386   : > { %v2651_v31 = vpop.eup %2650  ;;  %2143 = vst [vmem:[#allocation3] sm:$0x1] %v2649_v16  ;;  %2144 = vst [vmem:[%s3506_s9] sm:$0x1] %v2649_v16 }
 0x387   : > { %2145 = vst [vmem:[%s3507_s10] sm:$0x1] %v2651_v31 }
 0x388 PF: > { %p2467_p1 = scmp.ne.s32.totalorder %s2762_s27, 1 }
 0x389   : > { %v2152_v37 = vld [vmem:[%s2906_s23 + $0x10] sm:$0xff] (!%p2467_p1)  ;;  %v2150_v33 = vld [vmem:[%s2906_s23] sm:$0xff] (!%p2467_p1)  ;;  %vm2250_vm2 = vcmask (!%p2467_p1), 523264   ;;  %v2153_v47 = vld [vmem:[%s2906_s23 + $0x18] sm:$0xff] (!%p2467_p1) }
 0x38a   : > { %2149 = sbr.rel (%p2467_p1) target bundleno = 1056 (0x420), region = 56  ;;  %v2151_v50 = vld [vmem:[%s2906_s23 + $0x8] sm:$0xff] (!%p2467_p1)  ;;  %v2154_v56 = vld [vmem:[%s2906_s23 + $0x20] sm:$0xff] (!%p2467_p1)  ;;  %v2157_v61 = vld [vmem:[%s2906_s23 + $0x38] sm:$0xff] (!%p2467_p1) }
 0x38b   : > { %v2155_v48 = vld [vmem:[%s2906_s23 + $0x28] sm:$0xff] (!%p2467_p1)  ;;  %v2156_v62 = vld [vmem:[%s2906_s23 + $0x30] sm:$0xff] (!%p2467_p1)  ;;  %v2158_v40 = vld [vmem:[%s2906_s23 + $0x40] sm:$0xff] (!%p2467_p1) }
 0x38c   : > { %v2159_v3 = vld [vmem:[%s2906_s23 + $0x48] sm:$0xff] (!%p2467_p1)  ;;  %v2161_v41 = vld [vmem:[%s2906_s23 + $0x58] sm:$0xff] (!%p2467_p1)  ;;  %v2160_v42 = vld [vmem:[%s2906_s23 + $0x50] sm:$0xff] (!%p2467_p1) }
 0x38d   : > { %v2468_v32 = vld [vmem:[#allocation3] ss:$0 sm:$0xff] (!%p2467_p1)  ;;  %v2163_v45 = vld [vmem:[%s2906_s23 + $0x68] sm:$0xff] (!%p2467_p1)  ;;  %v2165_v14 = vld [vmem:[%s2906_s23 + $0x78] sm:$0xff] (!%p2467_p1) }
 0x38e   : > { %2180 = vbcast.lane.b32.xlu1 (!%p2467_p1), %v2468_v32, 272  ;;  %2172 = vbcast.lane.b32.xlu0 (!%p2467_p1), %v2468_v32, 256  ;;  %v2162_v10 = vld [vmem:[%s2906_s23 + $0x60] sm:$0xff] (!%p2467_p1)  ;;  %v2164_v53 = vld [vmem:[%s2906_s23 + $0x70] sm:$0xff] (!%p2467_p1) }
 0x392   : > { %2184 = vbcast.lane.b32.xlu1 %v2468_v32, 280  ;;  %2176 = vbcast.lane.b32.xlu0 %v2468_v32, 264 }
 0x396   : > { %2192 = vbcast.lane.b32.xlu1 %v2468_v32, 296  ;;  %2188 = vbcast.lane.b32.xlu0 %v2468_v32, 288 }
 0x39a   : > { %2200 = vbcast.lane.b32.xlu1 %v2468_v32, 312  ;;  %2196 = vbcast.lane.b32.xlu0 %v2468_v32, 304 }
 0x39e   : > { %2208 = vbcast.lane.b32.xlu1 %v2468_v32, 328  ;;  %2204 = vbcast.lane.b32.xlu0 %v2468_v32, 320 }
 0x3a2   : > { %2216 = vbcast.lane.b32.xlu1 %v2468_v32, 344  ;;  %2212 = vbcast.lane.b32.xlu0 %v2468_v32, 336 }
 0x3a6   : > { %2224 = vbcast.lane.b32.xlu1 %v2468_v32, 360  ;;  %2220 = vbcast.lane.b32.xlu0 %v2468_v32, 352 }
 0x3aa   : > { %2232 = vbcast.lane.b32.xlu1 %v2468_v32, 376  ;;  %2228 = vbcast.lane.b32.xlu0 %v2468_v32, 368 }
 0x400   : > { %v2181_v35 = vpop.permute.xlu1 %2180  ;;  %v2173_v36 = vpop.permute.xlu0 %2172 }
 0x401   : > { %v2236_v49 = vmul.f32 %v2181_v35, %v2152_v37  ;;  %v2234_v38 = vmul.f32 %v2173_v36, %v2150_v33 }
 0x403   : > { %2253 = vst.msk [vmem:[%s2911_s15 + $0x10] sm:$0xff] %vm2250_vm2, %v2236_v49  ;;  %2251 = vst.msk [vmem:[%s2911_s15] sm:$0xff] %vm2250_vm2, %v2234_v38 }
 0x404   : > { %v2185_v51 = vpop.permute.xlu1 %2184  ;;  %v2177_v52 = vpop.permute.xlu0 %2176 }
 0x405   : > { %v2237_v54 = vmul.f32 %v2185_v51, %v2153_v47  ;;  %v2235_v55 = vmul.f32 %v2177_v52, %v2151_v50 }
 0x407   : > { %2254 = vst.msk [vmem:[%s2911_s15 + $0x18] sm:$0xff] %vm2250_vm2, %v2237_v54  ;;  %2252 = vst.msk [vmem:[%s2911_s15 + $0x8] sm:$0xff] %vm2250_vm2, %v2235_v55 }
 0x408   : > { %v2193_v57 = vpop.permute.xlu1 %2192  ;;  %v2189_v58 = vpop.permute.xlu0 %2188 }
 0x409   : > { %v2239_v59 = vmul.f32 %v2193_v57, %v2155_v48  ;;  %v2238_v60 = vmul.f32 %v2189_v58, %v2154_v56 }
 0x40b   : > { %2256 = vst.msk [vmem:[%s2911_s15 + $0x28] sm:$0xff] %vm2250_vm2, %v2239_v59  ;;  %2255 = vst.msk [vmem:[%s2911_s15 + $0x20] sm:$0xff] %vm2250_vm2, %v2238_v60 }
 0x40c   : > { %v2201_v0 = vpop.permute.xlu1 %2200  ;;  %v2197_v39 = vpop.permute.xlu0 %2196 }
 0x40d   : > { %v2241_v1 = vmul.f32 %v2201_v0, %v2157_v61  ;;  %v2240_v2 = vmul.f32 %v2197_v39, %v2156_v62 }
 0x40f   : > { %2258 = vst.msk [vmem:[%s2911_s15 + $0x38] sm:$0xff] %vm2250_vm2, %v2241_v1  ;;  %2257 = vst.msk [vmem:[%s2911_s15 + $0x30] sm:$0xff] %vm2250_vm2, %v2240_v2 }
 0x410   : > { %v2209_v4 = vpop.permute.xlu1 %2208  ;;  %v2205_v6 = vpop.permute.xlu0 %2204 }
 0x411   : > { %v2243_v5 = vmul.f32 %v2209_v4, %v2159_v3  ;;  %v2242_v7 = vmul.f32 %v2205_v6, %v2158_v40 }
 0x413   : > { %2260 = vst.msk [vmem:[%s2911_s15 + $0x48] sm:$0xff] %vm2250_vm2, %v2243_v5  ;;  %2259 = vst.msk [vmem:[%s2911_s15 + $0x40] sm:$0xff] %vm2250_vm2, %v2242_v7 }
 0x414   : > { %v2217_v8 = vpop.permute.xlu1 %2216  ;;  %v2213_v9 = vpop.permute.xlu0 %2212 }
 0x415   : > { %v2245_v43 = vmul.f32 %v2217_v8, %v2161_v41  ;;  %v2244_v44 = vmul.f32 %v2213_v9, %v2160_v42 }
 0x417   : > { %2262 = vst.msk [vmem:[%s2911_s15 + $0x58] sm:$0xff] %vm2250_vm2, %v2245_v43  ;;  %2261 = vst.msk [vmem:[%s2911_s15 + $0x50] sm:$0xff] %vm2250_vm2, %v2244_v44 }
 0x418   : > { %v2225_v46 = vpop.permute.xlu1 %2224  ;;  %v2221_v11 = vpop.permute.xlu0 %2220 }
 0x419   : > { %v2247_v12 = vmul.f32 %v2225_v46, %v2163_v45  ;;  %v2246_v13 = vmul.f32 %v2221_v11, %v2162_v10 }
 0x41b   : > { %2264 = vst.msk [vmem:[%s2911_s15 + $0x68] sm:$0xff] %vm2250_vm2, %v2247_v12  ;;  %2263 = vst.msk [vmem:[%s2911_s15 + $0x60] sm:$0xff] %vm2250_vm2, %v2246_v13 }
 0x41c   : > { %v2233_v15 = vpop.permute.xlu1 %2232  ;;  %v2229_v17 = vpop.permute.xlu0 %2228 }
 0x41d   : > { %v2249_v18 = vmul.f32 %v2233_v15, %v2165_v14  ;;  %v2248_v63 = vmul.f32 %v2229_v17, %v2164_v53 }
 0x41f   : > { %2266 = vst.msk [vmem:[%s2911_s15 + $0x78] sm:$0xff] %vm2250_vm2, %v2249_v18  ;;  %2265 = vst.msk [vmem:[%s2911_s15 + $0x70] sm:$0xff] %vm2250_vm2, %v2248_v63 }
 0x420 PF: > { %s2469_s27 = sshll.u32 %s2766_s28, 4  ;;  %s3508_s19 = scalar_lea.vmem [#allocation4], %s2898_s18 }
 0x421   : > { %s3410_s16 = scalar_lea.hbm %s3493_s6, %s2469_s27  ;;  %s2299_s20 = sshll.u32 %s3508_s19, 4  ;;  %s2300_s20 = int_to_ptr.vmem [resolvable:$true] %s2299_s20 }
 0x422   : > { %s2278_s21 = scalar_lea.sflag [#allocation5], %s2898_s18  ;;  %s2652_s22 = scalar_lea.vmem %s2300_s20, 16 }
 0x423   : > { %p2653_p2 = scmp.ne.s32.totalorder %s2300_s20, %s2652_s22  ;;  %s2786_s15 = smov [#allocation4]  }
 0x424   : > { %s2656_s0 = sshll.u32 %s2786_s15, 4  ;;  %s2657_s0 = int_to_ptr.vmem [resolvable:$false] %s2656_s0 }
 0x425   : > { %p2654_p4 = pnand %p2653_p2, %p2877_p3  ;;  %s2658_s5 = scalar_lea.vmem %s2657_s0, 32 }
 0x426   : > { %p2659_p6 = scmp.lt.s32.totalorder %s2300_s20, %s2657_s0  ;;  %p2660_p7 = scmp.lt.s32.totalorder %s2658_s5, %s2652_s22 }
 0x427   : > { %p2655_p5 = pneg %p2654_p4 }
 0x428   : > { %p2661_p8 = por %p2660_p7, %p2659_p6 }
 0x42a   : > { %p2662_p10 = pnand %p2661_p8, %p2655_p5 }
 0x42c   : > { %2665 = shalt.err (!%p2662_p10)
}
 0x42d   : > { %s2666_s30 = scalar_lea.hbm %s3410_s16, 16  ;;  %s2670_s10 = scalar_lea.hbm %s3493_s6, 32 }
 0x42e   : > { %p2667_p11 = scmp.ne.s32.totalorder %s3410_s16, %s2666_s30  ;;  %p2671_p0 = scmp.lt.u32.totalorder %s3410_s16, %s3493_s6 }
 0x42f   : > { %p2672_p1 = scmp.lt.u32.totalorder %s2670_s10, %s2666_s30  ;;  %p2674_p4 = scmp.lt.u32.totalorder %s2666_s30, %s3410_s16 }
 0x430   : > { %p2668_p12 = pnand %p2667_p11, %p2877_p3 }
 0x431   : > { %p2673_p2 = por %p2672_p1, %p2671_p0 }
 0x432   : > { %p2669_p13 = pneg %p2668_p12 }
 0x433   : > { %p2675_p5 = por %p2674_p4, %p2673_p2 }
 0x435   : > { %p2676_p6 = pnand %p2675_p5, %p2669_p13 }
 0x437   : > { %2679 = shalt.err (!%p2676_p6)
}
 0x438   : > { %2560 = dma.vmem_to_hbm [thread:$0]  (%p2877_p3), %s2300_s20, 16, %s3410_s16, %s2278_s21  }
 0x439   : > { %s3437_s15 = scalar_lea.hbm %s3494_s7, %s2469_s27  ;;  %s3509_s0 = scalar_lea.vmem [#allocation6], %s2898_s18 }
 0x43a   : > { %s2312_s5 = sshll.u32 %s3509_s0, 4  ;;  %s2282_s30 = scalar_lea.sflag [#allocation7], %s2898_s18  ;;  %s2313_s5 = int_to_ptr.vmem [resolvable:$true] %s2312_s5 }
 0x43b   : > { %s2680_s11 = scalar_lea.vmem %s2313_s5, 16  ;;  %s2787_s9 = smov [#allocation6]  }
 0x43c   : > { %p2681_p7 = scmp.ne.s32.totalorder %s2313_s5, %s2680_s11  ;;  %s2684_s10 = sshll.u32 %s2787_s9, 4  ;;  %s2685_s10 = int_to_ptr.vmem [resolvable:$false] %s2684_s10 }
 0x43d   : > { %s2686_s23 = scalar_lea.vmem %s2685_s10, 32  ;;  %p2687_p11 = scmp.lt.s32.totalorder %s2313_s5, %s2685_s10 }
 0x43e   : > { %p2682_p8 = pnand %p2681_p7, %p2877_p3  ;;  %p2688_p12 = scmp.lt.s32.totalorder %s2686_s23, %s2680_s11 }
 0x440   : > { %p2683_p10 = pneg %p2682_p8  ;;  %p2689_p13 = por %p2688_p12, %p2687_p11 }
 0x442   : > { %p2690_p0 = pnand %p2689_p13, %p2683_p10 }
 0x444   : > { %2693 = shalt.err (!%p2690_p0)
}
 0x445   : > { %s2694_s28 = scalar_lea.hbm %s3437_s15, 16  ;;  %s2698_s16 = scalar_lea.hbm %s3494_s7, 32 }
 0x446   : > { %p2695_p1 = scmp.ne.s32.totalorder %s3437_s15, %s2694_s28  ;;  %p2699_p5 = scmp.lt.u32.totalorder %s3437_s15, %s3494_s7 }
 0x447   : > { %p2700_p6 = scmp.lt.u32.totalorder %s2698_s16, %s2694_s28  ;;  %p2702_p8 = scmp.lt.u32.totalorder %s2694_s28, %s3437_s15 }
 0x448   : > { %p2696_p2 = pnand %p2695_p1, %p2877_p3 }
 0x449   : > { %p2701_p7 = por %p2700_p6, %p2699_p5 }
 0x44a   : > { %p2697_p4 = pneg %p2696_p2 }
 0x44b   : > { %p2703_p10 = por %p2702_p8, %p2701_p7 }
 0x44d   : > { %p2704_p11 = pnand %p2703_p10, %p2697_p4 }
 0x44f   : > { %2707 = shalt.err (!%p2704_p11)
}
 0x450   : > { %2561 = dma.vmem_to_hbm [thread:$0]  (%p2877_p3), %s2313_s5, 16, %s3437_s15, %s2282_s30  }
 0x451 PF: > { %p2571_p12 = scmp.ge.s32.totalorder %s2778_s8, 2  ;;  %s2337_s12 = sand.u32 1, %s2750_s24  }
 0x452   : > { %s2338_s19 = scalar_lea.sflag [#allocation5], %s2337_s12 }
 0x453   : > { %p2565_p13 = pnand %p2571_p12, %p2887_p9 }
 0x455   : > { %2741 = dma.done.wait (!%p2565_p13), %s2338_s19, 16  }
 0x456   : > { %2743 = vsyncadd (!%p2565_p13), %s2338_s19, 4294967280  ;;  %s2346_s22 = scalar_lea.sflag [#allocation7], %s2337_s12 }
 0x457   : > { %2745 = dma.done.wait (!%p2565_p13), %s2346_s22, 16  }
 0x458   : > { %2747 = vsyncadd (!%p2565_p13), %s2346_s22, 4294967280  ;;  %s24_s8 = sadd.s32 1, %s2778_s8   ;;  %s3510_s28 = sld [smem:[#allocation10_spill]] }
 0x459   : > { %p21_p0 = scmp.ge.s32.totalorder %s24_s8, 6   ;;  %s3511_s13 = sld [smem:[#allocation11_spill]] }
 0x45a   : > { %s3512_s30 = sld [smem:[#allocation12_spill]]  ;;  %s3513_s24 = smov %s2754_s25 }
 0x45b   : > { %s3514_s25 = smov %s2758_s26  ;;  %s3515_s26 = smov %s2895_s17 }
 0x45c   : > { %s3516_s27 = smov %s2770_s29  ;;  %23 = sbr.rel (!%p21_p0) target bundleno = 10 (0xa), region = 120 }
 0x45f   : > { %s3517_s29 = smov %s3511_s13 }
 0x463   :  { %2350 = vsyncpa [#allocation5], 1 }
 0x464   :  { %2352 = vsyncpa [#allocation5 + $0x1], 1 }
 0x465   :  { %2353 = vsyncpa [#allocation7], 1 }
 0x466   :  { %2355 = vsyncpa [#allocation7 + $0x1], 1 }

</bundles_post_ra>
